<compile_context>
chip_gen: v6e
topology: v6e:2x2x1
jax: 0.10.0
libtpu: 0.0.40
codegen_flags: <defaults>
</compile_context>

<pallas_src>
import functools

import jax
import jax.numpy as jnp
from jax.experimental import pallas as pl
from jax.experimental.pallas import tpu as pltpu


# --------------------------------------------------------------------------
# Fused forward kernel (one grid step = one packed graph of N nodes)
#   h = x @ W_fc + b_fc                            (if dim_in != dim_hidden)
#   for each single-head GAT layer l (DGL semantics, slope 0.2, + bias):
#       hx = h @ Wc_l (+ add0 for l == 0)          Wc_l = [W_l | W_l a_l | W_l a_r | 0-pad]
#       hp, el, er = hx[:, :D], hx[:, D], hx[:, D+1]
#       e[v, u] = leaky_relu(el[u] + er[v]) + neg_bias[v, u]   (mask hoisted)
#       h = softmax_u(e) @ hp + bias_l
#   Z_prev = (A + I)^S h        (ahatS precomputed in the wrapper; the
#                                beta-weighted Z of the reference is dead
#                                w.r.t. the return value)
# --------------------------------------------------------------------------
def _hegt_kernel(*refs, L, D, apply_fc):
    if apply_fc:
        (x_ref, fcw_ref, fcb_ref, ahat_ref, negb_ref,
         add0_ref, wc_ref, bias_ref, o_ref) = refs
    else:
        (x_ref, ahat_ref, negb_ref,
         add0_ref, wc_ref, bias_ref, o_ref) = refs
        fcw_ref = fcb_ref = None

    neg_bias = negb_ref[...]                # (N, N) f32: 0 on edge dst<-src, -1e30 else

    if apply_fc:                            # static; mirrors the `!= 512` check
        h32 = jnp.dot(x_ref[...].astype(jnp.bfloat16), fcw_ref[...],
                      preferred_element_type=jnp.float32) + fcb_ref[...]
    else:
        h32 = x_ref[...].astype(jnp.float32)
    h = h32.astype(jnp.bfloat16)            # bf16 MXU operand, f32 accumulate

    for l in range(L):                      # L static -> fully unrolled
        # attention projections folded into the feature matmul as two extra
        # output columns; padded to 256 lanes so hp below is a clean lane tile
        hx = jnp.dot(h, wc_ref[l], preferred_element_type=jnp.float32)   # (N, 2D)
        if l == 0:
            # het one-hot contribution (replaces concat([h, het]) + ragged-K matmul)
            hx = hx + add0_ref[...]
        hp = hx[:, :D]                      # projected node features, lane-dense (N, 128)
        el = hx[:, D:D + 1]                 # (N, 1) "source" scores
        er = hx[:, D + 1:D + 2]             # (N, 1) "destination" scores
        e = er + jnp.transpose(el)          # e[dst, src]
        e = jnp.maximum(e, 0.2 * e)         # leaky_relu, negative_slope = 0.2
        e = e + neg_bias                    # hoisted mask: add instead of select
        e_max = jnp.max(e, axis=-1, keepdims=True)
        # masked logits underflow to exactly 0 under exp; wrapper asserts every
        # node has >= 1 in-edge so no row is fully masked.
        p = jnp.exp(e - e_max)
        denom = jnp.sum(p, axis=-1, keepdims=True)
        alpha = p * pl.reciprocal(denom, approx=False)    # exact for parity
        h32 = jnp.dot(alpha.astype(jnp.bfloat16), hp.astype(jnp.bfloat16),
                      preferred_element_type=jnp.float32) + bias_ref[l]
        h = h32.astype(jnp.bfloat16)

    # single matmul against precomputed (A+I)^S (no serial S-step chain)
    o_ref[...] = jnp.dot(ahat_ref[...], h, preferred_element_type=jnp.float32)


def hegt_fused(ahatS, neg_bias, feats, fc_w, fc_b, add0, wc_all, bias_all, *, apply_fc):
    B, N = ahatS.shape[0], ahatS.shape[1]
    L, D = wc_all.shape[0], wc_all.shape[1]
    kernel = functools.partial(_hegt_kernel, L=L, D=D, apply_fc=apply_fc)

    def batched(shape_tail):                # per-graph tensor: leading batch dim squeezed
        return pl.BlockSpec((pl.Squeezed(),) + tuple(shape_tail),
                            lambda b, _t=len(shape_tail): (b,) + (0,) * _t)

    def shared(arr):                        # weights shared across the batch grid axis
        return pl.BlockSpec(arr.shape, lambda b, _n=arr.ndim: (0,) * _n)

    in_arrays = [feats]
    in_specs = [batched(feats.shape[1:])]
    if apply_fc:                            # skip the fc DMA entirely when unused
        in_arrays += [fc_w, fc_b]
        in_specs += [shared(fc_w), shared(fc_b)]
    in_arrays += [ahatS, neg_bias, add0, wc_all, bias_all]
    in_specs += [batched(ahatS.shape[1:]), batched(neg_bias.shape[1:]),
                 batched(add0.shape[1:]), shared(wc_all), shared(bias_all)]

    # TODO(synk): for graphs that do not fit VMEM this must be re-tiled
    # (dst-row x src-column grid with online softmax; v7x plans must budget for
    # 64 MiB VMEM + explicit vmem_limit_bytes, v5e/v6e can use >=512-wide tiles).
    return pl.pallas_call(
        kernel,
        grid=(B,),
        out_shape=jax.ShapeDtypeStruct((B, N, D), jnp.float32),
        in_specs=in_specs,
        out_specs=pl.BlockSpec((pl.Squeezed(), N, D), lambda b: (b, 0, 0)),
        compiler_params=pltpu.CompilerParams(
            dimension_semantics=("parallel",)),   # both v7x TensorCores when B > 1
    )(*in_arrays)


# --------------------------------------------------------------------------
# HeGT parameters + forward (glue)
# --------------------------------------------------------------------------
def init_params(key, dim_in, dim_hidden, S, num_gnns, num_type):
    keys = jax.random.split(key, 1 + 2 * num_gnns)
    params = {
        "fc_w": jax.random.normal(keys[0], (dim_in, dim_hidden), jnp.float32) * 0.02,
        "fc_b": jnp.zeros((dim_hidden,), jnp.float32),
        "type_emb": jnp.eye(num_type, dtype=jnp.float32),
        # beta only feeds the reference's Z accumulation, which is dead w.r.t.
        # the returned Z_prev; the kernel never reads it.
        "beta": jnp.ones((S + 1,), jnp.float32),
    }
    gat = []
    # TODO(synk): reference builds GATConv(dim_hidden, dim_hidden), which cannot
    # consume the (dim_hidden + num_type)-dim concatenated features; layer 0's
    # weight here is sized to accept the concatenation (split into W_h / W_t in
    # the wrapper, so the concat never materializes).
    din = dim_hidden + num_type
    for l in range(num_gnns):
        kw, ka = keys[1 + 2 * l], keys[2 + 2 * l]
        w = jax.random.normal(kw, (din, dim_hidden), jnp.float32) * 0.05
        a = jax.random.normal(ka, (2, dim_hidden), jnp.float32) * 0.05
        b = jnp.zeros((1, dim_hidden), jnp.float32)
        gat.append((w, a, b))
        din = dim_hidden
    params["gat"] = gat
    return params


def hegt_forward(params, feats, node_types, adj, S):
    # accepts one graph (N, F) or a batch of packed graphs (B, N, F); packing
    # several small graphs block-diagonally into one N is exact (mask + A_hat
    # are block-diag, so graphs never mix) and fills vregs / MXU rows.
    squeeze = feats.ndim == 2
    if squeeze:
        feats, node_types, adj = feats[None], node_types[None], adj[None]
    B, N = adj.shape[0], adj.shape[1]
    D = params["fc_w"].shape[1]
    apply_fc = feats.shape[-1] != D            # mirrors the `!= 512` check

    # hoisted attention-mask bias: 0 where edge src->dst exists, -1e30 otherwise
    neg_bias = jnp.where(jnp.swapaxes(adj, -1, -2) > 0.0,
                         jnp.float32(0.0), jnp.float32(-1e30))

    # (A + I)^S precomputed as tiny dense matmuls inside the jitted wrapper
    eye = jnp.eye(N, dtype=jnp.float32)
    A_hat = adj + eye
    P = jnp.broadcast_to(eye, (B, N, N))
    for _ in range(S):
        P = jnp.matmul(P, A_hat)
    ahatS = P.astype(jnp.bfloat16)             # small integer walk counts

    # layer 0: split W0 into feature rows / type rows; the one-hot het_feat
    # concat becomes a tiny (B, N, num_type) @ (num_type, D) projection here.
    w0, a0, _ = params["gat"][0]
    w0_h, w0_t = w0[:D], w0[D:]
    het = params["type_emb"][node_types]                       # (B, N, T)
    t_rows = jnp.matmul(het, w0_t)                             # (B, N, D)
    add0 = jnp.concatenate([t_rows, jnp.matmul(t_rows, a0.T)], axis=-1)   # (B, N, D+2)
    DP = ((D + 2 + 127) // 128) * 128          # pad folded width to a lane multiple
    add0 = jnp.pad(add0, ((0, 0), (0, 0), (0, DP - (D + 2)))).astype(jnp.float32)

    # fold each layer's attention vectors into its weight and zero-pad:
    #   Wc_l = [W_l | W_l a_l | W_l a_r | 0]  -> el/er are columns D, D+1
    wcs, biases = [], []
    for l, (w, a, b) in enumerate(params["gat"]):
        wf = w0_h if l == 0 else w
        wc = jnp.concatenate([wf, wf @ a.T], axis=-1)          # (D, D+2)
        wcs.append(jnp.pad(wc, ((0, 0), (0, DP - (D + 2)))))
        biases.append(b.reshape(1, D))
    wc_all = jnp.stack(wcs).astype(jnp.bfloat16)               # (L, D, DP) bf16 (half the DMA)
    bias_all = jnp.stack(biases).astype(jnp.float32)           # (L, 1, D)

    fc_w = params["fc_w"].astype(jnp.bfloat16)
    fc_b = params["fc_b"].reshape(1, D).astype(jnp.float32)

    # TODO(synk): reference does `G = GATConv(G, feat)` (reassigns G to a tensor,
    # broken DGL code); node features are chained through the layers instead.
    out = hegt_fused(ahatS, neg_bias, feats.astype(jnp.float32), fc_w, fc_b,
                     add0, wc_all, bias_all, apply_fc=apply_fc)
    return out[0] if squeeze else out


# --------------------------------------------------------------------------
if __name__ == "__main__":
    key = jax.random.PRNGKey(0)
    # dim_hidden = 128 keeps every kernel output lane-dense (128-wide vst / MXU)
    dim_in, dim_hidden, S, num_gnns, num_type = 64, 128, 3, 4, 6
    counts = [6, 6, 6, 6, 4, 4]                # nodes per node-type, 32 per sub-graph
    n_sub = sum(counts)                        # 32
    graphs_per_pack, n_pack = 4, 2             # 4 sub-graphs packed -> N=128, 2 packed batches
    N = graphs_per_pack * n_sub                # 128

    k_feat, k_edge, k_param = jax.random.split(key, 3)

    def make_subgraph(k):
        # symmetric ring + a few random edges (every node gets in-edges), no self loops
        idx = jnp.arange(n_sub)
        a = jnp.zeros((n_sub, n_sub), jnp.float32)
        a = a.at[idx, (idx + 1) % n_sub].set(1.0)
        a = a.at[(idx + 1) % n_sub, idx].set(1.0)
        extra = jax.random.randint(k, (8, 2), 0, n_sub)
        a = a.at[extra[:, 0], extra[:, 1]].set(1.0)
        a = a.at[extra[:, 1], extra[:, 0]].set(1.0)
        return a * (1.0 - jnp.eye(n_sub, dtype=jnp.float32))

    edge_keys = jax.random.split(k_edge, n_pack * graphs_per_pack)
    sub_types = jnp.concatenate(
        [jnp.full((c,), t, jnp.int32) for t, c in enumerate(counts)])

    adjs, types = [], []
    for p in range(n_pack):
        blocks = [make_subgraph(edge_keys[p * graphs_per_pack + g])
                  for g in range(graphs_per_pack)]
        adjs.append(jax.scipy.linalg.block_diag(*blocks))
        types.append(jnp.tile(sub_types, graphs_per_pack))
    adj = jnp.stack(adjs)                      # (B, N, N) block-diagonal packed graphs
    node_types = jnp.stack(types)              # (B, N)
    feats = jax.random.normal(k_feat, (n_pack, N, dim_in), jnp.float32)

    # guard the exp-underflow masking trick: every node must have >= 1 in-edge
    assert bool(jnp.all(adj.sum(axis=-2) > 0)), "graph has a node with no in-edges"

    params = init_params(k_param, dim_in, dim_hidden, S, num_gnns, num_type)

    fwd = jax.jit(hegt_forward, static_argnames=("S",))
    out = fwd(params, feats, node_types, adj, S=S)
    out = jax.block_until_ready(out)
    assert out.shape == (n_pack, N, dim_hidden), out.shape
    assert bool(jnp.all(jnp.isfinite(out)))
    print("KERNEL_OK")
</pallas_src>

<mosaic_0001>
module attributes {stable_mosaic.version = 11 : i64} {
  func.func @_hegt_kernel(%arg0: i32, %arg1: memref<1x128x64xf32, #tpu.memory_space<vmem>>, %arg2: memref<64x128xbf16, #tpu.memory_space<vmem>>, %arg3: memref<1x128xf32, #tpu.memory_space<vmem>>, %arg4: memref<1x128x128xbf16, #tpu.memory_space<vmem>>, %arg5: memref<1x128x128xf32, #tpu.memory_space<vmem>>, %arg6: memref<1x128x256xf32, #tpu.memory_space<vmem>>, %arg7: memref<4x128x256xbf16, #tpu.memory_space<vmem>>, %arg8: memref<4x1x128xf32, #tpu.memory_space<vmem>>, %arg9: memref<1x128x128xf32, #tpu.memory_space<vmem>>) attributes {dimension_semantics = [#tpu.dimension_semantics<parallel>], iteration_bounds = array<i64: 2>, scalar_prefetch = 0 : i64, scratch_operands = 0 : i64, tpu.core_type = #tpu.core_type<tc>, window_params = [{transform_indices = @transform_0, window_bounds = array<i64: 1, 128, 64>}, {pipeline_mode = #tpu.pipeline_mode<synchronous>, transform_indices = @transform_1, window_bounds = array<i64: 64, 128>}, {pipeline_mode = #tpu.pipeline_mode<synchronous>, transform_indices = @transform_2, window_bounds = array<i64: 1, 128>}, {transform_indices = @transform_3, window_bounds = array<i64: 1, 128, 128>}, {transform_indices = @transform_4, window_bounds = array<i64: 1, 128, 128>}, {transform_indices = @transform_5, window_bounds = array<i64: 1, 128, 256>}, {pipeline_mode = #tpu.pipeline_mode<synchronous>, transform_indices = @transform_6, window_bounds = array<i64: 4, 128, 256>}, {pipeline_mode = #tpu.pipeline_mode<synchronous>, transform_indices = @transform_7, window_bounds = array<i64: 4, 1, 128>}, {transform_indices = @transform_8, window_bounds = array<i64: 1, 128, 128>}]} {
    %c0 = arith.constant 0 : index
    %c0_0 = arith.constant 0 : index
    %c0_1 = arith.constant 0 : index
    %0 = vector.load %arg5[%c0, %c0_0, %c0_1] : memref<1x128x128xf32, #tpu.memory_space<vmem>>, vector<1x128x128xf32>
    %1 = vector.shape_cast %0 : vector<1x128x128xf32> to vector<128x128xf32>
    %c0_2 = arith.constant 0 : index
    %c0_3 = arith.constant 0 : index
    %c0_4 = arith.constant 0 : index
    %2 = vector.load %arg1[%c0_2, %c0_3, %c0_4] : memref<1x128x64xf32, #tpu.memory_space<vmem>>, vector<1x128x64xf32>
    %3 = vector.shape_cast %2 : vector<1x128x64xf32> to vector<128x64xf32>
    %4 = arith.truncf %3 : vector<128x64xf32> to vector<128x64xbf16>
    %c0_5 = arith.constant 0 : index
    %c0_6 = arith.constant 0 : index
    %5 = vector.load %arg2[%c0_5, %c0_6] : memref<64x128xbf16, #tpu.memory_space<vmem>>, vector<64x128xbf16>
    %cst = arith.constant dense<0.000000e+00> : vector<128x128xf32>
    %6 = tpu.matmul %4, %5, %cst {dimension_numbers = #tpu.dot_dimension_numbers<[1], [0], [0], [1], [0, 0, 1, 1], [], []>} : vector<128x64xbf16>, vector<64x128xbf16>, vector<128x128xf32> -> vector<128x128xf32>
    %c0_7 = arith.constant 0 : index
    %c0_8 = arith.constant 0 : index
    %7 = vector.load %arg3[%c0_7, %c0_8] : memref<1x128xf32, #tpu.memory_space<vmem>>, vector<1x128xf32>
    %8 = vector.broadcast %7 : vector<1x128xf32> to vector<128x128xf32>
    %9 = arith.addf %6, %8 : vector<128x128xf32>
    %10 = arith.truncf %9 : vector<128x128xf32> to vector<128x128xbf16>
    %c0_9 = arith.constant 0 : index
    %c0_10 = arith.constant 0 : index
    %c0_11 = arith.constant 0 : index
    %11 = vector.load %arg7[%c0_9, %c0_10, %c0_11] : memref<4x128x256xbf16, #tpu.memory_space<vmem>>, vector<1x128x256xbf16>
    %12 = vector.shape_cast %11 : vector<1x128x256xbf16> to vector<128x256xbf16>
    %cst_12 = arith.constant dense<0.000000e+00> : vector<128x256xf32>
    %13 = tpu.matmul %10, %12, %cst_12 {dimension_numbers = #tpu.dot_dimension_numbers<[1], [0], [0], [1], [0, 0, 1, 1], [], []>} : vector<128x128xbf16>, vector<128x256xbf16>, vector<128x256xf32> -> vector<128x256xf32>
    %c0_13 = arith.constant 0 : index
    %c0_14 = arith.constant 0 : index
    %c0_15 = arith.constant 0 : index
    %14 = vector.load %arg6[%c0_13, %c0_14, %c0_15] : memref<1x128x256xf32, #tpu.memory_space<vmem>>, vector<1x128x256xf32>
    %15 = vector.shape_cast %14 : vector<1x128x256xf32> to vector<128x256xf32>
    %16 = arith.addf %13, %15 : vector<128x256xf32>
    %17 = vector.extract_strided_slice %16 {offsets = [0, 0], sizes = [128, 128], strides = [1, 1]} : vector<128x256xf32> to vector<128x128xf32>
    %18 = vector.extract_strided_slice %16 {offsets = [0, 128], sizes = [128, 1], strides = [1, 1]} : vector<128x256xf32> to vector<128x1xf32>
    %19 = vector.extract_strided_slice %16 {offsets = [0, 129], sizes = [128, 1], strides = [1, 1]} : vector<128x256xf32> to vector<128x1xf32>
    %20 = tpu.transpose %18, [1, 0] : vector<128x1xf32> -> vector<1x128xf32>
    %21 = vector.broadcast %19 : vector<128x1xf32> to vector<128x128xf32>
    %22 = vector.broadcast %20 : vector<1x128xf32> to vector<128x128xf32>
    %23 = arith.addf %21, %22 : vector<128x128xf32>
    %cst_16 = arith.constant 2.000000e-01 : f32
    %24 = vector.broadcast %cst_16 : f32 to vector<128x128xf32>
    %25 = arith.mulf %24, %23 : vector<128x128xf32>
    %26 = arith.maximumf %23, %25 : vector<128x128xf32>
    %27 = arith.addf %26, %1 : vector<128x128xf32>
    %cst_17 = arith.constant dense<0xFF800000> : vector<128xf32>
    %28 = vector.multi_reduction <maximumf>, %27, %cst_17 [1] : vector<128x128xf32> to vector<128xf32>
    %29 = vector.shape_cast %28 : vector<128xf32> to vector<128x1xf32>
    %30 = vector.broadcast %29 : vector<128x1xf32> to vector<128x128xf32>
    %31 = arith.subf %27, %30 : vector<128x128xf32>
    %32 = math.exp %31 : vector<128x128xf32>
    %cst_18 = arith.constant dense<0.000000e+00> : vector<128xf32>
    %33 = vector.multi_reduction <add>, %32, %cst_18 [1] : vector<128x128xf32> to vector<128xf32>
    %34 = vector.shape_cast %33 : vector<128xf32> to vector<128x1xf32>
    %35 = tpu.reciprocal %34 : vector<128x1xf32> -> vector<128x1xf32>
    %36 = vector.broadcast %35 : vector<128x1xf32> to vector<128x128xf32>
    %37 = arith.mulf %32, %36 : vector<128x128xf32>
    %38 = arith.truncf %37 : vector<128x128xf32> to vector<128x128xbf16>
    %39 = arith.truncf %17 : vector<128x128xf32> to vector<128x128xbf16>
    %cst_19 = arith.constant dense<0.000000e+00> : vector<128x128xf32>
    %40 = tpu.matmul %38, %39, %cst_19 {dimension_numbers = #tpu.dot_dimension_numbers<[1], [0], [0], [1], [0, 0, 1, 1], [], []>} : vector<128x128xbf16>, vector<128x128xbf16>, vector<128x128xf32> -> vector<128x128xf32>
    %c0_20 = arith.constant 0 : index
    %c0_21 = arith.constant 0 : index
    %c0_22 = arith.constant 0 : index
    %41 = vector.load %arg8[%c0_20, %c0_21, %c0_22] : memref<4x1x128xf32, #tpu.memory_space<vmem>>, vector<1x1x128xf32>
    %42 = vector.shape_cast %41 : vector<1x1x128xf32> to vector<1x128xf32>
    %43 = vector.broadcast %42 : vector<1x128xf32> to vector<128x128xf32>
    %44 = arith.addf %40, %43 : vector<128x128xf32>
    %45 = arith.truncf %44 : vector<128x128xf32> to vector<128x128xbf16>
    %c1 = arith.constant 1 : index
    %c0_23 = arith.constant 0 : index
    %c0_24 = arith.constant 0 : index
    %46 = vector.load %arg7[%c1, %c0_23, %c0_24] : memref<4x128x256xbf16, #tpu.memory_space<vmem>>, vector<1x128x256xbf16>
    %47 = vector.shape_cast %46 : vector<1x128x256xbf16> to vector<128x256xbf16>
    %cst_25 = arith.constant dense<0.000000e+00> : vector<128x256xf32>
    %48 = tpu.matmul %45, %47, %cst_25 {dimension_numbers = #tpu.dot_dimension_numbers<[1], [0], [0], [1], [0, 0, 1, 1], [], []>} : vector<128x128xbf16>, vector<128x256xbf16>, vector<128x256xf32> -> vector<128x256xf32>
    %49 = vector.extract_strided_slice %48 {offsets = [0, 0], sizes = [128, 128], strides = [1, 1]} : vector<128x256xf32> to vector<128x128xf32>
    %50 = vector.extract_strided_slice %48 {offsets = [0, 128], sizes = [128, 1], strides = [1, 1]} : vector<128x256xf32> to vector<128x1xf32>
    %51 = vector.extract_strided_slice %48 {offsets = [0, 129], sizes = [128, 1], strides = [1, 1]} : vector<128x256xf32> to vector<128x1xf32>
    %52 = tpu.transpose %50, [1, 0] : vector<128x1xf32> -> vector<1x128xf32>
    %53 = vector.broadcast %51 : vector<128x1xf32> to vector<128x128xf32>
    %54 = vector.broadcast %52 : vector<1x128xf32> to vector<128x128xf32>
    %55 = arith.addf %53, %54 : vector<128x128xf32>
    %cst_26 = arith.constant 2.000000e-01 : f32
    %56 = vector.broadcast %cst_26 : f32 to vector<128x128xf32>
    %57 = arith.mulf %56, %55 : vector<128x128xf32>
    %58 = arith.maximumf %55, %57 : vector<128x128xf32>
    %59 = arith.addf %58, %1 : vector<128x128xf32>
    %cst_27 = arith.constant dense<0xFF800000> : vector<128xf32>
    %60 = vector.multi_reduction <maximumf>, %59, %cst_27 [1] : vector<128x128xf32> to vector<128xf32>
    %61 = vector.shape_cast %60 : vector<128xf32> to vector<128x1xf32>
    %62 = vector.broadcast %61 : vector<128x1xf32> to vector<128x128xf32>
    %63 = arith.subf %59, %62 : vector<128x128xf32>
    %64 = math.exp %63 : vector<128x128xf32>
    %cst_28 = arith.constant dense<0.000000e+00> : vector<128xf32>
    %65 = vector.multi_reduction <add>, %64, %cst_28 [1] : vector<128x128xf32> to vector<128xf32>
    %66 = vector.shape_cast %65 : vector<128xf32> to vector<128x1xf32>
    %67 = tpu.reciprocal %66 : vector<128x1xf32> -> vector<128x1xf32>
    %68 = vector.broadcast %67 : vector<128x1xf32> to vector<128x128xf32>
    %69 = arith.mulf %64, %68 : vector<128x128xf32>
    %70 = arith.truncf %69 : vector<128x128xf32> to vector<128x128xbf16>
    %71 = arith.truncf %49 : vector<128x128xf32> to vector<128x128xbf16>
    %cst_29 = arith.constant dense<0.000000e+00> : vector<128x128xf32>
    %72 = tpu.matmul %70, %71, %cst_29 {dimension_numbers = #tpu.dot_dimension_numbers<[1], [0], [0], [1], [0, 0, 1, 1], [], []>} : vector<128x128xbf16>, vector<128x128xbf16>, vector<128x128xf32> -> vector<128x128xf32>
    %c1_30 = arith.constant 1 : index
    %c0_31 = arith.constant 0 : index
    %c0_32 = arith.constant 0 : index
    %73 = vector.load %arg8[%c1_30, %c0_31, %c0_32] : memref<4x1x128xf32, #tpu.memory_space<vmem>>, vector<1x1x128xf32>
    %74 = vector.shape_cast %73 : vector<1x1x128xf32> to vector<1x128xf32>
    %75 = vector.broadcast %74 : vector<1x128xf32> to vector<128x128xf32>
    %76 = arith.addf %72, %75 : vector<128x128xf32>
    %77 = arith.truncf %76 : vector<128x128xf32> to vector<128x128xbf16>
    %c2 = arith.constant 2 : index
    %c0_33 = arith.constant 0 : index
    %c0_34 = arith.constant 0 : index
    %78 = vector.load %arg7[%c2, %c0_33, %c0_34] : memref<4x128x256xbf16, #tpu.memory_space<vmem>>, vector<1x128x256xbf16>
    %79 = vector.shape_cast %78 : vector<1x128x256xbf16> to vector<128x256xbf16>
    %cst_35 = arith.constant dense<0.000000e+00> : vector<128x256xf32>
    %80 = tpu.matmul %77, %79, %cst_35 {dimension_numbers = #tpu.dot_dimension_numbers<[1], [0], [0], [1], [0, 0, 1, 1], [], []>} : vector<128x128xbf16>, vector<128x256xbf16>, vector<128x256xf32> -> vector<128x256xf32>
    %81 = vector.extract_strided_slice %80 {offsets = [0, 0], sizes = [128, 128], strides = [1, 1]} : vector<128x256xf32> to vector<128x128xf32>
    %82 = vector.extract_strided_slice %80 {offsets = [0, 128], sizes = [128, 1], strides = [1, 1]} : vector<128x256xf32> to vector<128x1xf32>
    %83 = vector.extract_strided_slice %80 {offsets = [0, 129], sizes = [128, 1], strides = [1, 1]} : vector<128x256xf32> to vector<128x1xf32>
    %84 = tpu.transpose %82, [1, 0] : vector<128x1xf32> -> vector<1x128xf32>
    %85 = vector.broadcast %83 : vector<128x1xf32> to vector<128x128xf32>
    %86 = vector.broadcast %84 : vector<1x128xf32> to vector<128x128xf32>
    %87 = arith.addf %85, %86 : vector<128x128xf32>
    %cst_36 = arith.constant 2.000000e-01 : f32
    %88 = vector.broadcast %cst_36 : f32 to vector<128x128xf32>
    %89 = arith.mulf %88, %87 : vector<128x128xf32>
    %90 = arith.maximumf %87, %89 : vector<128x128xf32>
    %91 = arith.addf %90, %1 : vector<128x128xf32>
    %cst_37 = arith.constant dense<0xFF800000> : vector<128xf32>
    %92 = vector.multi_reduction <maximumf>, %91, %cst_37 [1] : vector<128x128xf32> to vector<128xf32>
    %93 = vector.shape_cast %92 : vector<128xf32> to vector<128x1xf32>
    %94 = vector.broadcast %93 : vector<128x1xf32> to vector<128x128xf32>
    %95 = arith.subf %91, %94 : vector<128x128xf32>
    %96 = math.exp %95 : vector<128x128xf32>
    %cst_38 = arith.constant dense<0.000000e+00> : vector<128xf32>
    %97 = vector.multi_reduction <add>, %96, %cst_38 [1] : vector<128x128xf32> to vector<128xf32>
    %98 = vector.shape_cast %97 : vector<128xf32> to vector<128x1xf32>
    %99 = tpu.reciprocal %98 : vector<128x1xf32> -> vector<128x1xf32>
    %100 = vector.broadcast %99 : vector<128x1xf32> to vector<128x128xf32>
    %101 = arith.mulf %96, %100 : vector<128x128xf32>
    %102 = arith.truncf %101 : vector<128x128xf32> to vector<128x128xbf16>
    %103 = arith.truncf %81 : vector<128x128xf32> to vector<128x128xbf16>
    %cst_39 = arith.constant dense<0.000000e+00> : vector<128x128xf32>
    %104 = tpu.matmul %102, %103, %cst_39 {dimension_numbers = #tpu.dot_dimension_numbers<[1], [0], [0], [1], [0, 0, 1, 1], [], []>} : vector<128x128xbf16>, vector<128x128xbf16>, vector<128x128xf32> -> vector<128x128xf32>
    %c2_40 = arith.constant 2 : index
    %c0_41 = arith.constant 0 : index
    %c0_42 = arith.constant 0 : index
    %105 = vector.load %arg8[%c2_40, %c0_41, %c0_42] : memref<4x1x128xf32, #tpu.memory_space<vmem>>, vector<1x1x128xf32>
    %106 = vector.shape_cast %105 : vector<1x1x128xf32> to vector<1x128xf32>
    %107 = vector.broadcast %106 : vector<1x128xf32> to vector<128x128xf32>
    %108 = arith.addf %104, %107 : vector<128x128xf32>
    %109 = arith.truncf %108 : vector<128x128xf32> to vector<128x128xbf16>
    %c3 = arith.constant 3 : index
    %c0_43 = arith.constant 0 : index
    %c0_44 = arith.constant 0 : index
    %110 = vector.load %arg7[%c3, %c0_43, %c0_44] : memref<4x128x256xbf16, #tpu.memory_space<vmem>>, vector<1x128x256xbf16>
    %111 = vector.shape_cast %110 : vector<1x128x256xbf16> to vector<128x256xbf16>
    %cst_45 = arith.constant dense<0.000000e+00> : vector<128x256xf32>
    %112 = tpu.matmul %109, %111, %cst_45 {dimension_numbers = #tpu.dot_dimension_numbers<[1], [0], [0], [1], [0, 0, 1, 1], [], []>} : vector<128x128xbf16>, vector<128x256xbf16>, vector<128x256xf32> -> vector<128x256xf32>
    %113 = vector.extract_strided_slice %112 {offsets = [0, 0], sizes = [128, 128], strides = [1, 1]} : vector<128x256xf32> to vector<128x128xf32>
    %114 = vector.extract_strided_slice %112 {offsets = [0, 128], sizes = [128, 1], strides = [1, 1]} : vector<128x256xf32> to vector<128x1xf32>
    %115 = vector.extract_strided_slice %112 {offsets = [0, 129], sizes = [128, 1], strides = [1, 1]} : vector<128x256xf32> to vector<128x1xf32>
    %116 = tpu.transpose %114, [1, 0] : vector<128x1xf32> -> vector<1x128xf32>
    %117 = vector.broadcast %115 : vector<128x1xf32> to vector<128x128xf32>
    %118 = vector.broadcast %116 : vector<1x128xf32> to vector<128x128xf32>
    %119 = arith.addf %117, %118 : vector<128x128xf32>
    %cst_46 = arith.constant 2.000000e-01 : f32
    %120 = vector.broadcast %cst_46 : f32 to vector<128x128xf32>
    %121 = arith.mulf %120, %119 : vector<128x128xf32>
    %122 = arith.maximumf %119, %121 : vector<128x128xf32>
    %123 = arith.addf %122, %1 : vector<128x128xf32>
    %cst_47 = arith.constant dense<0xFF800000> : vector<128xf32>
    %124 = vector.multi_reduction <maximumf>, %123, %cst_47 [1] : vector<128x128xf32> to vector<128xf32>
    %125 = vector.shape_cast %124 : vector<128xf32> to vector<128x1xf32>
    %126 = vector.broadcast %125 : vector<128x1xf32> to vector<128x128xf32>
    %127 = arith.subf %123, %126 : vector<128x128xf32>
    %128 = math.exp %127 : vector<128x128xf32>
    %cst_48 = arith.constant dense<0.000000e+00> : vector<128xf32>
    %129 = vector.multi_reduction <add>, %128, %cst_48 [1] : vector<128x128xf32> to vector<128xf32>
    %130 = vector.shape_cast %129 : vector<128xf32> to vector<128x1xf32>
    %131 = tpu.reciprocal %130 : vector<128x1xf32> -> vector<128x1xf32>
    %132 = vector.broadcast %131 : vector<128x1xf32> to vector<128x128xf32>
    %133 = arith.mulf %128, %132 : vector<128x128xf32>
    %134 = arith.truncf %133 : vector<128x128xf32> to vector<128x128xbf16>
    %135 = arith.truncf %113 : vector<128x128xf32> to vector<128x128xbf16>
    %cst_49 = arith.constant dense<0.000000e+00> : vector<128x128xf32>
    %136 = tpu.matmul %134, %135, %cst_49 {dimension_numbers = #tpu.dot_dimension_numbers<[1], [0], [0], [1], [0, 0, 1, 1], [], []>} : vector<128x128xbf16>, vector<128x128xbf16>, vector<128x128xf32> -> vector<128x128xf32>
    %c3_50 = arith.constant 3 : index
    %c0_51 = arith.constant 0 : index
    %c0_52 = arith.constant 0 : index
    %137 = vector.load %arg8[%c3_50, %c0_51, %c0_52] : memref<4x1x128xf32, #tpu.memory_space<vmem>>, vector<1x1x128xf32>
    %138 = vector.shape_cast %137 : vector<1x1x128xf32> to vector<1x128xf32>
    %139 = vector.broadcast %138 : vector<1x128xf32> to vector<128x128xf32>
    %140 = arith.addf %136, %139 : vector<128x128xf32>
    %141 = arith.truncf %140 : vector<128x128xf32> to vector<128x128xbf16>
    %c0_53 = arith.constant 0 : index
    %c0_54 = arith.constant 0 : index
    %c0_55 = arith.constant 0 : index
    %142 = vector.load %arg4[%c0_53, %c0_54, %c0_55] : memref<1x128x128xbf16, #tpu.memory_space<vmem>>, vector<1x128x128xbf16>
    %143 = vector.shape_cast %142 : vector<1x128x128xbf16> to vector<128x128xbf16>
    %cst_56 = arith.constant dense<0.000000e+00> : vector<128x128xf32>
    %144 = tpu.matmul %143, %141, %cst_56 {dimension_numbers = #tpu.dot_dimension_numbers<[1], [0], [0], [1], [0, 0, 1, 1], [], []>} : vector<128x128xbf16>, vector<128x128xbf16>, vector<128x128xf32> -> vector<128x128xf32>
    %c0_57 = arith.constant 0 : index
    %c0_58 = arith.constant 0 : index
    %c0_59 = arith.constant 0 : index
    %145 = vector.load %arg9[%c0_57, %c0_58, %c0_59] : memref<1x128x128xf32, #tpu.memory_space<vmem>>, vector<1x128x128xf32>
    %146 = vector.shape_cast %145 : vector<1x128x128xf32> to vector<128x128xf32>
    %147 = vector.shape_cast %144 : vector<128x128xf32> to vector<1x128x128xf32>
    tpu.vector_store %arg9[%c0_57, %c0_58, %c0_59], %147 {strides = array<i32>} : memref<1x128x128xf32, #tpu.memory_space<vmem>>, vector<1x128x128xf32>,
    return
  }
  func.func @transform_0(%arg0: i32) -> (i32, i32, i32) {
    %c0_i32 = arith.constant 0 : i32
    %c0_i32_0 = arith.constant 0 : i32
    %c0_i32_1 = arith.constant 0 : i32
    return %arg0, %c0_i32, %c0_i32_0 : i32, i32, i32
  }
  func.func @transform_1(%arg0: i32) -> (i32, i32) {
    %c0_i32 = arith.constant 0 : i32
    %c0_i32_0 = arith.constant 0 : i32
    %c0_i32_1 = arith.constant 0 : i32
    return %c0_i32, %c0_i32_0 : i32, i32
  }
  func.func @transform_2(%arg0: i32) -> (i32, i32) {
    %c0_i32 = arith.constant 0 : i32
    %c0_i32_0 = arith.constant 0 : i32
    %c0_i32_1 = arith.constant 0 : i32
    return %c0_i32, %c0_i32_0 : i32, i32
  }
  func.func @transform_3(%arg0: i32) -> (i32, i32, i32) {
    %c0_i32 = arith.constant 0 : i32
    %c0_i32_0 = arith.constant 0 : i32
    %c0_i32_1 = arith.constant 0 : i32
    return %arg0, %c0_i32, %c0_i32_0 : i32, i32, i32
  }
  func.func @transform_4(%arg0: i32) -> (i32, i32, i32) {
    %c0_i32 = arith.constant 0 : i32
    %c0_i32_0 = arith.constant 0 : i32
    %c0_i32_1 = arith.constant 0 : i32
    return %arg0, %c0_i32, %c0_i32_0 : i32, i32, i32
  }
  func.func @transform_5(%arg0: i32) -> (i32, i32, i32) {
    %c0_i32 = arith.constant 0 : i32
    %c0_i32_0 = arith.constant 0 : i32
    %c0_i32_1 = arith.constant 0 : i32
    return %arg0, %c0_i32, %c0_i32_0 : i32, i32, i32
  }
  func.func @transform_6(%arg0: i32) -> (i32, i32, i32) {
    %c0_i32 = arith.constant 0 : i32
    %c0_i32_0 = arith.constant 0 : i32
    %c0_i32_1 = arith.constant 0 : i32
    %c0_i32_2 = arith.constant 0 : i32
    return %c0_i32, %c0_i32_0, %c0_i32_1 : i32, i32, i32
  }
  func.func @transform_7(%arg0: i32) -> (i32, i32, i32) {
    %c0_i32 = arith.constant 0 : i32
    %c0_i32_0 = arith.constant 0 : i32
    %c0_i32_1 = arith.constant 0 : i32
    %c0_i32_2 = arith.constant 0 : i32
    return %c0_i32, %c0_i32_0, %c0_i32_1 : i32, i32, i32
  }
  func.func @transform_8(%arg0: i32) -> (i32, i32, i32) {
    %c0_i32 = arith.constant 0 : i32
    %c0_i32_0 = arith.constant 0 : i32
    %c0_i32_1 = arith.constant 0 : i32
    return %arg0, %c0_i32, %c0_i32_0 : i32, i32, i32
  }
}

</mosaic_0001>

<bundles_post_ra>
// kernel: hegt_forward.1
= control target key start
LH: loop header
LB: loop body
LE: loop exit
PB: predicated region body
PF: predicated region fallthrough
CT: control target
= control target key end

     0   :  { %13 = vsyncpa [#allocation3], 0  ;;  %s5870_s0 = inlined_call_operand.vmem [shape: f32[2,128,64], index: 0, kind: input, shape index: {}]   ;;  %s5871_s1 = inlined_call_operand.vmem [shape: bf16[64,128], index: 1, kind: input, shape index: {}]   ;;  %s5872_s2 = inlined_call_operand.vmem [shape: f32[1,128], index: 2, kind: input, shape index: {}]   ;;  %s5873_s3 = inlined_call_operand.vmem [shape: bf16[2,128,128], index: 3, kind: input, shape index: {}]   ;;  %s5874_s4 = inlined_call_operand.vmem [shape: f32[2,128,128], index: 4, kind: input, shape index: {}]   ;;  %s5875_s5 = inlined_call_operand.vmem [shape: f32[2,128,256], index: 5, kind: input, shape index: {}]   ;;  %s5876_s6 = inlined_call_operand.vmem [shape: bf16[4,128,256], index: 6, kind: input, shape index: {}]   ;;  %s5877_s7 = inlined_call_operand.vmem [shape: f32[4,1,128], index: 7, kind: input, shape index: {}]   ;;  %s5878_s8 = inlined_call_operand.hbm [shape: f32[2,128,128], index: 8, kind: output, shape index: {}]  }
   0x1   :  { %15 = vsyncpa [#allocation3 + $0x1], 0  ;;  %s4537_s27 = smov 0   ;;  %s4539_s28 = smov 0  }
   0x2   :  { %s4541_s29 = smov 0   ;;  %s4543_s30 = smov 0  }
   0x3 LB: > { %s4558_s9 = sadd.s32 4294967295, %s4485_s30   ;;  %s3545_s10 = sadd.s32 4294967294, %s4485_s30   ;;  %s4485_s30 = sphi %s4543_s30, %s5884_s30   ;;  %s4481_s29 = sphi %s4541_s29, %s5883_s29   ;;  %s4477_s28 = sphi %s4539_s28, %s5882_s28   ;;  %s4473_s27 = sphi %s4537_s27, %s5881_s27  }
   0x4   : > { %s4562_s11 = sadd.s32 1, %s4485_s30   ;;  %s216_s12 = sadd.s32 1, %s4481_s29 }
   0x5   : > { %s213_s13 = ssub.s32 %s4485_s30, %s4562_s11  ;;  %p226_p0 = scmp.ne.s32.totalorder %s4481_s29, %s4477_s28 }
   0x6   : > { %p214_p1 = scmp.eq.s32.totalorder %s213_s13, 0  ;;  %p227_p2 = scmp.eq.s32.totalorder %s4558_s9, 1 }
   0x7   : > { %p232_p3 = scmp.ne.s32.totalorder %s4477_s28, %s4473_s27  ;;  %p233_p4 = scmp.eq.s32.totalorder %s3545_s10, 1 }
   0x8   : > { %s4573_s14 = scalar_select %p214_p1, %s4481_s29, %s216_s12  }
   0x9   : > { %p4575_p5 = por %p227_p2, %p226_p0  ;;  %p4579_p6 = por %p233_p4, %p232_p3 }
   0xa   : > { %p3548_p7 = scmp.ge.s32.totalorder %s4485_s30, 1  ;;  %p295_p8 = scmp.lt.s32.totalorder %s4485_s30, 3 }
   0xc   : > { %p296_p9 = pnand %p3548_p7, %p295_p8 }
   0xd   : > { %p344_p10 = scmp.lt.s32.totalorder (!%p296_p9), %s4558_s9, 1  ;;  %s341_s19 = sand.u32 (!%p296_p9), 1, %s4477_s28  }
   0xe   : > { %299 = sbr.rel (%p296_p9) target bundleno = 4221 (0x107d), region = 52  ;;  %s3707_s23 = sshll.u32 (!%p296_p9), %s4558_s9, 11 }
   0xf   : > { %s5830_s12 = scalar_lea.sflag (!%p296_p9), [#allocation3], %s341_s19 }
  0x13   : > { %v4045_v0 = vld [vmem:[%s5871_s1 + $0x18] sm:$0xff]   ;;  %v4046_v1 = vld [vmem:[%s5871_s1 + $0x10] sm:$0xff]   ;;  %s4593_s21 = scalar_select %p344_p10, %s4558_s9, 1  ;;  %v4047_v2 = vld [vmem:[%s5871_s1 + $0x8] sm:$0xff]   ;;  %vm444_vm0 = vcmask 523264   ;;  %v4487_v44 = vmov 0  }
  0x14   : > { %3800 = vmatprep.subr.bf16.mxu0 %v4045_v0  ;;  %v4049_v3 = vld [vmem:[%s5876_s6 + $0x74] ss:$8 sps:$4 sm:$0xff]   ;;  %v4051_v4 = vld [vmem:[%s5876_s6 + $0x70] ss:$8 sps:$4 sm:$0xff]   ;;  %v4048_v8 = vld [vmem:[%s5871_s1] sm:$0xff]   ;;  %734 = vmatprep.mubr.bf16.mxu1 %v4487_v44 }
  0x15   : > { %3801 = vmatpush3.bf16.msra.mxu0 %v4045_v0  ;;  %s3703_s24 = sshll.u32 %s4593_s21, 7  ;;  %702 = vmatprep.subr.bf16.mxu1 %v4049_v3  ;;  %v4052_v13 = vld [vmem:[%s5876_s6 + $0x64] ss:$8 sps:$4 sm:$0xff]   ;;  %v4054_v14 = vld [vmem:[%s5876_s6 + $0x60] ss:$8 sps:$4 sm:$0xff]   ;;  %s3706_s20 = sshll.u32 %s4593_s21, 8 }
  0x16   : > { %3802 = vmatprep.subr.bf16.mxu0 %v4046_v1  ;;  %s4607_s13 = scalar_lea.vmem %s5870_s0, %s3703_s24  ;;  %703 = vmatpush1.bf16.msra.mxu1 %v4051_v4  ;;  %v4055_v15 = vld [vmem:[%s5876_s6 + $0x54] ss:$8 sps:$4 sm:$0xff]   ;;  %v4057_v17 = vld [vmem:[%s5876_s6 + $0x50] ss:$8 sps:$4 sm:$0xff]   ;;  %v4058_v19 = vld [vmem:[%s5876_s6 + $0x44] ss:$8 sps:$4 sm:$0xff]   ;;  %s4696_s25 = scalar_lea.vmem %s5875_s5, %s3706_s20 }
  0x17   : > { %v381_v5 = vld [vmem:[%s4607_s13] sm:$0xff]  ;;  %v382_v6 = vld [vmem:[%s4607_s13 + $0x8] sm:$0xff]  ;;  %v383_v9 = vld [vmem:[%s4607_s13 + $0x10] sm:$0xff]  ;;  %704 = vmatprep.subr.bf16.mxu1 %v4052_v13  ;;  %s3549_s20 = sshll.u32 %s341_s19, 7 }
  0x18   : > { %v397_v7 = vpack.c.bf16 %v382_v6, %v381_v5  ;;  %v384_v10 = vld [vmem:[%s4607_s13 + $0x18] sm:$0xff]  ;;  %v385_v11 = vld [vmem:[%s4607_s13 + $0x20] sm:$0xff]  ;;  %v386_v12 = vld [vmem:[%s4607_s13 + $0x28] sm:$0xff]  ;;  %s5801_s22 = scalar_lea.vmem [#allocation2], %s3549_s20 }
  0x19   : > { %3803 = vmatpush3.bf16.msra.mxu0 %v4046_v1  ;;  %v398_v16 = vpack.c.bf16 %v384_v10, %v383_v9  ;;  %v399_v18 = vpack.c.bf16 %v386_v12, %v385_v11  ;;  %v4060_v20 = vld [vmem:[%s5876_s6 + $0x40] ss:$8 sps:$4 sm:$0xff]   ;;  %v387_v21 = vld [vmem:[%s4607_s13 + $0x30] sm:$0xff]  ;;  %v388_v22 = vld [vmem:[%s4607_s13 + $0x38] sm:$0xff] }
  0x1a   : > { %3804 = vmatprep.subr.bf16.mxu0 %v4047_v2  ;;  %3808 = vmatprep.mubr.msk.bf16.mxu0 %vm444_vm0, %v397_v7  ;;  %v4061_v23 = vld [vmem:[%s5876_s6 + $0x34] ss:$8 sps:$4 sm:$0xff]   ;;  %v389_v24 = vld [vmem:[%s4607_s13 + $0x40] sm:$0xff]  ;;  %v390_v25 = vld [vmem:[%s4607_s13 + $0x48] sm:$0xff]  ;;  %v400_v28 = vpack.c.bf16 %v388_v22, %v387_v21  ;;  %v4488_v22 = vmov 1  }
  0x1b   : > { %705 = vmatpush1.bf16.msra.mxu1 %v4054_v14  ;;  %v4063_v26 = vld [vmem:[%s5876_s6 + $0x30] ss:$8 sps:$4 sm:$0xff]   ;;  %v4064_v27 = vld [vmem:[%s5876_s6 + $0x24] ss:$8 sps:$4 sm:$0xff]   ;;  %v401_v29 = vpack.c.bf16 %v390_v25, %v389_v24  ;;  %v4066_v39 = vld [vmem:[%s5876_s6 + $0x20] ss:$8 sps:$4 sm:$0xff]   ;;  %4043 = vset.pattern.permute.xlu0 %v4488_v22 }
  0x1c   : > { %706 = vmatprep.subr.bf16.mxu1 %v4055_v15  ;;  %v391_v30 = vld [vmem:[%s4607_s13 + $0x50] sm:$0xff]  ;;  %v392_v31 = vld [vmem:[%s4607_s13 + $0x58] sm:$0xff]  ;;  %v393_v32 = vld [vmem:[%s4607_s13 + $0x60] sm:$0xff]  ;;  %4044 = vset.pattern.permute.xlu1 %v4488_v22 }
  0x1d   : > { %3805 = vmatpush3.bf16.msra.mxu0 %v4047_v2  ;;  %v394_v33 = vld [vmem:[%s4607_s13 + $0x68] sm:$0xff]  ;;  %v402_v34 = vpack.c.bf16 %v392_v31, %v391_v30  ;;  %v395_v36 = vld [vmem:[%s4607_s13 + $0x70] sm:$0xff]  ;;  %v396_v37 = vld [vmem:[%s4607_s13 + $0x78] sm:$0xff]  ;;  %s4816_s13 = scalar_lea.vmem %s5874_s4, %s3703_s24  ;;  %s3704_s24 = sshll.u32 %s4593_s21, 6 }
  0x1e   : > { %3806 = vmatprep.subr.bf16.mxu0 %v4048_v8  ;;  %v403_v35 = vpack.c.bf16 %v394_v33, %v393_v32  ;;  %v404_v38 = vpack.c.bf16 %v396_v37, %v395_v36  ;;  %v4067_v40 = vld [vmem:[%s5876_s6 + $0x14] ss:$8 sps:$4 sm:$0xff]   ;;  %v4069_v41 = vld [vmem:[%s5876_s6 + $0x10] ss:$8 sps:$4 sm:$0xff]   ;;  %v4070_v42 = vld [vmem:[%s5876_s6 + $0x4] ss:$8 sps:$4 sm:$0xff]   ;;  %s5785_s17 = scalar_lea.vmem %s5873_s3, %s3704_s24  ;;  %s5822_s24 = scalar_lea.hbm %s5878_s8, %s3707_s23 }
  0x1f   : > { %707 = vmatpush1.bf16.msra.mxu1 %v4057_v17  ;;  %v4072_v43 = vld [vmem:[%s5876_s6] ss:$8 sps:$4 sm:$0xff]   ;;  %v593_v30 = vld [vmem:[%s4696_s25 + $0x18] sm:$0xff] }
  0x20   : > { %708 = vmatprep.subr.bf16.mxu1 %v4058_v19  ;;  %v3558_v48 = vld [vmem:[%s5872_s2] ss:$0 sm:$0xff]  ;;  %v591_v24 = vld [vmem:[%s4696_s25 + $0x8] sm:$0xff] }
  0x21   : > { %3807 = vmatpush3.bf16.msra.mxu0 %v4048_v8  ;;  %v590_v25 = vld [vmem:[%s4696_s25] sm:$0xff]  ;;  %v595_v37 = vld [vmem:[%s4696_s25 + $0x28] sm:$0xff] }
  0x23   : > { %709 = vmatpush1.bf16.msra.mxu1 %v4060_v20 }
  0x24   : > { %3809 = vmatmul.mubr.msk.bf16.vlgmr.msra.gmra.mxu0 %vm444_vm0, %v398_v16  ;;  %710 = vmatprep.subr.bf16.mxu1 %v4061_v23 }
  0x25   : > { %3812 = vmatprep.mubr.msk.bf16.mxu0 %vm444_vm0, %v399_v18 }
  0x27   : > { %711 = vmatpush1.bf16.msra.mxu1 %v4063_v26 }
  0x28   : > { %712 = vmatprep.subr.bf16.mxu1 %v4064_v27  ;;  %v592_v27 = vld [vmem:[%s4696_s25 + $0x10] sm:$0xff] }
  0x2b   : > { %713 = vmatpush1.bf16.msra.mxu1 %v4066_v39 }
  0x2c   : > { %3813 = vmatmul.mubr.msk.bf16.gmra.mxu0 %vm444_vm0, %v400_v28  ;;  %714 = vmatprep.subr.bf16.mxu1 %v4067_v40  ;;  %v596_v40 = vld [vmem:[%s4696_s25 + $0x30] sm:$0xff] }
  0x2d   : > { %3816 = vmatprep.mubr.msk.bf16.mxu0 %vm444_vm0, %v401_v29 }
  0x2f   : > { %715 = vmatpush1.bf16.msra.mxu1 %v4069_v41 }
  0x30   : > { %716 = vmatprep.subr.bf16.mxu1 %v4070_v42 }
  0x33   : > { %717 = vmatpush1.bf16.msra.mxu1 %v4072_v43  ;;  %v597_v43 = vld [vmem:[%s4696_s25 + $0x38] sm:$0xff] }
  0x34   : > { %3817 = vmatmul.mubr.msk.bf16.gmra.mxu0 %vm444_vm0, %v402_v34 }
  0x35   : > { %3820 = vmatprep.mubr.msk.bf16.mxu0 %vm444_vm0, %v403_v35 }
  0x3c   : > { %3821 = vmatmul.mubr.msk.bf16.gmra.mxu0 %vm444_vm0, %v404_v38  ;;  %v594_v38 = vld [vmem:[%s4696_s25 + $0x20] sm:$0xff] }
  0xe4   : > { %v3810_v45 = vpop.f32.mrf.mxu0 }
  0xe5   : > { %v512_v57 = vadd.f32 %v3810_v45, %v3558_v48 }
  0xe6   : > { %v503_v46 = vpop.f32.mrf.mxu0 }
  0xe7   : > { %v504_v50 = vadd.f32 %v3558_v48, %v503_v46 }
  0xe8   : > { %v3811_v47 = vpop.f32.mrf.mxu0 }
  0xe9   : > { %v515_v55 = vadd.f32 %v3811_v47, %v3558_v48 }
  0xea   : > { %v506_v49 = vpop.f32.mrf.mxu0 }
  0xeb   : > { %v507_v51 = vadd.f32 %v3558_v48, %v506_v49  ;;  %v567_v58 = vpack.c.bf16 %v515_v55, %v512_v57  ;;  %v601_v55 = vld [vmem:[%s4696_s25 + $0x58] sm:$0xff] }
  0xec   : > { %v3814_v52 = vpop.f32.mrf.mxu0 }
  0xed   : > { %v566_v53 = vpack.c.bf16 %v507_v51, %v504_v50  ;;  %v528_v2 = vadd.f32 %v3814_v52, %v3558_v48  ;;  %v599_v51 = vld [vmem:[%s4696_s25 + $0x48] sm:$0xff] }
  0xee   : > { %v519_v54 = vpop.f32.mrf.mxu0 }
  0xef   : > { %735 = vmatmul.mubr.bf16.vlgmr.msra.gmra.mxu1 %v566_v53  ;;  %v520_v61 = vadd.f32 %v3558_v48, %v519_v54 }
  0xf0   : > { %744 = vmatprep.mubr.bf16.mxu1 %v4487_v44  ;;  %v3815_v56 = vpop.f32.mrf.mxu0 }
  0xf1   : > { %v531_v3 = vadd.f32 %v3815_v56, %v3558_v48 }
  0xf2   : > { %v522_v59 = vpop.f32.mrf.mxu0 }
  0xf3   : > { %v523_v62 = vadd.f32 %v3558_v48, %v522_v59  ;;  %v569_v5 = vpack.c.bf16 %v531_v3, %v528_v2  ;;  %v603_v59 = vld [vmem:[%s4696_s25 + $0x68] sm:$0xff] }
  0xf4   : > { %v3818_v60 = vpop.f32.mrf.mxu0  ;;  %v607_v3 = vld [vmem:[%s4696_s25 + $0x88] sm:$0xff] }
  0xf5   : > { %v568_v0 = vpack.c.bf16 %v523_v62, %v520_v61  ;;  %v544_v11 = vadd.f32 %v3818_v60, %v3558_v48 }
  0xf6   : > { %v535_v63 = vpop.f32.mrf.mxu0 }
  0xf7   : > { %745 = vmatmul.mubr.bf16.gmra.mxu1 %v567_v58  ;;  %v536_v6 = vadd.f32 %v3558_v48, %v535_v63  ;;  %v605_v63 = vld [vmem:[%s4696_s25 + $0x78] sm:$0xff] }
  0xf8   : > { %754 = vmatprep.mubr.bf16.mxu1 %v4487_v44  ;;  %v3819_v1 = vpop.f32.mrf.mxu0 }
  0xf9   : > { %v547_v12 = vadd.f32 %v3819_v1, %v3558_v48 }
  0xfa   : > { %v538_v4 = vpop.f32.mrf.mxu0 }
  0xfb   : > { %v539_v7 = vadd.f32 %v3558_v48, %v538_v4  ;;  %v571_v14 = vpack.c.bf16 %v547_v12, %v544_v11  ;;  %v611_v11 = vld [vmem:[%s4696_s25 + $0xa8] sm:$0xff] }
  0xfc   : > { %v3822_v8 = vpop.f32.mrf.mxu0 }
  0xfd   : > { %v570_v9 = vpack.c.bf16 %v539_v7, %v536_v6  ;;  %v560_v19 = vadd.f32 %v3822_v8, %v3558_v48  ;;  %v609_v7 = vld [vmem:[%s4696_s25 + $0x98] sm:$0xff] }
  0xfe   : > { %v551_v10 = vpop.f32.mrf.mxu0 }
  0xff   : > { %755 = vmatmul.mubr.bf16.gmra.mxu1 %v568_v0  ;;  %v552_v16 = vadd.f32 %v3558_v48, %v551_v10 }
 0x100   : > { %764 = vmatprep.mubr.bf16.mxu1 %v4487_v44  ;;  %v3823_v13 = vpop.f32.mrf.mxu0 }
 0x101   : > { %v563_v20 = vadd.f32 %v3823_v13, %v3558_v48 }
 0x102   : > { %v554_v15 = vpop.f32.mrf.mxu0 }
 0x103   : > { %v555_v17 = vadd.f32 %v3558_v48, %v554_v15  ;;  %v573_v21 = vpack.c.bf16 %v563_v20, %v560_v19  ;;  %v613_v15 = vld [vmem:[%s4696_s25 + $0xb8] sm:$0xff]  ;;  %v615_v19 = vld [vmem:[%s4696_s25 + $0xc8] sm:$0xff] }
 0x105   : > { %v572_v18 = vpack.c.bf16 %v555_v17, %v552_v16 }
 0x107   : > { %765 = vmatmul.mubr.bf16.gmra.mxu1 %v569_v5 }
 0x108   : > { %774 = vmatprep.mubr.bf16.mxu1 %v4487_v44 }
 0x10f   : > { %775 = vmatmul.mubr.bf16.gmra.mxu1 %v570_v9 }
 0x110   : > { %784 = vmatprep.mubr.bf16.mxu1 %v4487_v44 }
 0x117   : > { %785 = vmatmul.mubr.bf16.gmra.mxu1 %v571_v14 }
 0x118   : > { %794 = vmatprep.mubr.bf16.mxu1 %v4487_v44 }
 0x11f   : > { %795 = vmatmul.mubr.bf16.gmra.mxu1 %v572_v18 }
 0x120   : > { %804 = vmatprep.mubr.bf16.mxu1 %v4487_v44 }
 0x127   : > { %805 = vmatmul.mubr.bf16.gmra.mxu1 %v573_v21 }
 0x1af   : > { %v736_v23 = vpop.f32.mrf.mxu1 }
 0x1b0   : > { %v737_v31 = vadd.f32 %v736_v23, %v590_v25  ;;  %v617_v23 = vld [vmem:[%s4696_s25 + $0xd8] sm:$0xff]  ;;  %v614_v25 = vld [vmem:[%s4696_s25 + $0xc0] sm:$0xff] }
 0x1b1   : > { %v738_v26 = vpop.f32.mrf.mxu1 }
 0x1b2   : > { %v4701_v28 = vadd.f32 %v738_v26, %v591_v24 }
 0x1b3   : > { %v740_v29 = vpop.f32.mrf.mxu1 }
 0x1b4   : > { %v741_v32 = vadd.f32 %v740_v29, %v592_v27  ;;  %849 = vperm.xlu0 %4043, %v4701_v28   ;;  %v616_v27 = vld [vmem:[%s4696_s25 + $0xd0] sm:$0xff]  ;;  %v618_v29 = vld [vmem:[%s4696_s25 + $0xe0] sm:$0xff] }
 0x1b5   : > { %v742_v33 = vpop.f32.mrf.mxu1 }
 0x1b6   : > { %v4705_v34 = vpack.c.bf16 %v741_v32, %v737_v31  ;;  %v4707_v35 = vadd.f32 %v742_v33, %v593_v30  ;;  %v619_v31 = vld [vmem:[%s4696_s25 + $0xe8] sm:$0xff]  ;;  %v620_v33 = vld [vmem:[%s4696_s25 + $0xf0] sm:$0xff] }
 0x1b7   : > { %v746_v36 = vpop.f32.mrf.mxu1 }
 0x1b8   : > { %854 = vperm.xlu0 %4043, %v4707_v35   ;;  %v747_v45 = vadd.f32 %v746_v36, %v594_v38  ;;  %v610_v36 = vld [vmem:[%s4696_s25 + $0xa0] sm:$0xff] }
 0x1b9   : > { %v748_v39 = vpop.f32.mrf.mxu1 }
 0x1ba   : > { %v4713_v41 = vadd.f32 %v748_v39, %v595_v37 }
 0x1bb   : > { %v750_v42 = vpop.f32.mrf.mxu1 }
 0x1bc   : > { %v751_v46 = vadd.f32 %v750_v42, %v596_v40  ;;  %859 = vperm.xlu1 %4044, %v4713_v41   ;;  %v612_v42 = vld [vmem:[%s4696_s25 + $0xb0] sm:$0xff] }
 0x1bd   : > { %v752_v47 = vpop.f32.mrf.mxu1 }
 0x1be   : > { %v4717_v48 = vpack.c.bf16 %v751_v46, %v747_v45  ;;  %v4719_v49 = vadd.f32 %v752_v47, %v597_v43  ;;  %v621_v45 = vld [vmem:[%s4696_s25 + $0xf8] sm:$0xff] }
 0x1bf   : > { %v4721_v50 = vpop.f32.mrf.mxu1 }
 0x1c0   : > { %864 = vperm.xlu1 %4044, %v4719_v49  }
 0x1c1   : > { %v758_v52 = vpop.f32.mrf.mxu1 }
 0x1c2   : > { %v4725_v53 = vadd.f32 %v758_v52, %v599_v51 }
 0x1c3   : > { %v4727_v54 = vpop.f32.mrf.mxu1 }
 0x1c4   : > { %869 = vperm.xlu0 %4043, %v4725_v53  }
 0x1c5   : > { %v762_v56 = vpop.f32.mrf.mxu1 }
 0x1c6   : > { %v4731_v57 = vadd.f32 %v762_v56, %v601_v55 }
 0x1c7   : > { %v4733_v58 = vpop.f32.mrf.mxu1 }
 0x1c8   : > { %874 = vperm.xlu1 %4044, %v4731_v57  }
 0x1c9   : > { %v768_v60 = vpop.f32.mrf.mxu1 }
 0x1ca   : > { %v4737_v61 = vadd.f32 %v768_v60, %v603_v59  ;;  %v606_v60 = vld [vmem:[%s4696_s25 + $0x80] sm:$0xff] }
 0x1cb   : > { %v4739_v62 = vpop.f32.mrf.mxu1 }
 0x1cc   : > { %879 = vperm.xlu0 %4043, %v4737_v61  }
 0x1cd   : > { %v772_v0 = vpop.f32.mrf.mxu1 }
 0x1ce   : > { %v4743_v1 = vadd.f32 %v772_v0, %v605_v63  ;;  %v608_v63 = vld [vmem:[%s4696_s25 + $0x90] sm:$0xff] }
 0x1cf   : > { %v776_v2 = vpop.f32.mrf.mxu1 }
 0x1d0   : > { %884 = vperm.xlu1 %4044, %v4743_v1  }
 0x1d1   : > { %v778_v4 = vpop.f32.mrf.mxu1 }
 0x1d2   : > { %v4747_v5 = vadd.f32 %v778_v4, %v607_v3  ;;  %v604_v4 = vld [vmem:[%s4696_s25 + $0x70] sm:$0xff] }
 0x1d3   : > { %v780_v6 = vpop.f32.mrf.mxu1 }
 0x1d4   : > { %889 = vperm.xlu1 %4044, %v4747_v5   ;;  %v781_v0 = vadd.f32 %v780_v6, %v608_v63 }
 0x1d5   : > { %v782_v8 = vpop.f32.mrf.mxu1 }
 0x1d6   : > { %v4751_v9 = vadd.f32 %v782_v8, %v609_v7  ;;  %v771_v8 = vadd.f32 %v4739_v62, %v604_v4 }
 0x1d7   : > { %v786_v10 = vpop.f32.mrf.mxu1 }
 0x1d8   : > { %894 = vperm.xlu1 %4044, %v4751_v9   ;;  %v787_v47 = vadd.f32 %v786_v10, %v610_v36  ;;  %v600_v10 = vld [vmem:[%s4696_s25 + $0x50] sm:$0xff] }
 0x1d9   : > { %v788_v12 = vpop.f32.mrf.mxu1 }
 0x1da   : > { %v4755_v13 = vadd.f32 %v788_v12, %v611_v11 }
 0x1db   : > { %v790_v14 = vpop.f32.mrf.mxu1 }
 0x1dc   : > { %899 = vperm.xlu1 %4044, %v4755_v13   ;;  %v791_v52 = vadd.f32 %v790_v14, %v612_v42 }
 0x1dd   : > { %v792_v16 = vpop.f32.mrf.mxu1 }
 0x1de   : > { %v4759_v17 = vadd.f32 %v792_v16, %v613_v15  ;;  %v1152_v3 = vpack.c.bf16 %v791_v52, %v787_v47  ;;  %v4853_v47 = vld [vmem:[%s4816_s13 + $0x18] sm:$0xff] }
 0x1df   : > { %v796_v18 = vpop.f32.mrf.mxu1 }
 0x1e0   : > { %904 = vperm.xlu1 %4044, %v4759_v17   ;;  %v797_v37 = vadd.f32 %v796_v18, %v614_v25 }
 0x1e1   : > { %v798_v20 = vpop.f32.mrf.mxu1 }
 0x1e2   : > { %v4763_v21 = vadd.f32 %v798_v20, %v615_v19  ;;  %v4823_v20 = vld [vmem:[%s4816_s13 + $0x38] sm:$0xff] }
 0x1e3   : > { %v800_v22 = vpop.f32.mrf.mxu1 }
 0x1e4   : > { %909 = vperm.xlu1 %4044, %v4763_v21   ;;  %v801_v38 = vadd.f32 %v800_v22, %v616_v27 }
 0x1e5   : > { %v802_v24 = vpop.f32.mrf.mxu1 }
 0x1e6   : > { %v4768_v26 = vadd.f32 %v802_v24, %v617_v23  ;;  %v1153_v55 = vpack.c.bf16 %v801_v38, %v797_v37 }
 0x1e7   : > { %v806_v30 = vpop.f32.mrf.mxu1 }
 0x1e8   : > { %914 = vperm.xlu1 %4044, %v4768_v26   ;;  %v807_v39 = vadd.f32 %v806_v30, %v618_v29 }
 0x1e9   : > { %v808_v32 = vpop.f32.mrf.mxu1 }
 0x1ea   : > { %v809_v40 = vadd.f32 %v808_v32, %v619_v31  ;;  %815 = vxpose.xlu0.b32.start [1/16] (narrow) %v4701_v28, 8  ;;  %v777_v28 = vadd.f32 %v776_v2, %v606_v60  ;;  %v598_v2 = vld [vmem:[%s4696_s25 + $0x40] sm:$0xff]  ;;  %v4836_v32 = vld [vmem:[%s4816_s13 + $0x8] sm:$0xff] }
 0x1eb   : > { %v810_v43 = vpop.f32.mrf.mxu1  ;;  %v757_v12 = vadd.f32 %v4721_v50, %v598_v2  ;;  %v4861_v60 = vld [vmem:[%s4816_s13 + $0x20] sm:$0xff]  ;;  %v4877_v2 = vld [vmem:[%s4816_s13 + $0x30] sm:$0xff] }
 0x1ec   : > { %v811_v46 = vadd.f32 %v810_v43, %v620_v33  ;;  %919 = vperm.xlu1 %4044, %v809_v40   ;;  %v1151_v7 = vpack.c.bf16 %v781_v0, %v777_v28 }
 0x1ed   : > { %v812_v51 = vpop.f32.mrf.mxu1 }
 0x1ee   : > { %v1154_v56 = vpack.c.bf16 %v811_v46, %v807_v39  ;;  %v813_v59 = vadd.f32 %v812_v51, %v621_v45  ;;  %816 = vxpose.xlu0.b32.cont [2/16] (narrow) %v4707_v35, 8  ;;  %v602_v35 = vld [vmem:[%s4696_s25 + $0x60] sm:$0xff]  ;;  %s3447_s25 = sshll.u32 %s5801_s22, 4  ;;  %s5824_s25 = int_to_ptr.vmem [resolvable:$true] %s3447_s25 }
 0x1ef   : > { %v767_v11 = vadd.f32 %v4733_v58, %v602_v35  ;;  %s4425_s9 = scalar_lea.vmem %s5824_s25, 2048 }
 0x1f0   : > { %3824 = vmatprep.subr.bf16.mxu0 %v1154_v56  ;;  %924 = vperm.xlu1 %4044, %v813_v59   ;;  %p4426_p11 = scmp.ne.s32.totalorder %s5824_s25, %s4425_s9 }
 0x1f1   : > { %3825 = vmatpush3.bf16.msra.mxu0 %v1154_v56  ;;  %v1150_v6 = vpack.c.bf16 %v771_v8, %v767_v11 }
 0x1f2   : > { %817 = vxpose.xlu0.b32.cont [3/16] (narrow) %v4713_v41, 8  ;;  %3826 = vmatprep.subr.bf16.mxu0 %v1153_v55  ;;  %v761_v41 = vadd.f32 %v4727_v54, %v600_v10  ;;  %v927_v54 = vlaneseq  ;;  %p4427_p12 = pnand %p4426_p11, %p4575_p5 }
 0x1f4   : > { %v928_v58 = vshrl.u32 %v927_v54, 7  ;;  %p4428_p13 = pneg %p4427_p12 }
 0x1f5   : > { %3827 = vmatpush3.bf16.msra.mxu0 %v1153_v55 }
 0x1f6   : > { %818 = vxpose.xlu0.b32.cont [4/16] (narrow) %v4719_v49, 8  ;;  %3828 = vmatprep.subr.bf16.mxu0 %v1152_v3  ;;  %v1149_v49 = vpack.c.bf16 %v761_v41, %v757_v12  ;;  %v4806_v62 = vsub.s32 0, %v928_v58 }
 0x1f9   : > { %3829 = vmatpush3.bf16.msra.mxu0 %v1152_v3 }
 0x1fa   : > { %819 = vxpose.xlu0.b32.cont [5/16] (narrow) %v4725_v53, 8  ;;  %3830 = vmatprep.subr.bf16.mxu0 %v1151_v7 }
 0x1fd   : > { %3831 = vmatpush3.bf16.msra.mxu0 %v1151_v7  ;;  %v4869_v7 = vld [vmem:[%s4816_s13 + $0x28] sm:$0xff] }
 0x1fe   : > { %3832 = vmatprep.subr.bf16.mxu0 %v1150_v6  ;;  %820 = vxpose.xlu0.b32.cont [6/16] (narrow) %v4731_v57, 8 }
 0x201   : > { %3833 = vmatpush3.bf16.msra.mxu0 %v1150_v6 }
 0x202   : > { %3834 = vmatprep.subr.bf16.mxu0 %v1149_v49  ;;  %821 = vxpose.xlu0.b32.cont [7/16] (narrow) %v4737_v61, 8 }
 0x205   : > { %3835 = vmatpush3.bf16.msra.mxu0 %v1149_v49 }
 0x206   : > { %3836 = vmatprep.subr.bf16.mxu0 %v4717_v48  ;;  %822 = vxpose.xlu0.b32.cont [8/16] (narrow) %v4743_v1, 8 }
 0x209   : > { %3837 = vmatpush3.bf16.msra.mxu0 %v4717_v48 }
 0x20a   : > { %823 = vxpose.xlu0.b32.cont [9/16] (narrow) %v4747_v5, 8  ;;  %3838 = vmatprep.subr.bf16.mxu0 %v4705_v34 }
 0x20d   : > { %3839 = vmatpush3.bf16.msra.mxu0 %v4705_v34 }
 0x20e   : > { %824 = vxpose.xlu0.b32.cont [10/16] (narrow) %v4751_v9, 8 }
 0x212   : > { %825 = vxpose.xlu0.b32.cont [11/16] (narrow) %v4755_v13, 8 }
 0x216   : > { %826 = vxpose.xlu0.b32.cont [12/16] (narrow) %v4759_v17, 8 }
 0x21a   : > { %827 = vxpose.xlu0.b32.cont [13/16] (narrow) %v4763_v21, 8  ;;  %v4826_v21 = vld [vmem:[%s4816_s13] sm:$0xff] }
 0x21e   : > { %828 = vxpose.xlu0.b32.cont [14/16] (narrow) %v4768_v26, 8 }
 0x222   : > { %829 = vxpose.xlu0.b32.cont [15/16] (narrow) %v809_v40, 8  ;;  %v4845_v40 = vld [vmem:[%s4816_s13 + $0x10] sm:$0xff] }
 0x226   : > { %830 = vxpose.xlu0.b32.end [16/16] (narrow) %v813_v59, 8 }
 0x22f   : > { %v850_v48 = vpop.permute.xlu0 %849 }
 0x233   : > { %v855_v50 = vpop.permute.xlu0 %854 }
 0x237   : > { %v860_v53 = vpop.permute.xlu1 %859 }
 0x23b   : > { %v865_v34 = vpop.permute.xlu1 %864 }
 0x23f   : > { %v870_v57 = vpop.permute.xlu0 %869 }
 0x243   : > { %v875_v1 = vpop.permute.xlu1 %874 }
 0x247   : > { %v880_v61 = vpop.permute.xlu0 %879 }
 0x24b   : > { %v885_v13 = vpop.permute.xlu1 %884 }
 0x24f   : > { %v890_v25 = vpop.permute.xlu1 %889 }
 0x253   : > { %v895_v39 = vpop.permute.xlu1 %894 }
 0x257   : > { %v900_v51 = vpop.permute.xlu1 %899 }
 0x25b   : > { %v905_v4 = vpop.permute.xlu1 %904 }
 0x25f   : > { %v910_v41 = vpop.permute.xlu1 %909 }
 0x266   : > { %v831_v5 = vpop.trf.xlu0 }
 0x267   : > { %v4809_v9 = vrot.slane %v831_v5, %v4806_v62 }
 0x269   : > { %v938_v14 = vadd.f32 %v4809_v9, %v885_v13  ;;  %v931_v15 = vadd.f32 %v4809_v9, %v850_v48  ;;  %v932_v16 = vadd.f32 %v4809_v9, %v855_v50  ;;  %v933_v19 = vadd.f32 %v4809_v9, %v860_v53  ;;  %v4885_v50 = vld [vmem:[%s4816_s13 + $0x40] sm:$0xff] }
 0x26a   : > { %v934_v26 = vadd.f32 %v4809_v9, %v865_v34  ;;  %v935_v38 = vadd.f32 %v4809_v9, %v870_v57  ;;  %v936_v46 = vadd.f32 %v4809_v9, %v875_v1  ;;  %v937_v59 = vadd.f32 %v4809_v9, %v880_v61  ;;  %v915_v34 = vpop.permute.xlu1 %914  ;;  %v4893_v61 = vld [vmem:[%s4816_s13 + $0x48] sm:$0xff] }
 0x26b   : > { %v954_v17 = vmul.f32 0.2, %v938_v14  ;;  %v947_v18 = vmul.f32 0.2, %v931_v15  ;;  %v948_v22 = vmul.f32 0.2, %v932_v16  ;;  %v939_v3 = vadd.f32 %v4809_v9, %v890_v25 }
 0x26c   : > { %v949_v31 = vmul.f32 0.2, %v933_v19  ;;  %v950_v37 = vmul.f32 0.2, %v934_v26  ;;  %v951_v45 = vmul.f32 0.2, %v935_v38  ;;  %v940_v11 = vadd.f32 %v4809_v9, %v895_v39 }
 0x26d   : > { %v970_v23 = vmax.f32 %v938_v14, %v954_v17  ;;  %v963_v24 = vmax.f32 %v931_v15, %v947_v18  ;;  %v964_v30 = vmax.f32 %v932_v16, %v948_v22  ;;  %v952_v56 = vmul.f32 0.2, %v936_v46  ;;  %v4901_v15 = vld [vmem:[%s4816_s13 + $0x50] sm:$0xff] }
 0x26e   : > { %v965_v36 = vmax.f32 %v933_v19, %v949_v31  ;;  %v966_v43 = vmax.f32 %v934_v26, %v950_v37  ;;  %v967_v55 = vmax.f32 %v935_v38, %v951_v45  ;;  %v953_v0 = vmul.f32 0.2, %v937_v59  ;;  %v920_v16 = vpop.permute.xlu1 %919  ;;  %v4925_v45 = vld [vmem:[%s4816_s13 + $0x68] sm:$0xff] }
 0x26f   : > { %v4830_v27 = vadd.f32 %v970_v23, %v4823_v20  ;;  %v4833_v29 = vadd.f32 %v963_v24, %v4826_v21  ;;  %v4841_v33 = vadd.f32 %v964_v30, %v4836_v32  ;;  %v968_v28 = vmax.f32 %v936_v46, %v952_v56  ;;  %v4909_v23 = vld [vmem:[%s4816_s13 + $0x58] sm:$0xff]  ;;  %v4932_v56 = vld [vmem:[%s4816_s13 + $0x70] sm:$0xff] }
 0x270   : > { %v4849_v42 = vadd.f32 %v965_v36, %v4845_v40  ;;  %v4857_v52 = vadd.f32 %v966_v43, %v4853_v47  ;;  %v4865_v63 = vadd.f32 %v967_v55, %v4861_v60  ;;  %v969_v8 = vmax.f32 %v937_v59, %v953_v0  ;;  %v4917_v36 = vld [vmem:[%s4816_s13 + $0x60] sm:$0xff] }
 0x271   : > { %1009 = vmax.xlane.f32.xlu0 %v4830_v27  ;;  %995 = vmax.xlane.f32.xlu1 %v4833_v29  ;;  %v4873_v35 = vadd.f32 %v968_v28, %v4869_v7  ;;  %v955_v10 = vmul.f32 0.2, %v939_v3  ;;  %v956_v49 = vmul.f32 0.2, %v940_v11  ;;  %v941_v48 = vadd.f32 %v4809_v9, %v900_v51  ;;  %v4939_v28 = vld [vmem:[%s4816_s13 + $0x78] sm:$0xff] }
 0x272   : > { %v4881_v6 = vadd.f32 %v969_v8, %v4877_v2  ;;  %v942_v58 = vadd.f32 %v4809_v9, %v905_v4  ;;  %v943_v14 = vadd.f32 %v4809_v9, %v910_v41  ;;  %v944_v22 = vadd.f32 %v4809_v9, %v915_v34  ;;  %v925_v31 = vpop.permute.xlu1 %924 }
 0x273   : > { %v971_v12 = vmax.f32 %v939_v3, %v955_v10  ;;  %v972_v54 = vmax.f32 %v940_v11, %v956_v49  ;;  %v957_v57 = vmul.f32 0.2, %v941_v48  ;;  %v945_v24 = vadd.f32 %v4809_v9, %v920_v16 }
 0x274   : > { %v958_v13 = vmul.f32 0.2, %v942_v58  ;;  %v959_v19 = vmul.f32 0.2, %v943_v14  ;;  %v960_v30 = vmul.f32 0.2, %v944_v22  ;;  %v946_v38 = vadd.f32 %v4809_v9, %v925_v31 }
 0x275   : > { %997 = vmax.xlane.f32.xlu1 %v4841_v33  ;;  %v4889_v53 = vadd.f32 %v971_v12, %v4885_v50  ;;  %v4897_v1 = vadd.f32 %v972_v54, %v4893_v61  ;;  %v973_v5 = vmax.f32 %v941_v48, %v957_v57  ;;  %v961_v37 = vmul.f32 0.2, %v945_v24 }
 0x276   : > { %v974_v18 = vmax.f32 %v942_v58, %v958_v13  ;;  %v975_v26 = vmax.f32 %v943_v14, %v959_v19  ;;  %v976_v43 = vmax.f32 %v944_v22, %v960_v30  ;;  %v962_v46 = vmul.f32 0.2, %v946_v38 }
 0x277   : > { %v4905_v17 = vadd.f32 %v973_v5, %v4901_v15  ;;  %v977_v55 = vmax.f32 %v945_v24, %v961_v37 }
 0x278   : > { %v4914_v25 = vadd.f32 %v974_v18, %v4909_v23  ;;  %v4922_v39 = vadd.f32 %v975_v26, %v4917_v36  ;;  %v4929_v51 = vadd.f32 %v976_v43, %v4925_v45  ;;  %v978_v9 = vmax.f32 %v946_v38, %v962_v46 }
 0x279   : > { %999 = vmax.xlane.f32.xlu1 %v4849_v42  ;;  %v4936_v59 = vadd.f32 %v977_v55, %v4932_v56 }
 0x27a   : > { %v4943_v0 = vadd.f32 %v978_v9, %v4939_v28 }
 0x27d   : > { %1001 = vmax.xlane.f32.xlu1 %v4857_v52 }
 0x281   : > { %1003 = vmax.xlane.f32.xlu1 %v4865_v63 }
 0x285   : > { %1005 = vmax.xlane.f32.xlu1 %v4873_v35 }
 0x289   : > { %1007 = vmax.xlane.f32.xlu1 %v4881_v6 }
 0x28d   : > { %1011 = vmax.xlane.f32.xlu1 %v4889_v53 }
 0x291   : > { %1013 = vmax.xlane.f32.xlu1 %v4897_v1 }
 0x295   : > { %1015 = vmax.xlane.f32.xlu1 %v4905_v17 }
 0x299   : > { %1017 = vmax.xlane.f32.xlu1 %v4914_v25 }
 0x29d   : > { %1019 = vmax.xlane.f32.xlu1 %v4922_v39 }
 0x2a1   : > { %1021 = vmax.xlane.f32.xlu1 %v4929_v51 }
 0x2a5   : > { %1023 = vmax.xlane.f32.xlu1 %v4936_v59 }
 0x2a9   : > { %1025 = vmax.xlane.f32.xlu1 %v4943_v0 }
 0x2fa   : > { %v996_v3 = vpop.xlane.xlu1 %995  ;;  %v1010_v5 = vpop.xlane.xlu0 %1009 }
 0x2fb   : > { %v1027_v4 = vsub.f32 %v4833_v29, %v996_v3  ;;  %v1034_v14 = vsub.f32 %v4830_v27, %v1010_v5 }
 0x2fd   : > { %v1043_v8 = vmul.f32 1.442695, %v1027_v4  ;;  %v1057_v19 = vmul.f32 1.442695, %v1034_v14 }
 0x2fe   : > { %v998_v10 = vpop.xlane.xlu1 %997 }
 0x2ff   : > { %v1028_v11 = vsub.f32 %v4841_v33, %v998_v10  ;;  %4153 = vpow2.f32 %v1043_v8 }
 0x301   : > { %v1045_v41 = vmul.f32 1.442695, %v1028_v11 }
 0x302   : > { %v1000_v12 = vpop.xlane.xlu1 %999 }
 0x303   : > { %4155 = vpow2.f32 %v1045_v41  ;;  %v1029_v49 = vsub.f32 %v4849_v42, %v1000_v12 }
 0x305   : > { %v1047_v48 = vmul.f32 1.442695, %v1029_v49 }
 0x306   : > { %v1002_v54 = vpop.xlane.xlu1 %1001 }
 0x307   : > { %4157 = vpow2.f32 %v1047_v48  ;;  %v1030_v57 = vsub.f32 %v4857_v52, %v1002_v54 }
 0x309   : > { %v1049_v58 = vmul.f32 1.442695, %v1030_v57 }
 0x30a   : > { %v1004_v34 = vpop.xlane.xlu1 %1003 }
 0x30b   : > { %4159 = vpow2.f32 %v1049_v58  ;;  %v1031_v29 = vsub.f32 %v4865_v63, %v1004_v34 }
 0x30c   : > { %v4951_v13 = vpop.eup %4153 }
 0x30d   : > { %v1051_v33 = vmul.f32 1.442695, %v1031_v29  ;;  %1075 = vadd.xlane.f32.xlu1 %v4951_v13 }
 0x30e   : > { %v1006_v16 = vpop.xlane.xlu1 %1005 }
 0x30f   : > { %4161 = vpow2.f32 %v1051_v33  ;;  %v1032_v42 = vsub.f32 %v4873_v35, %v1006_v16 }
 0x310   : > { %v4956_v18 = vpop.eup %4155 }
 0x311   : > { %v1053_v52 = vmul.f32 1.442695, %v1032_v42  ;;  %1077 = vadd.xlane.f32.xlu1 %v4956_v18 }
 0x312   : > { %v1008_v22 = vpop.xlane.xlu1 %1007 }
 0x313   : > { %4163 = vpow2.f32 %v1053_v52  ;;  %v1033_v63 = vsub.f32 %v4881_v6, %v1008_v22 }
 0x314   : > { %v4960_v24 = vpop.eup %4157  ;;  %4165 = vpow2.f32 %v1057_v19 }
 0x315   : > { %v1055_v26 = vmul.f32 1.442695, %v1033_v63  ;;  %1079 = vadd.xlane.f32.xlu1 %v4960_v24 }
 0x316   : > { %v1012_v27 = vpop.xlane.xlu1 %1011 }
 0x317   : > { %4167 = vpow2.f32 %v1055_v26  ;;  %v1035_v35 = vsub.f32 %v4889_v53, %v1012_v27 }
 0x318   : > { %v4964_v30 = vpop.eup %4159 }
 0x319   : > { %v1059_v31 = vmul.f32 1.442695, %v1035_v35  ;;  %1081 = vadd.xlane.f32.xlu0 %v4964_v30 }
 0x31a   : > { %v1014_v37 = vpop.xlane.xlu1 %1013 }
 0x31b   : > { %4169 = vpow2.f32 %v1059_v31  ;;  %v1036_v38 = vsub.f32 %v4897_v1, %v1014_v37 }
 0x31c   : > { %v4968_v6 = vpop.eup %4161 }
 0x31d   : > { %v1061_v43 = vmul.f32 1.442695, %v1036_v38  ;;  %1083 = vadd.xlane.f32.xlu1 %v4968_v6 }
 0x31e   : > { %v1016_v46 = vpop.xlane.xlu1 %1015 }
 0x31f   : > { %4171 = vpow2.f32 %v1061_v43  ;;  %v1037_v55 = vsub.f32 %v4905_v17, %v1016_v46 }
 0x320   : > { %v4972_v9 = vpop.eup %4163 }
 0x321   : > { %v1063_v53 = vmul.f32 1.442695, %v1037_v55  ;;  %1085 = vadd.xlane.f32.xlu0 %v4972_v9  ;;  %v4975_v4 = vpop.eup %4165 }
 0x322   : > { %v1018_v3 = vpop.xlane.xlu1 %1017 }
 0x323   : > { %4173 = vpow2.f32 %v1063_v53  ;;  %v1038_v1 = vsub.f32 %v4914_v25, %v1018_v3 }
 0x324   : > { %v4978_v8 = vpop.eup %4167 }
 0x325   : > { %v1065_v10 = vmul.f32 1.442695, %v1038_v1  ;;  %1089 = vadd.xlane.f32.xlu0 %v4975_v4  ;;  %1087 = vadd.xlane.f32.xlu1 %v4978_v8 }
 0x326   : > { %v1020_v11 = vpop.xlane.xlu1 %1019 }
 0x327   : > { %4175 = vpow2.f32 %v1065_v10  ;;  %v1039_v17 = vsub.f32 %v4922_v39, %v1020_v11 }
 0x328   : > { %v4983_v41 = vpop.eup %4169 }
 0x329   : > { %v1067_v12 = vmul.f32 1.442695, %v1039_v17  ;;  %1091 = vadd.xlane.f32.xlu1 %v4983_v41 }
 0x32a   : > { %v1022_v49 = vpop.xlane.xlu1 %1021 }
 0x32b   : > { %4177 = vpow2.f32 %v1067_v12  ;;  %v1040_v25 = vsub.f32 %v4929_v51, %v1022_v49 }
 0x32c   : > { %v4987_v48 = vpop.eup %4171 }
 0x32d   : > { %v1069_v54 = vmul.f32 1.442695, %v1040_v25  ;;  %1093 = vadd.xlane.f32.xlu0 %v4987_v48 }
 0x32e   : > { %v1024_v57 = vpop.xlane.xlu1 %1023 }
 0x32f   : > { %4179 = vpow2.f32 %v1069_v54  ;;  %v1041_v58 = vsub.f32 %v4936_v59, %v1024_v57 }
 0x330   : > { %v4991_v34 = vpop.eup %4173 }
 0x331   : > { %v1071_v39 = vmul.f32 1.442695, %v1041_v58  ;;  %1095 = vadd.xlane.f32.xlu1 %v4991_v34 }
 0x332   : > { %v1026_v5 = vpop.xlane.xlu1 %1025 }
 0x333   : > { %4181 = vpow2.f32 %v1071_v39  ;;  %v1042_v29 = vsub.f32 %v4943_v0, %v1026_v5  ;;  %v4075_v0 = vld [vmem:[%s5876_s6 + $0xf4] ss:$8 sps:$4 sm:$0xff]   ;;  %v4079_v39 = vld [vmem:[%s5876_s6 + $0xd0] ss:$8 sps:$4 sm:$0xff]  }
 0x334   : > { %v4995_v33 = vpop.eup %4175  ;;  %1364 = vmatprep.subr.bf16.mxu0 %v4075_v0 }
 0x335   : > { %v1073_v51 = vmul.f32 1.442695, %v1042_v29  ;;  %1097 = vadd.xlane.f32.xlu0 %v4995_v33  ;;  %v4084_v29 = vld [vmem:[%s5876_s6 + $0xc4] ss:$8 sps:$4 sm:$0xff]  }
 0x337   : > { %4183 = vpow2.f32 %v1073_v51 }
 0x338   : > { %v4998_v14 = vpop.eup %4177 }
 0x339   : > { %1099 = vadd.xlane.f32.xlu1 %v4998_v14 }
 0x33c   : > { %v5001_v59 = vpop.eup %4179 }
 0x33d   : > { %1101 = vadd.xlane.f32.xlu0 %v5001_v59 }
 0x340   : > { %v5004_v16 = vpop.eup %4181 }
 0x341   : > { %1103 = vadd.xlane.f32.xlu1 %v5004_v16 }
 0x344   : > { %v5007_v42 = vpop.eup %4183 }
 0x345   : > { %1105 = vadd.xlane.f32.xlu0 %v5007_v42 }
 0x396   : > { %v1076_v52 = vpop.xlane.xlu1 %1075 }
 0x397   : > { %4185 = vrcp.f32 %v1076_v52 }
 0x39a   : > { %v1078_v19 = vpop.xlane.xlu1 %1077 }
 0x39b   : > { %4187 = vrcp.f32 %v1078_v19  ;;  %v4082_v19 = vld [vmem:[%s5876_s6 + $0xc0] ss:$8 sps:$4 sm:$0xff]  }
 0x39e   : > { %v1080_v22 = vpop.xlane.xlu1 %1079 }
 0x39f   : > { %4189 = vrcp.f32 %v1080_v22 }
 0x3a2   : > { %v1082_v63 = vpop.xlane.xlu0 %1081 }
 0x3a3   : > { %4191 = vrcp.f32 %v1082_v63  ;;  %v4087_v63 = vld [vmem:[%s5876_s6 + $0xb4] ss:$8 sps:$4 sm:$0xff]  }
 0x3a4   : > { %v4186_v27 = vpop.eup %4185 }
 0x3a5   : > { %v1123_v37 = vmul.f32 %v4186_v27, %v4951_v13  ;;  %v4073_v13 = vld [vmem:[%s5876_s6 + $0xf0] ss:$8 sps:$4 sm:$0xff]  }
 0x3a6   : > { %v1084_v26 = vpop.xlane.xlu1 %1083 }
 0x3a7   : > { %4193 = vrcp.f32 %v1084_v26 }
 0x3a8   : > { %v4188_v35 = vpop.eup %4187 }
 0x3a9   : > { %v1124_v38 = vmul.f32 %v4188_v35, %v4956_v18  ;;  %v4078_v18 = vld [vmem:[%s5876_s6 + $0xe4] ss:$8 sps:$4 sm:$0xff]  }
 0x3aa   : > { %v1086_v31 = vpop.xlane.xlu0 %1085  ;;  %v4090_v35 = vld [vmem:[%s5876_s6 + $0xa4] ss:$8 sps:$4 sm:$0xff]  }
 0x3ab   : > { %4195 = vrcp.f32 %v1086_v31  ;;  %v1139_v43 = vpack.c.bf16 %v1124_v38, %v1123_v37 }
 0x3ac   : > { %v4190_v46 = vpop.eup %4189 }
 0x3ad   : > { %3840 = vmatprep.mubr.bf16.mxu0 %v1139_v43  ;;  %v1125_v1 = vmul.f32 %v4190_v46, %v4960_v24  ;;  %v4076_v24 = vld [vmem:[%s5876_s6 + $0xe0] ss:$8 sps:$4 sm:$0xff]  }
 0x3ae   : > { %v1090_v55 = vpop.xlane.xlu0 %1089  ;;  %v1088_v53 = vpop.xlane.xlu1 %1087  ;;  %v4088_v46 = vld [vmem:[%s5876_s6 + $0xa0] ss:$8 sps:$4 sm:$0xff]  }
 0x3af   : > { %4197 = vrcp.f32 %v1090_v55 }
 0x3b0   : > { %v4192_v3 = vpop.eup %4191  ;;  %4199 = vrcp.f32 %v1088_v53 }
 0x3b1   : > { %v1126_v10 = vmul.f32 %v4192_v3, %v4964_v30  ;;  %v4081_v30 = vld [vmem:[%s5876_s6 + $0xd4] ss:$8 sps:$4 sm:$0xff]  }
 0x3b2   : > { %v1092_v11 = vpop.xlane.xlu1 %1091 }
 0x3b3   : > { %v1140_v17 = vpack.c.bf16 %v1126_v10, %v1125_v1  ;;  %4201 = vrcp.f32 %v1092_v11 }
 0x3b4   : > { %v4194_v12 = vpop.eup %4193 }
 0x3b5   : > { %3841 = vmatmul.mubr.bf16.vlgmr.msra.gmra.mxu0 %v1140_v17  ;;  %v1127_v54 = vmul.f32 %v4194_v12, %v4968_v6 }
 0x3b6   : > { %v1094_v49 = vpop.xlane.xlu0 %1093  ;;  %1365 = vmatpush1.bf16.msra.mxu0 %v4073_v13 }
 0x3b7   : > { %4203 = vrcp.f32 %v1094_v49  ;;  %1366 = vmatprep.subr.bf16.mxu0 %v4078_v18 }
 0x3b8   : > { %v4196_v25 = vpop.eup %4195 }
 0x3b9   : > { %v1128_v57 = vmul.f32 %v4196_v25, %v4972_v9 }
 0x3ba   : > { %v1096_v58 = vpop.xlane.xlu1 %1095  ;;  %1367 = vmatpush1.bf16.msra.mxu0 %v4076_v24 }
 0x3bb   : > { %v1141_v5 = vpack.c.bf16 %v1128_v57, %v1127_v54  ;;  %1368 = vmatprep.subr.bf16.mxu0 %v4081_v30  ;;  %4205 = vrcp.f32 %v1096_v58  ;;  %v3587_v58 = vld [vmem:[%s5877_s7] ss:$0 sm:$0xff] }
 0x3bc   : > { %v4198_v51 = vpop.eup %4197 }
 0x3bd   : > { %v4200_v0 = vpop.eup %4199  ;;  %3844 = vmatprep.mubr.bf16.mxu0 %v1141_v5  ;;  %v1130_v6 = vmul.f32 %v4198_v51, %v4975_v4  ;;  %v4085_v4 = vld [vmem:[%s5876_s6 + $0xb0] ss:$8 sps:$4 sm:$0xff]  }
 0x3be   : > { %v1098_v52 = vpop.xlane.xlu0 %1097  ;;  %v1129_v9 = vmul.f32 %v4200_v0, %v4978_v8  ;;  %1369 = vmatpush1.bf16.msra.mxu0 %v4079_v39 }
 0x3bf   : > { %4207 = vrcp.f32 %v1098_v52  ;;  %1370 = vmatprep.subr.bf16.mxu0 %v4084_v29 }
 0x3c0   : > { %v1142_v22 = vpack.c.bf16 %v1130_v6, %v1129_v9  ;;  %v4202_v26 = vpop.eup %4201 }
 0x3c1   : > { %v1131_v31 = vmul.f32 %v4202_v26, %v4983_v41 }
 0x3c2   : > { %3845 = vmatmul.mubr.bf16.gmra.mxu0 %v1142_v22  ;;  %v1100_v27 = vpop.xlane.xlu1 %1099 }
 0x3c3   : > { %1371 = vmatpush1.bf16.msra.mxu0 %v4082_v19  ;;  %4209 = vrcp.f32 %v1100_v27 }
 0x3c4   : > { %v4204_v8 = vpop.eup %4203  ;;  %1372 = vmatprep.subr.bf16.mxu0 %v4087_v63 }
 0x3c5   : > { %v1132_v37 = vmul.f32 %v4204_v8, %v4987_v48 }
 0x3c6   : > { %v1102_v38 = vpop.xlane.xlu0 %1101 }
 0x3c7   : > { %4211 = vrcp.f32 %v1102_v38  ;;  %v1143_v43 = vpack.c.bf16 %v1132_v37, %v1131_v31  ;;  %1373 = vmatpush1.bf16.msra.mxu0 %v4085_v4 }
 0x3c8   : > { %1374 = vmatprep.subr.bf16.mxu0 %v4090_v35  ;;  %v4206_v55 = vpop.eup %4205 }
 0x3c9   : > { %3848 = vmatprep.mubr.bf16.mxu0 %v1143_v43  ;;  %v1133_v1 = vmul.f32 %v4206_v55, %v4991_v34 }
 0x3ca   : > { %v1104_v53 = vpop.xlane.xlu1 %1103 }
 0x3cb   : > { %1375 = vmatpush1.bf16.msra.mxu0 %v4088_v46  ;;  %4213 = vrcp.f32 %v1104_v53 }
 0x3cc   : > { %v4208_v3 = vpop.eup %4207 }
 0x3cd   : > { %v1134_v41 = vmul.f32 %v4208_v3, %v4995_v33  ;;  %v4091_v33 = vld [vmem:[%s5876_s6 + $0x90] ss:$8 sps:$4 sm:$0xff]  }
 0x3ce   : > { %v1106_v48 = vpop.xlane.xlu0 %1105 }
 0x3cf   : > { %4215 = vrcp.f32 %v1106_v48  ;;  %v1144_v10 = vpack.c.bf16 %v1134_v41, %v1133_v1 }
 0x3d0   : > { %v4210_v11 = vpop.eup %4209 }
 0x3d1   : > { %3849 = vmatmul.mubr.bf16.gmra.mxu0 %v1144_v10  ;;  %v1135_v17 = vmul.f32 %v4210_v11, %v4998_v14  ;;  %v4093_v14 = vld [vmem:[%s5876_s6 + $0x94] ss:$8 sps:$4 sm:$0xff]  }
 0x3d2   : > { %1376 = vmatprep.subr.bf16.mxu0 %v4093_v14 }
 0x3d3   : > { %1377 = vmatpush1.bf16.msra.mxu0 %v4091_v33 }
 0x3d4   : > { %v4212_v13 = vpop.eup %4211 }
 0x3d5   : > { %v1136_v18 = vmul.f32 %v4212_v13, %v5001_v59  ;;  %v4094_v59 = vld [vmem:[%s5876_s6 + $0x80] ss:$8 sps:$4 sm:$0xff]  }
 0x3d7   : > { %v1145_v12 = vpack.c.bf16 %v1136_v18, %v1135_v17 }
 0x3d8   : > { %v4214_v49 = vpop.eup %4213 }
 0x3d9   : > { %3852 = vmatprep.mubr.bf16.mxu0 %v1145_v12  ;;  %v1137_v30 = vmul.f32 %v4214_v49, %v5004_v16  ;;  %v4096_v16 = vld [vmem:[%s5876_s6 + $0x84] ss:$8 sps:$4 sm:$0xff]  }
 0x3da   : > { %1378 = vmatprep.subr.bf16.mxu0 %v4096_v16 }
 0x3db   : > { %1379 = vmatpush1.bf16.msra.mxu0 %v4094_v59 }
 0x3dc   : > { %v4216_v24 = vpop.eup %4215 }
 0x3dd   : > { %v1138_v34 = vmul.f32 %v4216_v24, %v5007_v42 }
 0x3df   : > { %v1146_v25 = vpack.c.bf16 %v1138_v34, %v1137_v30 }
 0x3e1   : > { %3853 = vmatmul.mubr.bf16.gmra.mxu0 %v1146_v25 }
 0x3e2   : > { %1396 = vmatprep.mubr.bf16.mxu0 %v4487_v44 }
 0x475   : > { %v3842_v42 = vpop.f32.mrf.mxu0 }
 0x476   : > { %v1205_v52 = vadd.f32 %v3842_v42, %v3587_v58 }
 0x477   : > { %v1196_v54 = vpop.f32.mrf.mxu0 }
 0x478   : > { %v1197_v5 = vadd.f32 %v3587_v58, %v1196_v54 }
 0x479   : > { %v3843_v57 = vpop.f32.mrf.mxu0 }
 0x47a   : > { %v1208_v0 = vadd.f32 %v3843_v57, %v3587_v58 }
 0x47b   : > { %v1199_v39 = vpop.f32.mrf.mxu0 }
 0x47c   : > { %v1200_v29 = vadd.f32 %v3587_v58, %v1199_v39  ;;  %v1260_v19 = vpack.c.bf16 %v1208_v0, %v1205_v52 }
 0x47e   : > { %v1259_v51 = vpack.c.bf16 %v1200_v29, %v1197_v5 }
 0x480   : > { %1397 = vmatmul.mubr.bf16.vlgmr.msra.gmra.mxu0 %v1259_v51 }
 0x481   : > { %1406 = vmatprep.mubr.bf16.mxu0 %v4487_v44 }
 0x482   : > { %v3846_v6 = vpop.f32.mrf.mxu0 }
 0x483   : > { %v1221_v37 = vadd.f32 %v3846_v6, %v3587_v58 }
 0x484   : > { %v1212_v9 = vpop.f32.mrf.mxu0 }
 0x485   : > { %v1213_v27 = vadd.f32 %v3587_v58, %v1212_v9 }
 0x486   : > { %v3847_v22 = vpop.f32.mrf.mxu0 }
 0x487   : > { %v1224_v35 = vadd.f32 %v3847_v22, %v3587_v58 }
 0x488   : > { %v1215_v63 = vpop.f32.mrf.mxu0  ;;  %1407 = vmatmul.mubr.bf16.gmra.mxu0 %v1260_v19 }
 0x489   : > { %1416 = vmatprep.mubr.bf16.mxu0 %v4487_v44  ;;  %v1216_v26 = vadd.f32 %v3587_v58, %v1215_v63  ;;  %v1262_v43 = vpack.c.bf16 %v1224_v35, %v1221_v37 }
 0x48b   : > { %v1261_v4 = vpack.c.bf16 %v1216_v26, %v1213_v27 }
 0x490   : > { %1417 = vmatmul.mubr.bf16.gmra.mxu0 %v1261_v4 }
 0x491   : > { %v3850_v8 = vpop.f32.mrf.mxu0  ;;  %1426 = vmatprep.mubr.bf16.mxu0 %v4487_v44 }
 0x492   : > { %v1237_v10 = vadd.f32 %v3850_v8, %v3587_v58 }
 0x493   : > { %v1228_v31 = vpop.f32.mrf.mxu0 }
 0x494   : > { %v1229_v53 = vadd.f32 %v3587_v58, %v1228_v31 }
 0x495   : > { %v3851_v38 = vpop.f32.mrf.mxu0 }
 0x496   : > { %v1240_v41 = vadd.f32 %v3851_v38, %v3587_v58 }
 0x497   : > { %v1231_v46 = vpop.f32.mrf.mxu0 }
 0x498   : > { %1427 = vmatmul.mubr.bf16.gmra.mxu0 %v1262_v43  ;;  %v1232_v55 = vadd.f32 %v3587_v58, %v1231_v46  ;;  %v1264_v13 = vpack.c.bf16 %v1240_v41, %v1237_v10 }
 0x499   : > { %1436 = vmatprep.mubr.bf16.mxu0 %v4487_v44 }
 0x49a   : > { %v1263_v3 = vpack.c.bf16 %v1232_v55, %v1229_v53 }
 0x4a0   : > { %1437 = vmatmul.mubr.bf16.gmra.mxu0 %v1263_v3 }
 0x4a1   : > { %v3854_v1 = vpop.f32.mrf.mxu0  ;;  %1446 = vmatprep.mubr.bf16.mxu0 %v4487_v44 }
 0x4a2   : > { %v1253_v30 = vadd.f32 %v3854_v1, %v3587_v58 }
 0x4a3   : > { %v1244_v48 = vpop.f32.mrf.mxu0 }
 0x4a4   : > { %v1245_v12 = vadd.f32 %v3587_v58, %v1244_v48 }
 0x4a5   : > { %v3855_v11 = vpop.f32.mrf.mxu0 }
 0x4a6   : > { %v1256_v24 = vadd.f32 %v3855_v11, %v3587_v58 }
 0x4a7   : > { %v1247_v17 = vpop.f32.mrf.mxu0 }
 0x4a8   : > { %1447 = vmatmul.mubr.bf16.gmra.mxu0 %v1264_v13  ;;  %v1248_v18 = vadd.f32 %v3587_v58, %v1247_v17  ;;  %v1266_v34 = vpack.c.bf16 %v1256_v24, %v1253_v30 }
 0x4a9   : > { %1456 = vmatprep.mubr.bf16.mxu0 %v4487_v44 }
 0x4aa   : > { %v1265_v49 = vpack.c.bf16 %v1248_v18, %v1245_v12 }
 0x4b0   : > { %1457 = vmatmul.mubr.bf16.gmra.mxu0 %v1265_v49 }
 0x4b1   : > { %1466 = vmatprep.mubr.bf16.mxu0 %v4487_v44 }
 0x4b8   : > { %1467 = vmatmul.mubr.bf16.gmra.mxu0 %v1266_v34 }
 0x540   : > { %v1398_v25 = vpop.f32.mrf.mxu0 }
 0x542   : > { %v1400_v33 = vpop.f32.mrf.mxu0 }
 0x543   : > { %1511 = vperm.xlu1 %4044, %v1400_v33  }
 0x544   : > { %v1402_v14 = vpop.f32.mrf.mxu0 }
 0x545   : > { %v5085_v59 = vpack.c.bf16 %v1402_v14, %v1398_v25 }
 0x546   : > { %v1404_v16 = vpop.f32.mrf.mxu0 }
 0x547   : > { %1516 = vperm.xlu0 %4043, %v1404_v16  }
 0x548   : > { %v1408_v42 = vpop.f32.mrf.mxu0 }
 0x54a   : > { %v1410_v54 = vpop.f32.mrf.mxu0 }
 0x54b   : > { %1521 = vperm.xlu1 %4044, %v1410_v54  }
 0x54c   : > { %v1412_v57 = vpop.f32.mrf.mxu0 }
 0x54d   : > { %v5087_v39 = vpack.c.bf16 %v1412_v57, %v1408_v42 }
 0x54e   : > { %v1414_v5 = vpop.f32.mrf.mxu0 }
 0x54f   : > { %1526 = vperm.xlu1 %4044, %v1414_v5  }
 0x550   : > { %v1418_v29 = vpop.f32.mrf.mxu0 }
 0x552   : > { %v1420_v58 = vpop.f32.mrf.mxu0 }
 0x553   : > { %1531 = vperm.xlu0 %4043, %v1420_v58  }
 0x554   : > { %v1422_v51 = vpop.f32.mrf.mxu0 }
 0x555   : > { %v1811_v17 = vpack.c.bf16 %v1422_v51, %v1418_v29 }
 0x556   : > { %v1424_v0 = vpop.f32.mrf.mxu0 }
 0x557   : > { %1536 = vperm.xlu1 %4044, %v1424_v0  }
 0x558   : > { %v1428_v6 = vpop.f32.mrf.mxu0 }
 0x55a   : > { %v1430_v52 = vpop.f32.mrf.mxu0 }
 0x55b   : > { %1541 = vperm.xlu0 %4043, %v1430_v52  }
 0x55c   : > { %v1432_v9 = vpop.f32.mrf.mxu0 }
 0x55d   : > { %v1812_v13 = vpack.c.bf16 %v1432_v9, %v1428_v6 }
 0x55e   : > { %v1434_v19 = vpop.f32.mrf.mxu0 }
 0x55f   : > { %1546 = vperm.xlu1 %4044, %v1434_v19  }
 0x560   : > { %v1438_v22 = vpop.f32.mrf.mxu0 }
 0x562   : > { %v1440_v63 = vpop.f32.mrf.mxu0 }
 0x563   : > { %1551 = vperm.xlu1 %4044, %v1440_v63  }
 0x564   : > { %v1442_v26 = vpop.f32.mrf.mxu0 }
 0x565   : > { %v1813_v11 = vpack.c.bf16 %v1442_v26, %v1438_v22 }
 0x566   : > { %v1444_v27 = vpop.f32.mrf.mxu0 }
 0x567   : > { %1556 = vperm.xlu1 %4044, %v1444_v27  }
 0x568   : > { %v1448_v4 = vpop.f32.mrf.mxu0 }
 0x56a   : > { %v1450_v8 = vpop.f32.mrf.mxu0 }
 0x56b   : > { %1561 = vperm.xlu1 %4044, %v1450_v8  }
 0x56c   : > { %v1452_v35 = vpop.f32.mrf.mxu0 }
 0x56d   : > { %v1814_v10 = vpack.c.bf16 %v1452_v35, %v1448_v4 }
 0x56e   : > { %v1454_v31 = vpop.f32.mrf.mxu0 }
 0x56f   : > { %1566 = vperm.xlu1 %4044, %v1454_v31  }
 0x570   : > { %v1458_v37 = vpop.f32.mrf.mxu0 }
 0x572   : > { %v1460_v38 = vpop.f32.mrf.mxu0 }
 0x573   : > { %1571 = vperm.xlu1 %4044, %v1460_v38  }
 0x574   : > { %v1462_v43 = vpop.f32.mrf.mxu0 }
 0x575   : > { %v1815_v48 = vpack.c.bf16 %v1462_v43, %v1458_v37 }
 0x576   : > { %v1464_v46 = vpop.f32.mrf.mxu0 }
 0x577   : > { %1576 = vperm.xlu1 %4044, %v1464_v46  }
 0x578   : > { %v1468_v55 = vpop.f32.mrf.mxu0 }
 0x579   : > { %1477 = vxpose.xlu0.b32.start [1/16] (narrow) %v1400_v33, 8 }
 0x57a   : > { %v1470_v53 = vpop.f32.mrf.mxu0 }
 0x57b   : > { %1581 = vperm.xlu1 %4044, %v1470_v53  }
 0x57c   : > { %v1472_v3 = vpop.f32.mrf.mxu0 }
 0x57d   : > { %v1816_v1 = vpack.c.bf16 %v1472_v3, %v1468_v55  ;;  %1478 = vxpose.xlu0.b32.cont [2/16] (narrow) %v1404_v16, 8 }
 0x57e   : > { %v1474_v41 = vpop.f32.mrf.mxu0 }
 0x57f   : > { %3856 = vmatprep.subr.bf16.mxu1 %v1816_v1  ;;  %1586 = vperm.xlu1 %4044, %v1474_v41  }
 0x580   : > { %3857 = vmatpush3.bf16.msra.mxu1 %v1816_v1 }
 0x581   : > { %1479 = vxpose.xlu0.b32.cont [3/16] (narrow) %v1410_v54, 8  ;;  %3858 = vmatprep.subr.bf16.mxu1 %v1815_v48 }
 0x584   : > { %3859 = vmatpush3.bf16.msra.mxu1 %v1815_v48 }
 0x585   : > { %1480 = vxpose.xlu0.b32.cont [4/16] (narrow) %v1414_v5, 8  ;;  %3860 = vmatprep.subr.bf16.mxu1 %v1814_v10 }
 0x588   : > { %3861 = vmatpush3.bf16.msra.mxu1 %v1814_v10 }
 0x589   : > { %1481 = vxpose.xlu0.b32.cont [5/16] (narrow) %v1420_v58, 8  ;;  %3862 = vmatprep.subr.bf16.mxu1 %v1813_v11 }
 0x58c   : > { %3863 = vmatpush3.bf16.msra.mxu1 %v1813_v11 }
 0x58d   : > { %1482 = vxpose.xlu0.b32.cont [6/16] (narrow) %v1424_v0, 8  ;;  %3864 = vmatprep.subr.bf16.mxu1 %v1812_v13 }
 0x590   : > { %3865 = vmatpush3.bf16.msra.mxu1 %v1812_v13 }
 0x591   : > { %1483 = vxpose.xlu0.b32.cont [7/16] (narrow) %v1430_v52, 8  ;;  %3866 = vmatprep.subr.bf16.mxu1 %v1811_v17 }
 0x594   : > { %3867 = vmatpush3.bf16.msra.mxu1 %v1811_v17 }
 0x595   : > { %1484 = vxpose.xlu0.b32.cont [8/16] (narrow) %v1434_v19, 8  ;;  %3868 = vmatprep.subr.bf16.mxu1 %v5087_v39 }
 0x598   : > { %3869 = vmatpush3.bf16.msra.mxu1 %v5087_v39 }
 0x599   : > { %1485 = vxpose.xlu0.b32.cont [9/16] (narrow) %v1440_v63, 8  ;;  %3870 = vmatprep.subr.bf16.mxu1 %v5085_v59 }
 0x59c   : > { %3871 = vmatpush3.bf16.msra.mxu1 %v5085_v59 }
 0x59d   : > { %1486 = vxpose.xlu0.b32.cont [10/16] (narrow) %v1444_v27, 8 }
 0x5a1   : > { %1487 = vxpose.xlu0.b32.cont [11/16] (narrow) %v1450_v8, 8 }
 0x5a5   : > { %1488 = vxpose.xlu0.b32.cont [12/16] (narrow) %v1454_v31, 8 }
 0x5a9   : > { %1489 = vxpose.xlu0.b32.cont [13/16] (narrow) %v1460_v38, 8 }
 0x5ad   : > { %1490 = vxpose.xlu0.b32.cont [14/16] (narrow) %v1464_v46, 8 }
 0x5b1   : > { %1491 = vxpose.xlu0.b32.cont [15/16] (narrow) %v1470_v53, 8 }
 0x5b5   : > { %1492 = vxpose.xlu0.b32.end [16/16] (narrow) %v1474_v41, 8 }
 0x5be   : > { %v1512_v18 = vpop.permute.xlu1 %1511 }
 0x5c2   : > { %v1517_v12 = vpop.permute.xlu0 %1516 }
 0x5c6   : > { %v1522_v49 = vpop.permute.xlu1 %1521 }
 0x5ca   : > { %v1527_v30 = vpop.permute.xlu1 %1526 }
 0x5ce   : > { %v1532_v24 = vpop.permute.xlu0 %1531 }
 0x5d2   : > { %v1537_v25 = vpop.permute.xlu1 %1536 }
 0x5d6   : > { %v1542_v34 = vpop.permute.xlu0 %1541 }
 0x5da   : > { %v1547_v16 = vpop.permute.xlu1 %1546 }
 0x5de   : > { %v1552_v0 = vpop.permute.xlu1 %1551 }
 0x5e2   : > { %v1557_v8 = vpop.permute.xlu1 %1556 }
 0x5e6   : > { %v1562_v37 = vpop.permute.xlu1 %1561 }
 0x5ea   : > { %v1567_v1 = vpop.permute.xlu1 %1566 }
 0x5ee   : > { %v1572_v11 = vpop.permute.xlu1 %1571 }
 0x5f5   : > { %v1493_v33 = vpop.trf.xlu0 }
 0x5f6   : > { %v5094_v14 = vrot.slane %v1493_v33, %v4806_v62 }
 0x5f8   : > { %v1600_v59 = vadd.f32 %v5094_v14, %v1547_v16  ;;  %v1593_v42 = vadd.f32 %v5094_v14, %v1512_v18  ;;  %v1594_v54 = vadd.f32 %v5094_v14, %v1517_v12  ;;  %v1595_v5 = vadd.f32 %v5094_v14, %v1522_v49 }
 0x5f9   : > { %v1596_v6 = vadd.f32 %v5094_v14, %v1527_v30  ;;  %v1597_v4 = vadd.f32 %v5094_v14, %v1532_v24  ;;  %v1598_v31 = vadd.f32 %v5094_v14, %v1537_v25  ;;  %v1599_v46 = vadd.f32 %v5094_v14, %v1542_v34  ;;  %v1577_v30 = vpop.permute.xlu1 %1576 }
 0x5fa   : > { %v1616_v57 = vmul.f32 0.2, %v1600_v59  ;;  %v1609_v39 = vmul.f32 0.2, %v1593_v42  ;;  %v1610_v29 = vmul.f32 0.2, %v1594_v54  ;;  %v1601_v3 = vadd.f32 %v5094_v14, %v1552_v0 }
 0x5fb   : > { %v1611_v22 = vmul.f32 0.2, %v1595_v5  ;;  %v1612_v27 = vmul.f32 0.2, %v1596_v6  ;;  %v1613_v35 = vmul.f32 0.2, %v1597_v4  ;;  %v1602_v10 = vadd.f32 %v5094_v14, %v1557_v8 }
 0x5fc   : > { %v1632_v58 = vmax.f32 %v1600_v59, %v1616_v57  ;;  %v1625_v51 = vmax.f32 %v1593_v42, %v1609_v39  ;;  %v1626_v19 = vmax.f32 %v1594_v54, %v1610_v29  ;;  %v1614_v43 = vmul.f32 0.2, %v1598_v31 }
 0x5fd   : > { %v1627_v26 = vmax.f32 %v1595_v5, %v1611_v22  ;;  %v1629_v38 = vmax.f32 %v1597_v4, %v1613_v35  ;;  %v1615_v53 = vmul.f32 0.2, %v1599_v46  ;;  %v1617_v48 = vmul.f32 0.2, %v1601_v3  ;;  %v1582_v16 = vpop.permute.xlu1 %1581 }
 0x5fe   : > { %v5102_v52 = vadd.f32 %v1632_v58, %v4823_v20  ;;  %v5105_v9 = vadd.f32 %v1625_v51, %v4826_v21  ;;  %v5110_v63 = vadd.f32 %v1626_v19, %v4836_v32  ;;  %v1628_v21 = vmax.f32 %v1596_v6, %v1612_v27 }
 0x5ff   : > { %v5115_v20 = vadd.f32 %v1627_v26, %v4845_v40  ;;  %v5125_v55 = vadd.f32 %v1629_v38, %v4861_v60  ;;  %v1630_v40 = vmax.f32 %v1598_v31, %v1614_v43  ;;  %v1633_v13 = vmax.f32 %v1601_v3, %v1617_v48 }
 0x600   : > { %1671 = vmax.xlane.f32.xlu0 %v5102_v52  ;;  %1657 = vmax.xlane.f32.xlu1 %v5105_v9  ;;  %v5120_v32 = vadd.f32 %v1628_v21, %v4853_v47  ;;  %v1631_v47 = vmax.f32 %v1599_v46, %v1615_v53  ;;  %v1618_v17 = vmul.f32 0.2, %v1602_v10  ;;  %v1603_v18 = vadd.f32 %v5094_v14, %v1562_v37 }
 0x601   : > { %v5130_v41 = vadd.f32 %v1630_v40, %v4869_v7  ;;  %v5140_v12 = vadd.f32 %v1633_v13, %v4885_v50  ;;  %v1604_v24 = vadd.f32 %v5094_v14, %v1567_v1  ;;  %v1605_v33 = vadd.f32 %v5094_v14, %v1572_v11  ;;  %v1587_v29 = vpop.permute.xlu1 %1586 }
 0x602   : > { %v5135_v60 = vadd.f32 %v1631_v47, %v4877_v2  ;;  %v1634_v7 = vmax.f32 %v1602_v10, %v1618_v17  ;;  %v1619_v49 = vmul.f32 0.2, %v1603_v18  ;;  %v1606_v54 = vadd.f32 %v5094_v14, %v1577_v30 }
 0x603   : > { %v1620_v25 = vmul.f32 0.2, %v1604_v24  ;;  %v1621_v42 = vmul.f32 0.2, %v1605_v33  ;;  %v1607_v57 = vadd.f32 %v5094_v14, %v1582_v16 }
 0x604   : > { %1659 = vmax.xlane.f32.xlu1 %v5110_v63  ;;  %v5145_v34 = vadd.f32 %v1634_v7, %v4893_v61  ;;  %v1635_v2 = vmax.f32 %v1603_v18, %v1619_v49  ;;  %v1622_v5 = vmul.f32 0.2, %v1606_v54 }
 0x605   : > { %v1636_v59 = vmax.f32 %v1604_v24, %v1620_v25  ;;  %v1637_v39 = vmax.f32 %v1605_v33, %v1621_v42  ;;  %v1623_v58 = vmul.f32 0.2, %v1607_v57 }
 0x606   : > { %v5150_v50 = vadd.f32 %v1635_v2, %v4901_v15  ;;  %v1608_v15 = vadd.f32 %v5094_v14, %v1587_v29  ;;  %v1638_v0 = vmax.f32 %v1606_v54, %v1622_v5 }
 0x607   : > { %v5156_v61 = vadd.f32 %v1636_v59, %v4909_v23  ;;  %v5161_v51 = vadd.f32 %v1637_v39, %v4917_v36  ;;  %v1639_v6 = vmax.f32 %v1607_v57, %v1623_v58 }
 0x608   : > { %1661 = vmax.xlane.f32.xlu1 %v5115_v20  ;;  %v1624_v19 = vmul.f32 0.2, %v1608_v15  ;;  %v5165_v22 = vadd.f32 %v1638_v0, %v4925_v45 }
 0x609   : > { %v5169_v26 = vadd.f32 %v1639_v6, %v4932_v56 }
 0x60a   : > { %v1640_v23 = vmax.f32 %v1608_v15, %v1624_v19 }
 0x60c   : > { %1663 = vmax.xlane.f32.xlu1 %v5120_v32  ;;  %v5173_v14 = vadd.f32 %v1640_v23, %v4939_v28 }
 0x610   : > { %1665 = vmax.xlane.f32.xlu1 %v5125_v55 }
 0x614   : > { %1667 = vmax.xlane.f32.xlu1 %v5130_v41 }
 0x618   : > { %1669 = vmax.xlane.f32.xlu1 %v5135_v60 }
 0x61c   : > { %1673 = vmax.xlane.f32.xlu1 %v5140_v12 }
 0x620   : > { %1675 = vmax.xlane.f32.xlu1 %v5145_v34 }
 0x624   : > { %1677 = vmax.xlane.f32.xlu1 %v5150_v50 }
 0x628   : > { %1679 = vmax.xlane.f32.xlu1 %v5156_v61 }
 0x62c   : > { %1681 = vmax.xlane.f32.xlu1 %v5161_v51 }
 0x630   : > { %1683 = vmax.xlane.f32.xlu1 %v5165_v22 }
 0x634   : > { %1685 = vmax.xlane.f32.xlu1 %v5169_v26 }
 0x638   : > { %1687 = vmax.xlane.f32.xlu1 %v5173_v14 }
 0x689   : > { %v1658_v36 = vpop.xlane.xlu1 %1657  ;;  %v1672_v46 = vpop.xlane.xlu0 %1671 }
 0x68a   : > { %v1689_v27 = vsub.f32 %v5105_v9, %v1658_v36  ;;  %v1696_v53 = vsub.f32 %v5102_v52, %v1672_v46 }
 0x68c   : > { %v1705_v4 = vmul.f32 1.442695, %v1689_v27  ;;  %v1719_v47 = vmul.f32 1.442695, %v1696_v53 }
 0x68d   : > { %v1660_v8 = vpop.xlane.xlu1 %1659 }
 0x68e   : > { %v1690_v45 = vsub.f32 %v5110_v63, %v1660_v8  ;;  %4217 = vpow2.f32 %v1705_v4 }
 0x690   : > { %v1707_v21 = vmul.f32 1.442695, %v1690_v45 }
 0x691   : > { %v1662_v35 = vpop.xlane.xlu1 %1661 }
 0x692   : > { %4219 = vpow2.f32 %v1707_v21  ;;  %v1691_v56 = vsub.f32 %v5115_v20, %v1662_v35 }
 0x694   : > { %v1709_v31 = vmul.f32 1.442695, %v1691_v56 }
 0x695   : > { %v1664_v37 = vpop.xlane.xlu1 %1663 }
 0x696   : > { %4221 = vpow2.f32 %v1709_v31  ;;  %v1692_v28 = vsub.f32 %v5120_v32, %v1664_v37 }
 0x698   : > { %v1711_v38 = vmul.f32 1.442695, %v1692_v28 }
 0x699   : > { %v1666_v43 = vpop.xlane.xlu1 %1665 }
 0x69a   : > { %4223 = vpow2.f32 %v1711_v38  ;;  %v1693_v9 = vsub.f32 %v5125_v55, %v1666_v43 }
 0x69b   : > { %v5181_v40 = vpop.eup %4217 }
 0x69c   : > { %v1713_v63 = vmul.f32 1.442695, %v1693_v9  ;;  %1737 = vadd.xlane.f32.xlu1 %v5181_v40 }
 0x69d   : > { %v1668_v3 = vpop.xlane.xlu1 %1667 }
 0x69e   : > { %4225 = vpow2.f32 %v1713_v63  ;;  %v1694_v20 = vsub.f32 %v5130_v41, %v1668_v3 }
 0x69f   : > { %v5186_v1 = vpop.eup %4219 }
 0x6a0   : > { %v1715_v32 = vmul.f32 1.442695, %v1694_v20  ;;  %1739 = vadd.xlane.f32.xlu1 %v5186_v1 }
 0x6a1   : > { %v1670_v48 = vpop.xlane.xlu1 %1669 }
 0x6a2   : > { %4227 = vpow2.f32 %v1715_v32  ;;  %v1695_v55 = vsub.f32 %v5135_v60, %v1670_v48 }
 0x6a3   : > { %v5190_v10 = vpop.eup %4221  ;;  %4229 = vpow2.f32 %v1719_v47 }
 0x6a4   : > { %v1717_v11 = vmul.f32 1.442695, %v1695_v55  ;;  %1741 = vadd.xlane.f32.xlu1 %v5190_v10 }
 0x6a5   : > { %v1674_v52 = vpop.xlane.xlu1 %1673 }
 0x6a6   : > { %4231 = vpow2.f32 %v1717_v11  ;;  %v1697_v41 = vsub.f32 %v5140_v12, %v1674_v52  ;;  %v4105_v52 = vld [vmem:[%s5876_s6 + $0x154] ss:$8 sps:$4 sm:$0xff]  }
 0x6a7   : > { %v5194_v13 = vpop.eup %4223 }
 0x6a8   : > { %v1721_v17 = vmul.f32 1.442695, %v1697_v41  ;;  %1743 = vadd.xlane.f32.xlu0 %v5194_v13 }
 0x6a9   : > { %v1676_v18 = vpop.xlane.xlu1 %1675 }
 0x6aa   : > { %4233 = vpow2.f32 %v1721_v17  ;;  %v1698_v7 = vsub.f32 %v5145_v34, %v1676_v18 }
 0x6ab   : > { %v5198_v60 = vpop.eup %4225 }
 0x6ac   : > { %v1723_v49 = vmul.f32 1.442695, %v1698_v7  ;;  %1745 = vadd.xlane.f32.xlu1 %v5198_v60  ;;  %v4103_v7 = vld [vmem:[%s5876_s6 + $0x150] ss:$8 sps:$4 sm:$0xff]  }
 0x6ad   : > { %v1678_v24 = vpop.xlane.xlu1 %1677 }
 0x6ae   : > { %4235 = vpow2.f32 %v1723_v49  ;;  %v1699_v30 = vsub.f32 %v5150_v50, %v1678_v24  ;;  %v4108_v24 = vld [vmem:[%s5876_s6 + $0x144] ss:$8 sps:$4 sm:$0xff]  }
 0x6af   : > { %v5202_v2 = vpop.eup %4227 }
 0x6b0   : > { %v1725_v12 = vmul.f32 1.442695, %v1699_v30  ;;  %1747 = vadd.xlane.f32.xlu0 %v5202_v2  ;;  %v5205_v33 = vpop.eup %4229 }
 0x6b1   : > { %v1680_v25 = vpop.xlane.xlu1 %1679 }
 0x6b2   : > { %4237 = vpow2.f32 %v1725_v12  ;;  %v1700_v34 = vsub.f32 %v5156_v61, %v1680_v25 }
 0x6b3   : > { %v5208_v16 = vpop.eup %4231 }
 0x6b4   : > { %v1727_v59 = vmul.f32 1.442695, %v1700_v34  ;;  %1751 = vadd.xlane.f32.xlu0 %v5205_v33  ;;  %1749 = vadd.xlane.f32.xlu1 %v5208_v16  ;;  %v4106_v34 = vld [vmem:[%s5876_s6 + $0x140] ss:$8 sps:$4 sm:$0xff]  }
 0x6b5   : > { %v1682_v42 = vpop.xlane.xlu1 %1681 }
 0x6b6   : > { %4239 = vpow2.f32 %v1727_v59  ;;  %v1701_v50 = vsub.f32 %v5161_v51, %v1682_v42  ;;  %v4111_v42 = vld [vmem:[%s5876_s6 + $0x134] ss:$8 sps:$4 sm:$0xff]  }
 0x6b7   : > { %v5213_v54 = vpop.eup %4233 }
 0x6b8   : > { %v1729_v57 = vmul.f32 1.442695, %v1701_v50  ;;  %1753 = vadd.xlane.f32.xlu1 %v5213_v54 }
 0x6b9   : > { %v1684_v39 = vpop.xlane.xlu1 %1683 }
 0x6ba   : > { %4241 = vpow2.f32 %v1729_v57  ;;  %v1702_v61 = vsub.f32 %v5165_v22, %v1684_v39  ;;  %v4114_v39 = vld [vmem:[%s5876_s6 + $0x124] ss:$8 sps:$4 sm:$0xff]  }
 0x6bb   : > { %v5217_v5 = vpop.eup %4235 }
 0x6bc   : > { %v1731_v29 = vmul.f32 1.442695, %v1702_v61  ;;  %1755 = vadd.xlane.f32.xlu0 %v5217_v5 }
 0x6bd   : > { %v1686_v58 = vpop.xlane.xlu1 %1685 }
 0x6be   : > { %4243 = vpow2.f32 %v1731_v29  ;;  %v1703_v15 = vsub.f32 %v5169_v26, %v1686_v58 }
 0x6bf   : > { %v5221_v0 = vpop.eup %4237 }
 0x6c0   : > { %v1733_v51 = vmul.f32 1.442695, %v1703_v15  ;;  %1757 = vadd.xlane.f32.xlu1 %v5221_v0 }
 0x6c1   : > { %v1688_v6 = vpop.xlane.xlu1 %1687 }
 0x6c2   : > { %4245 = vpow2.f32 %v1733_v51  ;;  %v1704_v19 = vsub.f32 %v5173_v14, %v1688_v6  ;;  %v4099_v14 = vld [vmem:[%s5876_s6 + $0x174] ss:$8 sps:$4 sm:$0xff]   ;;  %v4112_v51 = vld [vmem:[%s5876_s6 + $0x120] ss:$8 sps:$4 sm:$0xff]  }
 0x6c3   : > { %v5225_v23 = vpop.eup %4239  ;;  %2027 = vmatprep.subr.bf16.mxu1 %v4099_v14 }
 0x6c4   : > { %v1735_v22 = vmul.f32 1.442695, %v1704_v19  ;;  %1759 = vadd.xlane.f32.xlu0 %v5225_v23 }
 0x6c6   : > { %4247 = vpow2.f32 %v1735_v22 }
 0x6c7   : > { %v5228_v36 = vpop.eup %4241 }
 0x6c8   : > { %1761 = vadd.xlane.f32.xlu1 %v5228_v36 }
 0x6cb   : > { %v5231_v26 = vpop.eup %4243 }
 0x6cc   : > { %1763 = vadd.xlane.f32.xlu0 %v5231_v26 }
 0x6cf   : > { %v5234_v27 = vpop.eup %4245 }
 0x6d0   : > { %1765 = vadd.xlane.f32.xlu1 %v5234_v27 }
 0x6d3   : > { %v5237_v4 = vpop.eup %4247 }
 0x6d4   : > { %1767 = vadd.xlane.f32.xlu0 %v5237_v4 }
 0x725   : > { %v1738_v8 = vpop.xlane.xlu1 %1737 }
 0x726   : > { %4249 = vrcp.f32 %v1738_v8 }
 0x729   : > { %v1740_v45 = vpop.xlane.xlu1 %1739 }
 0x72a   : > { %4251 = vrcp.f32 %v1740_v45 }
 0x72d   : > { %v1742_v21 = vpop.xlane.xlu1 %1741 }
 0x72e   : > { %4253 = vrcp.f32 %v1742_v21 }
 0x731   : > { %v1744_v35 = vpop.xlane.xlu0 %1743 }
 0x732   : > { %4255 = vrcp.f32 %v1744_v35 }
 0x733   : > { %v4250_v31 = vpop.eup %4249 }
 0x734   : > { %v1785_v38 = vmul.f32 %v4250_v31, %v5181_v40  ;;  %v4097_v40 = vld [vmem:[%s5876_s6 + $0x170] ss:$8 sps:$4 sm:$0xff]  }
 0x735   : > { %v1746_v56 = vpop.xlane.xlu1 %1745 }
 0x736   : > { %4257 = vrcp.f32 %v1746_v56 }
 0x737   : > { %v4252_v37 = vpop.eup %4251 }
 0x738   : > { %v1786_v43 = vmul.f32 %v4252_v37, %v5186_v1  ;;  %v4102_v1 = vld [vmem:[%s5876_s6 + $0x164] ss:$8 sps:$4 sm:$0xff]  }
 0x739   : > { %v1748_v28 = vpop.xlane.xlu0 %1747 }
 0x73a   : > { %4259 = vrcp.f32 %v1748_v28  ;;  %v1801_v46 = vpack.c.bf16 %v1786_v43, %v1785_v38 }
 0x73b   : > { %v4254_v9 = vpop.eup %4253 }
 0x73c   : > { %3872 = vmatprep.mubr.bf16.mxu1 %v1801_v46  ;;  %v1787_v20 = vmul.f32 %v4254_v9, %v5190_v10  ;;  %v4100_v10 = vld [vmem:[%s5876_s6 + $0x160] ss:$8 sps:$4 sm:$0xff]  }
 0x73d   : > { %v1752_v63 = vpop.xlane.xlu0 %1751  ;;  %v1750_v53 = vpop.xlane.xlu1 %1749 }
 0x73e   : > { %4261 = vrcp.f32 %v1752_v63  ;;  %v3621_v63 = vld [vmem:[%s5877_s7 + $0x1] ss:$0 sm:$0xff] }
 0x73f   : > { %v4256_v3 = vpop.eup %4255  ;;  %4263 = vrcp.f32 %v1750_v53 }
 0x740   : > { %v1788_v32 = vmul.f32 %v4256_v3, %v5194_v13 }
 0x741   : > { %v1754_v47 = vpop.xlane.xlu1 %1753 }
 0x742   : > { %v1802_v48 = vpack.c.bf16 %v1788_v32, %v1787_v20  ;;  %4265 = vrcp.f32 %v1754_v47 }
 0x743   : > { %v4258_v55 = vpop.eup %4257 }
 0x744   : > { %3873 = vmatmul.mubr.bf16.vlgmr.msra.gmra.mxu1 %v1802_v48  ;;  %v1789_v13 = vmul.f32 %v4258_v55, %v5198_v60 }
 0x745   : > { %v1756_v11 = vpop.xlane.xlu0 %1755  ;;  %2028 = vmatpush1.bf16.msra.mxu1 %v4097_v40 }
 0x746   : > { %4267 = vrcp.f32 %v1756_v11  ;;  %2029 = vmatprep.subr.bf16.mxu1 %v4102_v1 }
 0x747   : > { %v4260_v41 = vpop.eup %4259 }
 0x748   : > { %v1790_v17 = vmul.f32 %v4260_v41, %v5202_v2 }
 0x749   : > { %v1758_v18 = vpop.xlane.xlu1 %1757  ;;  %2030 = vmatpush1.bf16.msra.mxu1 %v4100_v10 }
 0x74a   : > { %v1803_v49 = vpack.c.bf16 %v1790_v17, %v1789_v13  ;;  %2031 = vmatprep.subr.bf16.mxu1 %v4105_v52  ;;  %4269 = vrcp.f32 %v1758_v18 }
 0x74b   : > { %v4262_v30 = vpop.eup %4261 }
 0x74c   : > { %v4264_v12 = vpop.eup %4263  ;;  %3876 = vmatprep.mubr.bf16.mxu1 %v1803_v49  ;;  %v1792_v60 = vmul.f32 %v4262_v30, %v5205_v33  ;;  %v4109_v33 = vld [vmem:[%s5876_s6 + $0x130] ss:$8 sps:$4 sm:$0xff]  }
 0x74d   : > { %v1760_v25 = vpop.xlane.xlu0 %1759  ;;  %v1791_v2 = vmul.f32 %v4264_v12, %v5208_v16  ;;  %2032 = vmatpush1.bf16.msra.mxu1 %v4103_v7 }
 0x74e   : > { %4271 = vrcp.f32 %v1760_v25  ;;  %2033 = vmatprep.subr.bf16.mxu1 %v4108_v24 }
 0x74f   : > { %v1804_v59 = vpack.c.bf16 %v1792_v60, %v1791_v2  ;;  %v4266_v50 = vpop.eup %4265 }
 0x750   : > { %v1793_v61 = vmul.f32 %v4266_v50, %v5213_v54 }
 0x751   : > { %3877 = vmatmul.mubr.bf16.gmra.mxu1 %v1804_v59  ;;  %v1762_v57 = vpop.xlane.xlu1 %1761 }
 0x752   : > { %2034 = vmatpush1.bf16.msra.mxu1 %v4106_v34  ;;  %4273 = vrcp.f32 %v1762_v57 }
 0x753   : > { %v4268_v16 = vpop.eup %4267  ;;  %2035 = vmatprep.subr.bf16.mxu1 %v4111_v42 }
 0x754   : > { %v1794_v29 = vmul.f32 %v4268_v16, %v5217_v5 }
 0x755   : > { %v1764_v58 = vpop.xlane.xlu0 %1763 }
 0x756   : > { %4275 = vrcp.f32 %v1764_v58  ;;  %v1805_v15 = vpack.c.bf16 %v1794_v29, %v1793_v61  ;;  %2036 = vmatpush1.bf16.msra.mxu1 %v4109_v33 }
 0x757   : > { %2037 = vmatprep.subr.bf16.mxu1 %v4114_v39  ;;  %v4270_v6 = vpop.eup %4269 }
 0x758   : > { %3880 = vmatprep.mubr.bf16.mxu1 %v1805_v15  ;;  %v1795_v14 = vmul.f32 %v4270_v6, %v5221_v0 }
 0x759   : > { %v1766_v19 = vpop.xlane.xlu1 %1765 }
 0x75a   : > { %2038 = vmatpush1.bf16.msra.mxu1 %v4112_v51  ;;  %4277 = vrcp.f32 %v1766_v19 }
 0x75b   : > { %v4272_v22 = vpop.eup %4271 }
 0x75c   : > { %v1796_v54 = vmul.f32 %v4272_v22, %v5225_v23  ;;  %v4115_v23 = vld [vmem:[%s5876_s6 + $0x110] ss:$8 sps:$4 sm:$0xff]  }
 0x75d   : > { %v1768_v5 = vpop.xlane.xlu0 %1767 }
 0x75e   : > { %4279 = vrcp.f32 %v1768_v5  ;;  %v1806_v8 = vpack.c.bf16 %v1796_v54, %v1795_v14 }
 0x75f   : > { %v4274_v45 = vpop.eup %4273 }
 0x760   : > { %3881 = vmatmul.mubr.bf16.gmra.mxu1 %v1806_v8  ;;  %v1797_v35 = vmul.f32 %v4274_v45, %v5228_v36  ;;  %v4117_v36 = vld [vmem:[%s5876_s6 + $0x114] ss:$8 sps:$4 sm:$0xff]  }
 0x761   : > { %2039 = vmatprep.subr.bf16.mxu1 %v4117_v36 }
 0x762   : > { %2040 = vmatpush1.bf16.msra.mxu1 %v4115_v23 }
 0x763   : > { %v4276_v21 = vpop.eup %4275 }
 0x764   : > { %v1798_v56 = vmul.f32 %v4276_v21, %v5231_v26  ;;  %v4118_v26 = vld [vmem:[%s5876_s6 + $0x100] ss:$8 sps:$4 sm:$0xff]  }
 0x766   : > { %v1807_v31 = vpack.c.bf16 %v1798_v56, %v1797_v35 }
 0x767   : > { %v4278_v37 = vpop.eup %4277 }
 0x768   : > { %3884 = vmatprep.mubr.bf16.mxu1 %v1807_v31  ;;  %v1799_v38 = vmul.f32 %v4278_v37, %v5234_v27  ;;  %v4120_v27 = vld [vmem:[%s5876_s6 + $0x104] ss:$8 sps:$4 sm:$0xff]  }
 0x769   : > { %2041 = vmatprep.subr.bf16.mxu1 %v4120_v27 }
 0x76a   : > { %2042 = vmatpush1.bf16.msra.mxu1 %v4118_v26 }
 0x76b   : > { %v4280_v28 = vpop.eup %4279 }
 0x76c   : > { %v1800_v0 = vmul.f32 %v4280_v28, %v5237_v4 }
 0x76e   : > { %v1808_v43 = vpack.c.bf16 %v1800_v0, %v1799_v38 }
 0x770   : > { %3885 = vmatmul.mubr.bf16.gmra.mxu1 %v1808_v43 }
 0x771   : > { %2059 = vmatprep.mubr.bf16.mxu1 %v4487_v44 }
 0x804   : > { %v3874_v4 = vpop.f32.mrf.mxu1 }
 0x805   : > { %v1868_v48 = vadd.f32 %v3874_v4, %v3621_v63 }
 0x806   : > { %v1859_v46 = vpop.f32.mrf.mxu1 }
 0x807   : > { %v1860_v3 = vadd.f32 %v3621_v63, %v1859_v46 }
 0x808   : > { %v3875_v9 = vpop.f32.mrf.mxu1 }
 0x809   : > { %v1871_v47 = vadd.f32 %v3875_v9, %v3621_v63 }
 0x80a   : > { %v1862_v53 = vpop.f32.mrf.mxu1 }
 0x80b   : > { %v1863_v20 = vadd.f32 %v3621_v63, %v1862_v53  ;;  %v1923_v55 = vpack.c.bf16 %v1871_v47, %v1868_v48 }
 0x80d   : > { %v1922_v32 = vpack.c.bf16 %v1863_v20, %v1860_v3 }
 0x80f   : > { %2060 = vmatmul.mubr.bf16.vlgmr.msra.gmra.mxu1 %v1922_v32 }
 0x810   : > { %2069 = vmatprep.mubr.bf16.mxu1 %v4487_v44 }
 0x811   : > { %v3878_v40 = vpop.f32.mrf.mxu1 }
 0x812   : > { %v1884_v49 = vadd.f32 %v3878_v40, %v3621_v63 }
 0x813   : > { %v1875_v1 = vpop.f32.mrf.mxu1 }
 0x814   : > { %v1876_v41 = vadd.f32 %v3621_v63, %v1875_v1 }
 0x815   : > { %v3879_v11 = vpop.f32.mrf.mxu1 }
 0x816   : > { %v1887_v18 = vadd.f32 %v3879_v11, %v3621_v63 }
 0x817   : > { %v1878_v10 = vpop.f32.mrf.mxu1  ;;  %2070 = vmatmul.mubr.bf16.gmra.mxu1 %v1923_v55 }
 0x818   : > { %2079 = vmatprep.mubr.bf16.mxu1 %v4487_v44  ;;  %v1879_v52 = vadd.f32 %v3621_v63, %v1878_v10  ;;  %v1925_v30 = vpack.c.bf16 %v1887_v18, %v1884_v49 }
 0x81a   : > { %v1924_v13 = vpack.c.bf16 %v1879_v52, %v1876_v41 }
 0x81f   : > { %2080 = vmatmul.mubr.bf16.gmra.mxu1 %v1924_v13 }
 0x820   : > { %v3882_v17 = vpop.f32.mrf.mxu1  ;;  %2089 = vmatprep.mubr.bf16.mxu1 %v4487_v44 }
 0x821   : > { %v1900_v50 = vadd.f32 %v3882_v17, %v3621_v63 }
 0x822   : > { %v1891_v7 = vpop.f32.mrf.mxu1 }
 0x823   : > { %v1892_v25 = vadd.f32 %v3621_v63, %v1891_v7 }
 0x824   : > { %v3883_v24 = vpop.f32.mrf.mxu1 }
 0x825   : > { %v1903_v59 = vadd.f32 %v3883_v24, %v3621_v63 }
 0x826   : > { %v1894_v12 = vpop.f32.mrf.mxu1 }
 0x827   : > { %2090 = vmatmul.mubr.bf16.gmra.mxu1 %v1925_v30  ;;  %v1895_v60 = vadd.f32 %v3621_v63, %v1894_v12  ;;  %v1927_v33 = vpack.c.bf16 %v1903_v59, %v1900_v50 }
 0x828   : > { %2099 = vmatprep.mubr.bf16.mxu1 %v4487_v44 }
 0x829   : > { %v1926_v2 = vpack.c.bf16 %v1895_v60, %v1892_v25 }
 0x82f   : > { %2100 = vmatmul.mubr.bf16.gmra.mxu1 %v1926_v2 }
 0x830   : > { %v3886_v34 = vpop.f32.mrf.mxu1  ;;  %2109 = vmatprep.mubr.bf16.mxu1 %v4487_v44 }
 0x831   : > { %v1916_v15 = vadd.f32 %v3886_v34, %v3621_v63 }
 0x832   : > { %v1907_v42 = vpop.f32.mrf.mxu1 }
 0x833   : > { %v1908_v61 = vadd.f32 %v3621_v63, %v1907_v42 }
 0x834   : > { %v3887_v57 = vpop.f32.mrf.mxu1 }
 0x835   : > { %v1919_v58 = vadd.f32 %v3887_v57, %v3621_v63 }
 0x836   : > { %v1910_v16 = vpop.f32.mrf.mxu1 }
 0x837   : > { %2110 = vmatmul.mubr.bf16.gmra.mxu1 %v1927_v33  ;;  %v1911_v39 = vadd.f32 %v3621_v63, %v1910_v16  ;;  %v1929_v51 = vpack.c.bf16 %v1919_v58, %v1916_v15 }
 0x838   : > { %2119 = vmatprep.mubr.bf16.mxu1 %v4487_v44 }
 0x839   : > { %v1928_v29 = vpack.c.bf16 %v1911_v39, %v1908_v61 }
 0x83f   : > { %2120 = vmatmul.mubr.bf16.gmra.mxu1 %v1928_v29 }
 0x840   : > { %2129 = vmatprep.mubr.bf16.mxu1 %v4487_v44 }
 0x847   : > { %2130 = vmatmul.mubr.bf16.gmra.mxu1 %v1929_v51  ;;  %v5332_v51 = vld [vmem:[%s4816_s13 + $0x38] sm:$0xff] }
 0x8cf   : > { %v2061_v6 = vpop.f32.mrf.mxu1 }
 0x8d1   : > { %v2063_v19 = vpop.f32.mrf.mxu1 }
 0x8d2   : > { %2174 = vperm.xlu1 %4044, %v2063_v19  }
 0x8d3   : > { %v2065_v22 = vpop.f32.mrf.mxu1 }
 0x8d4   : > { %v5315_v14 = vpack.c.bf16 %v2065_v22, %v2061_v6 }
 0x8d5   : > { %v2067_v54 = vpop.f32.mrf.mxu1 }
 0x8d6   : > { %2179 = vperm.xlu0 %4043, %v2067_v54  }
 0x8d7   : > { %v2071_v5 = vpop.f32.mrf.mxu1 }
 0x8d9   : > { %v2073_v8 = vpop.f32.mrf.mxu1 }
 0x8da   : > { %2184 = vperm.xlu1 %4044, %v2073_v8  }
 0x8db   : > { %v2075_v45 = vpop.f32.mrf.mxu1 }
 0x8dc   : > { %v5317_v21 = vpack.c.bf16 %v2075_v45, %v2071_v5  ;;  %v5346_v5 = vld [vmem:[%s4816_s13 + $0x8] sm:$0xff] }
 0x8dd   : > { %v2077_v35 = vpop.f32.mrf.mxu1 }
 0x8de   : > { %2189 = vperm.xlu1 %4044, %v2077_v35  }
 0x8df   : > { %v2081_v56 = vpop.f32.mrf.mxu1 }
 0x8e1   : > { %v2083_v31 = vpop.f32.mrf.mxu1 }
 0x8e2   : > { %2194 = vperm.xlu0 %4043, %v2083_v31  }
 0x8e3   : > { %v2085_v37 = vpop.f32.mrf.mxu1 }
 0x8e4   : > { %v2474_v17 = vpack.c.bf16 %v2085_v37, %v2081_v56 }
 0x8e5   : > { %v2087_v28 = vpop.f32.mrf.mxu1 }
 0x8e6   : > { %2199 = vperm.xlu1 %4044, %v2087_v28  }
 0x8e7   : > { %v2091_v38 = vpop.f32.mrf.mxu1 }
 0x8e9   : > { %v2093_v0 = vpop.f32.mrf.mxu1 }
 0x8ea   : > { %2204 = vperm.xlu0 %4043, %v2093_v0  }
 0x8eb   : > { %v2095_v43 = vpop.f32.mrf.mxu1 }
 0x8ec   : > { %v2475_v13 = vpack.c.bf16 %v2095_v43, %v2091_v38 }
 0x8ed   : > { %v2097_v23 = vpop.f32.mrf.mxu1 }
 0x8ee   : > { %2209 = vperm.xlu1 %4044, %v2097_v23  }
 0x8ef   : > { %v2101_v36 = vpop.f32.mrf.mxu1 }
 0x8f1   : > { %v2103_v26 = vpop.f32.mrf.mxu1 }
 0x8f2   : > { %2214 = vperm.xlu1 %4044, %v2103_v26  }
 0x8f3   : > { %v2105_v27 = vpop.f32.mrf.mxu1 }
 0x8f4   : > { %v2476_v41 = vpack.c.bf16 %v2105_v27, %v2101_v36 }
 0x8f5   : > { %v2107_v4 = vpop.f32.mrf.mxu1 }
 0x8f6   : > { %2219 = vperm.xlu1 %4044, %v2107_v4  }
 0x8f7   : > { %v2111_v46 = vpop.f32.mrf.mxu1 }
 0x8f9   : > { %v2113_v9 = vpop.f32.mrf.mxu1 }
 0x8fa   : > { %2224 = vperm.xlu1 %4044, %v2113_v9  }
 0x8fb   : > { %v2115_v63 = vpop.f32.mrf.mxu1 }
 0x8fc   : > { %v2477_v52 = vpack.c.bf16 %v2115_v63, %v2111_v46  ;;  %v5370_v46 = vld [vmem:[%s4816_s13 + $0x20] sm:$0xff] }
 0x8fd   : > { %v2117_v53 = vpop.f32.mrf.mxu1 }
 0x8fe   : > { %2229 = vperm.xlu1 %4044, %v2117_v53  }
 0x8ff   : > { %v2121_v3 = vpop.f32.mrf.mxu1 }
 0x901   : > { %v2123_v20 = vpop.f32.mrf.mxu1 }
 0x902   : > { %2234 = vperm.xlu1 %4044, %v2123_v20  }
 0x903   : > { %v2125_v32 = vpop.f32.mrf.mxu1 }
 0x904   : > { %v2478_v10 = vpack.c.bf16 %v2125_v32, %v2121_v3  ;;  %v5378_v32 = vld [vmem:[%s4816_s13 + $0x28] sm:$0xff] }
 0x905   : > { %v2127_v47 = vpop.f32.mrf.mxu1 }
 0x906   : > { %2239 = vperm.xlu1 %4044, %v2127_v47  }
 0x907   : > { %v2131_v40 = vpop.f32.mrf.mxu1 }
 0x908   : > { %2140 = vxpose.xlu0.b32.start [1/16] (narrow) %v2063_v19, 8  ;;  %v5338_v19 = vld [vmem:[%s4816_s13] sm:$0xff] }
 0x909   : > { %v2133_v48 = vpop.f32.mrf.mxu1 }
 0x90a   : > { %2244 = vperm.xlu1 %4044, %v2133_v48  }
 0x90b   : > { %v2135_v1 = vpop.f32.mrf.mxu1 }
 0x90c   : > { %v2479_v55 = vpack.c.bf16 %v2135_v1, %v2131_v40  ;;  %2141 = vxpose.xlu0.b32.cont [2/16] (narrow) %v2067_v54, 8 }
 0x90d   : > { %v2137_v11 = vpop.f32.mrf.mxu1 }
 0x90e   : > { %3888 = vmatprep.subr.bf16.mxu0 %v2479_v55  ;;  %2249 = vperm.xlu1 %4044, %v2137_v11  }
 0x90f   : > { %3889 = vmatpush3.bf16.msra.mxu0 %v2479_v55 }
 0x910   : > { %2142 = vxpose.xlu0.b32.cont [3/16] (narrow) %v2073_v8, 8  ;;  %3890 = vmatprep.subr.bf16.mxu0 %v2478_v10 }
 0x913   : > { %3891 = vmatpush3.bf16.msra.mxu0 %v2478_v10 }
 0x914   : > { %2143 = vxpose.xlu0.b32.cont [4/16] (narrow) %v2077_v35, 8  ;;  %3892 = vmatprep.subr.bf16.mxu0 %v2477_v52 }
 0x917   : > { %3893 = vmatpush3.bf16.msra.mxu0 %v2477_v52 }
 0x918   : > { %2144 = vxpose.xlu0.b32.cont [5/16] (narrow) %v2083_v31, 8  ;;  %3894 = vmatprep.subr.bf16.mxu0 %v2476_v41  ;;  %v5354_v31 = vld [vmem:[%s4816_s13 + $0x10] sm:$0xff] }
 0x91b   : > { %3895 = vmatpush3.bf16.msra.mxu0 %v2476_v41 }
 0x91c   : > { %2145 = vxpose.xlu0.b32.cont [6/16] (narrow) %v2087_v28, 8  ;;  %3896 = vmatprep.subr.bf16.mxu0 %v2475_v13 }
 0x91f   : > { %3897 = vmatpush3.bf16.msra.mxu0 %v2475_v13 }
 0x920   : > { %2146 = vxpose.xlu0.b32.cont [7/16] (narrow) %v2093_v0, 8  ;;  %3898 = vmatprep.subr.bf16.mxu0 %v2474_v17 }
 0x923   : > { %3899 = vmatpush3.bf16.msra.mxu0 %v2474_v17  ;;  %v5394_v17 = vld [vmem:[%s4816_s13 + $0x40] sm:$0xff] }
 0x924   : > { %2147 = vxpose.xlu0.b32.cont [8/16] (narrow) %v2097_v23, 8  ;;  %3900 = vmatprep.subr.bf16.mxu0 %v5317_v21  ;;  %v5362_v23 = vld [vmem:[%s4816_s13 + $0x18] sm:$0xff] }
 0x927   : > { %3901 = vmatpush3.bf16.msra.mxu0 %v5317_v21 }
 0x928   : > { %2148 = vxpose.xlu0.b32.cont [9/16] (narrow) %v2103_v26, 8  ;;  %3902 = vmatprep.subr.bf16.mxu0 %v5315_v14 }
 0x92b   : > { %3903 = vmatpush3.bf16.msra.mxu0 %v5315_v14 }
 0x92c   : > { %2149 = vxpose.xlu0.b32.cont [10/16] (narrow) %v2107_v4, 8 }
 0x930   : > { %2150 = vxpose.xlu0.b32.cont [11/16] (narrow) %v2113_v9, 8 }
 0x934   : > { %2151 = vxpose.xlu0.b32.cont [12/16] (narrow) %v2117_v53, 8 }
 0x938   : > { %2152 = vxpose.xlu0.b32.cont [13/16] (narrow) %v2123_v20, 8 }
 0x93c   : > { %2153 = vxpose.xlu0.b32.cont [14/16] (narrow) %v2127_v47, 8 }
 0x940   : > { %2154 = vxpose.xlu0.b32.cont [15/16] (narrow) %v2133_v48, 8 }
 0x944   : > { %2155 = vxpose.xlu0.b32.end [16/16] (narrow) %v2137_v11, 8  ;;  %v5386_v11 = vld [vmem:[%s4816_s13 + $0x30] sm:$0xff] }
 0x94d   : > { %v2175_v18 = vpop.permute.xlu1 %2174 }
 0x951   : > { %v2180_v7 = vpop.permute.xlu0 %2179 }
 0x955   : > { %v2185_v49 = vpop.permute.xlu1 %2184 }
 0x959   : > { %v2190_v30 = vpop.permute.xlu1 %2189 }
 0x95d   : > { %v2195_v24 = vpop.permute.xlu0 %2194 }
 0x961   : > { %v2200_v60 = vpop.permute.xlu1 %2199 }
 0x965   : > { %v2205_v12 = vpop.permute.xlu0 %2204 }
 0x969   : > { %v2210_v34 = vpop.permute.xlu1 %2209 }
 0x96d   : > { %v2215_v58 = vpop.permute.xlu1 %2214 }
 0x971   : > { %v2220_v56 = vpop.permute.xlu1 %2219 }
 0x975   : > { %v2225_v43 = vpop.permute.xlu1 %2224 }
 0x979   : > { %v2230_v20 = vpop.permute.xlu1 %2229 }
 0x97d   : > { %v2235_v55 = vpop.permute.xlu1 %2234 }
 0x984   : > { %v2156_v25 = vpop.trf.xlu0 }
 0x985   : > { %v5324_v2 = vrot.slane %v2156_v25, %v4806_v62 }
 0x987   : > { %v2263_v59 = vadd.f32 %v5324_v2, %v2210_v34  ;;  %v2256_v42 = vadd.f32 %v5324_v2, %v2175_v18  ;;  %v2257_v50 = vadd.f32 %v5324_v2, %v2180_v7  ;;  %v2258_v16 = vadd.f32 %v5324_v2, %v2185_v49 }
 0x988   : > { %v2259_v15 = vadd.f32 %v5324_v2, %v2190_v30  ;;  %v2260_v35 = vadd.f32 %v5324_v2, %v2195_v24  ;;  %v2261_v0 = vadd.f32 %v5324_v2, %v2200_v60  ;;  %v2262_v4 = vadd.f32 %v5324_v2, %v2205_v12  ;;  %v2240_v30 = vpop.permute.xlu1 %2239  ;;  %v5402_v12 = vld [vmem:[%s4816_s13 + $0x48] sm:$0xff] }
 0x989   : > { %v2279_v57 = vmul.f32 0.2, %v2263_v59  ;;  %v2272_v33 = vmul.f32 0.2, %v2256_v42  ;;  %v2273_v39 = vmul.f32 0.2, %v2257_v50  ;;  %v2264_v3 = vadd.f32 %v5324_v2, %v2215_v58 }
 0x98a   : > { %v2274_v54 = vmul.f32 0.2, %v2258_v16  ;;  %v2275_v21 = vmul.f32 0.2, %v2259_v15  ;;  %v2276_v38 = vmul.f32 0.2, %v2260_v35  ;;  %v2265_v1 = vadd.f32 %v5324_v2, %v2220_v56 }
 0x98b   : > { %v2295_v61 = vmax.f32 %v2263_v59, %v2279_v57  ;;  %v2288_v29 = vmax.f32 %v2256_v42, %v2272_v33  ;;  %v2289_v14 = vmax.f32 %v2257_v50, %v2273_v39  ;;  %v2277_v27 = vmul.f32 0.2, %v2261_v0  ;;  %v5410_v50 = vld [vmem:[%s4816_s13 + $0x50] sm:$0xff] }
 0x98c   : > { %v2290_v45 = vmax.f32 %v2258_v16, %v2274_v54  ;;  %v2291_v28 = vmax.f32 %v2259_v15, %v2275_v21  ;;  %v2292_v26 = vmax.f32 %v2260_v35, %v2276_v38  ;;  %v2278_v53 = vmul.f32 0.2, %v2262_v4  ;;  %v2245_v42 = vpop.permute.xlu1 %2244  ;;  %v5427_v35 = vld [vmem:[%s4816_s13 + $0x60] sm:$0xff] }
 0x98d   : > { %v5335_v6 = vadd.f32 %v5332_v51, %v2295_v61  ;;  %v5341_v22 = vadd.f32 %v5338_v19, %v2288_v29  ;;  %v5349_v8 = vadd.f32 %v5346_v5, %v2289_v14  ;;  %v2293_v63 = vmax.f32 %v2261_v0, %v2277_v27  ;;  %v5419_v29 = vld [vmem:[%s4816_s13 + $0x58] sm:$0xff] }
 0x98e   : > { %v5357_v37 = vadd.f32 %v5354_v31, %v2290_v45  ;;  %v5365_v36 = vadd.f32 %v5362_v23, %v2291_v28  ;;  %v5373_v9 = vadd.f32 %v5370_v46, %v2292_v26  ;;  %v2294_v40 = vmax.f32 %v2262_v4, %v2278_v53  ;;  %v5441_v4 = vld [vmem:[%s4816_s13 + $0x70] sm:$0xff] }
 0x98f   : > { %2334 = vmax.xlane.f32.xlu0 %v5335_v6  ;;  %2320 = vmax.xlane.f32.xlu1 %v5341_v22  ;;  %v5381_v47 = vadd.f32 %v5378_v32, %v2293_v63  ;;  %v2280_v48 = vmul.f32 0.2, %v2264_v3  ;;  %v2281_v41 = vmul.f32 0.2, %v2265_v1  ;;  %v2266_v13 = vadd.f32 %v5324_v2, %v2225_v43  ;;  %v5434_v43 = vld [vmem:[%s4816_s13 + $0x68] sm:$0xff]  ;;  %v5448_v63 = vld [vmem:[%s4816_s13 + $0x78] sm:$0xff] }
 0x990   : > { %v5389_v10 = vadd.f32 %v5386_v11, %v2294_v40  ;;  %v2267_v24 = vadd.f32 %v5324_v2, %v2230_v20  ;;  %v2268_v59 = vadd.f32 %v5324_v2, %v2235_v55  ;;  %v2269_v39 = vadd.f32 %v5324_v2, %v2240_v30  ;;  %v2250_v54 = vpop.permute.xlu1 %2249  ;;  %s4489_s13 = smov [#allocation2]  }
 0x991   : > { %v2296_v52 = vmax.f32 %v2264_v3, %v2280_v48  ;;  %v2297_v7 = vmax.f32 %v2265_v1, %v2281_v41  ;;  %v2282_v49 = vmul.f32 0.2, %v2266_v13  ;;  %v2270_v61 = vadd.f32 %v5324_v2, %v2245_v42 }
 0x992   : > { %v2283_v34 = vmul.f32 0.2, %v2267_v24  ;;  %v2284_v16 = vmul.f32 0.2, %v2268_v59  ;;  %v2285_v14 = vmul.f32 0.2, %v2269_v39  ;;  %v2271_v21 = vadd.f32 %v5324_v2, %v2250_v54 }
 0x993   : > { %2322 = vmax.xlane.f32.xlu1 %v5349_v8  ;;  %v5397_v18 = vadd.f32 %v5394_v17, %v2296_v52  ;;  %v5405_v60 = vadd.f32 %v5402_v12, %v2297_v7  ;;  %v2298_v25 = vmax.f32 %v2266_v13, %v2282_v49  ;;  %v2286_v45 = vmul.f32 0.2, %v2270_v61 }
 0x994   : > { %v2299_v33 = vmax.f32 %v2267_v24, %v2283_v34  ;;  %v2300_v15 = vmax.f32 %v2268_v59, %v2284_v16  ;;  %v2301_v28 = vmax.f32 %v2269_v39, %v2285_v14  ;;  %v2287_v0 = vmul.f32 0.2, %v2271_v21 }
 0x995   : > { %v5413_v57 = vadd.f32 %v5410_v50, %v2298_v25  ;;  %v2302_v38 = vmax.f32 %v2270_v61, %v2286_v45 }
 0x996   : > { %v5422_v58 = vadd.f32 %v5419_v29, %v2299_v33  ;;  %v5430_v56 = vadd.f32 %v5427_v35, %v2300_v15  ;;  %v5437_v26 = vadd.f32 %v5434_v43, %v2301_v28  ;;  %v2303_v27 = vmax.f32 %v2271_v21, %v2287_v0 }
 0x997   : > { %2324 = vmax.xlane.f32.xlu1 %v5357_v37  ;;  %v5444_v2 = vadd.f32 %v5441_v4, %v2302_v38 }
 0x998   : > { %v5451_v53 = vadd.f32 %v5448_v63, %v2303_v27 }
 0x99b   : > { %2326 = vmax.xlane.f32.xlu1 %v5365_v36 }
 0x99f   : > { %2328 = vmax.xlane.f32.xlu1 %v5373_v9 }
 0x9a3   : > { %2330 = vmax.xlane.f32.xlu1 %v5381_v47 }
 0x9a7   : > { %2332 = vmax.xlane.f32.xlu1 %v5389_v10 }
 0x9ab   : > { %2336 = vmax.xlane.f32.xlu1 %v5397_v18 }
 0x9af   : > { %2338 = vmax.xlane.f32.xlu1 %v5405_v60 }
 0x9b3   : > { %2340 = vmax.xlane.f32.xlu1 %v5413_v57 }
 0x9b7   : > { %2342 = vmax.xlane.f32.xlu1 %v5422_v58 }
 0x9bb   : > { %2344 = vmax.xlane.f32.xlu1 %v5430_v56 }
 0x9bf   : > { %2346 = vmax.xlane.f32.xlu1 %v5437_v26 }
 0x9c3   : > { %2348 = vmax.xlane.f32.xlu1 %v5444_v2 }
 0x9c7   : > { %2350 = vmax.xlane.f32.xlu1 %v5451_v53 }
 0xa18   : > { %v2321_v3 = vpop.xlane.xlu1 %2320  ;;  %v2335_v25 = vpop.xlane.xlu0 %2334 }
 0xa19   : > { %v2352_v20 = vsub.f32 %v5341_v22, %v2321_v3  ;;  %v2359_v59 = vsub.f32 %v5335_v6, %v2335_v25 }
 0xa1b   : > { %v2368_v40 = vmul.f32 1.442695, %v2352_v20  ;;  %v2382_v16 = vmul.f32 1.442695, %v2359_v59 }
 0xa1c   : > { %v2323_v48 = vpop.xlane.xlu1 %2322 }
 0xa1d   : > { %v2353_v1 = vsub.f32 %v5349_v8, %v2323_v48  ;;  %4281 = vpow2.f32 %v2368_v40 }
 0xa1f   : > { %v2370_v55 = vmul.f32 1.442695, %v2353_v1 }
 0xa20   : > { %v2325_v52 = vpop.xlane.xlu1 %2324 }
 0xa21   : > { %4283 = vpow2.f32 %v2370_v55  ;;  %v2354_v41 = vsub.f32 %v5357_v37, %v2325_v52 }
 0xa23   : > { %v2372_v13 = vmul.f32 1.442695, %v2354_v41 }
 0xa24   : > { %v2327_v7 = vpop.xlane.xlu1 %2326 }
 0xa25   : > { %4285 = vpow2.f32 %v2372_v13  ;;  %v2355_v49 = vsub.f32 %v5365_v36, %v2327_v7 }
 0xa27   : > { %v2374_v24 = vmul.f32 1.442695, %v2355_v49 }
 0xa28   : > { %v2329_v30 = vpop.xlane.xlu1 %2328 }
 0xa29   : > { %4287 = vpow2.f32 %v2374_v24  ;;  %v2356_v22 = vsub.f32 %v5373_v9, %v2329_v30 }
 0xa2a   : > { %v5459_v34 = vpop.eup %4281 }
 0xa2b   : > { %v2376_v8 = vmul.f32 1.442695, %v2356_v22  ;;  %2400 = vadd.xlane.f32.xlu1 %v5459_v34 }
 0xa2c   : > { %v2331_v42 = vpop.xlane.xlu1 %2330 }
 0xa2d   : > { %4289 = vpow2.f32 %v2376_v8  ;;  %v2357_v37 = vsub.f32 %v5381_v47, %v2331_v42 }
 0xa2e   : > { %v5464_v33 = vpop.eup %4283 }
 0xa2f   : > { %v2378_v36 = vmul.f32 1.442695, %v2357_v37  ;;  %2402 = vadd.xlane.f32.xlu1 %v5464_v33 }
 0xa30   : > { %v2333_v39 = vpop.xlane.xlu1 %2332 }
 0xa31   : > { %4291 = vpow2.f32 %v2378_v36  ;;  %v2358_v9 = vsub.f32 %v5389_v10, %v2333_v39 }
 0xa32   : > { %v5468_v61 = vpop.eup %4285  ;;  %4293 = vpow2.f32 %v2382_v16 }
 0xa33   : > { %v2380_v15 = vmul.f32 1.442695, %v2358_v9  ;;  %2404 = vadd.xlane.f32.xlu1 %v5468_v61 }
 0xa34   : > { %v2337_v6 = vpop.xlane.xlu1 %2336 }
 0xa35   : > { %4295 = vpow2.f32 %v2380_v15  ;;  %v2360_v47 = vsub.f32 %v5397_v18, %v2337_v6 }
 0xa36   : > { %v5472_v14 = vpop.eup %4287 }
 0xa37   : > { %v2384_v54 = vmul.f32 1.442695, %v2360_v47  ;;  %2406 = vadd.xlane.f32.xlu0 %v5472_v14 }
 0xa38   : > { %v2339_v45 = vpop.xlane.xlu1 %2338 }
 0xa39   : > { %4297 = vpow2.f32 %v2384_v54  ;;  %v2361_v21 = vsub.f32 %v5405_v60, %v2339_v45 }
 0xa3a   : > { %v5476_v10 = vpop.eup %4289 }
 0xa3b   : > { %v2386_v28 = vmul.f32 1.442695, %v2361_v21  ;;  %2408 = vadd.xlane.f32.xlu1 %v5476_v10 }
 0xa3c   : > { %v2341_v38 = vpop.xlane.xlu1 %2340 }
 0xa3d   : > { %4299 = vpow2.f32 %v2386_v28  ;;  %v2362_v0 = vsub.f32 %v5413_v57, %v2341_v38 }
 0xa3e   : > { %v5480_v27 = vpop.eup %4291 }
 0xa3f   : > { %v2388_v18 = vmul.f32 1.442695, %v2362_v0  ;;  %2410 = vadd.xlane.f32.xlu0 %v5480_v27  ;;  %v5483_v20 = vpop.eup %4293 }
 0xa40   : > { %v2343_v3 = vpop.xlane.xlu1 %2342 }
 0xa41   : > { %4301 = vpow2.f32 %v2388_v18  ;;  %v2363_v60 = vsub.f32 %v5422_v58, %v2343_v3 }
 0xa42   : > { %v5486_v40 = vpop.eup %4295 }
 0xa43   : > { %v2390_v48 = vmul.f32 1.442695, %v2363_v60  ;;  %2414 = vadd.xlane.f32.xlu0 %v5483_v20  ;;  %2412 = vadd.xlane.f32.xlu1 %v5486_v40 }
 0xa44   : > { %v2345_v1 = vpop.xlane.xlu1 %2344 }
 0xa45   : > { %4303 = vpow2.f32 %v2390_v48  ;;  %v2364_v57 = vsub.f32 %v5430_v56, %v2345_v1 }
 0xa46   : > { %v5491_v55 = vpop.eup %4297 }
 0xa47   : > { %v2392_v52 = vmul.f32 1.442695, %v2364_v57  ;;  %2416 = vadd.xlane.f32.xlu1 %v5491_v55 }
 0xa48   : > { %v2347_v41 = vpop.xlane.xlu1 %2346 }
 0xa49   : > { %4305 = vpow2.f32 %v2392_v52  ;;  %v2365_v58 = vsub.f32 %v5437_v26, %v2347_v41 }
 0xa4a   : > { %v5495_v13 = vpop.eup %4299 }
 0xa4b   : > { %v2394_v7 = vmul.f32 1.442695, %v2365_v58  ;;  %2418 = vadd.xlane.f32.xlu0 %v5495_v13 }
 0xa4c   : > { %v2349_v49 = vpop.xlane.xlu1 %2348 }
 0xa4d   : > { %4307 = vpow2.f32 %v2394_v7  ;;  %v2366_v24 = vsub.f32 %v5444_v2, %v2349_v49 }
 0xa4e   : > { %v5499_v30 = vpop.eup %4301 }
 0xa4f   : > { %v2396_v56 = vmul.f32 1.442695, %v2366_v24  ;;  %2420 = vadd.xlane.f32.xlu1 %v5499_v30 }
 0xa50   : > { %v2351_v25 = vpop.xlane.xlu1 %2350 }
 0xa51   : > { %4309 = vpow2.f32 %v2396_v56  ;;  %v2367_v22 = vsub.f32 %v5451_v53, %v2351_v25  ;;  %v4123_v53 = vld [vmem:[%s5876_s6 + $0x1f4] ss:$8 sps:$4 sm:$0xff]   ;;  %v4127_v56 = vld [vmem:[%s5876_s6 + $0x1d0] ss:$8 sps:$4 sm:$0xff]  }
 0xa52   : > { %v5503_v8 = vpop.eup %4303  ;;  %2690 = vmatprep.subr.bf16.mxu0 %v4123_v53 }
 0xa53   : > { %v2398_v26 = vmul.f32 1.442695, %v2367_v22  ;;  %2422 = vadd.xlane.f32.xlu0 %v5503_v8  ;;  %v4132_v22 = vld [vmem:[%s5876_s6 + $0x1c4] ss:$8 sps:$4 sm:$0xff]  }
 0xa55   : > { %4311 = vpow2.f32 %v2398_v26 }
 0xa56   : > { %v5506_v59 = vpop.eup %4305 }
 0xa57   : > { %2424 = vadd.xlane.f32.xlu1 %v5506_v59 }
 0xa5a   : > { %v5509_v2 = vpop.eup %4307 }
 0xa5b   : > { %2426 = vadd.xlane.f32.xlu0 %v5509_v2 }
 0xa5e   : > { %v5512_v42 = vpop.eup %4309 }
 0xa5f   : > { %2428 = vadd.xlane.f32.xlu1 %v5512_v42 }
 0xa62   : > { %v5515_v37 = vpop.eup %4311 }
 0xa63   : > { %2430 = vadd.xlane.f32.xlu0 %v5515_v37 }
 0xab4   : > { %v2401_v36 = vpop.xlane.xlu1 %2400 }
 0xab5   : > { %4313 = vrcp.f32 %v2401_v36 }
 0xab8   : > { %v2403_v16 = vpop.xlane.xlu1 %2402 }
 0xab9   : > { %4315 = vrcp.f32 %v2403_v16  ;;  %v4130_v16 = vld [vmem:[%s5876_s6 + $0x1c0] ss:$8 sps:$4 sm:$0xff]  }
 0xabc   : > { %v2405_v39 = vpop.xlane.xlu1 %2404 }
 0xabd   : > { %4317 = vrcp.f32 %v2405_v39 }
 0xac0   : > { %v2407_v9 = vpop.xlane.xlu0 %2406 }
 0xac1   : > { %4319 = vrcp.f32 %v2407_v9  ;;  %v4135_v9 = vld [vmem:[%s5876_s6 + $0x1b4] ss:$8 sps:$4 sm:$0xff]  }
 0xac2   : > { %v4314_v6 = vpop.eup %4313 }
 0xac3   : > { %v2448_v45 = vmul.f32 %v4314_v6, %v5459_v34  ;;  %v4121_v34 = vld [vmem:[%s5876_s6 + $0x1f0] ss:$8 sps:$4 sm:$0xff]  }
 0xac4   : > { %v2409_v15 = vpop.xlane.xlu1 %2408 }
 0xac5   : > { %4321 = vrcp.f32 %v2409_v15 }
 0xac6   : > { %v4316_v47 = vpop.eup %4315 }
 0xac7   : > { %v2449_v21 = vmul.f32 %v4316_v47, %v5464_v33  ;;  %v4126_v33 = vld [vmem:[%s5876_s6 + $0x1e4] ss:$8 sps:$4 sm:$0xff]  }
 0xac8   : > { %v2411_v54 = vpop.xlane.xlu0 %2410  ;;  %v4138_v47 = vld [vmem:[%s5876_s6 + $0x1a4] ss:$8 sps:$4 sm:$0xff]  }
 0xac9   : > { %4323 = vrcp.f32 %v2411_v54  ;;  %v2464_v28 = vpack.c.bf16 %v2449_v21, %v2448_v45 }
 0xaca   : > { %v4318_v38 = vpop.eup %4317 }
 0xacb   : > { %3904 = vmatprep.mubr.bf16.mxu0 %v2464_v28  ;;  %v2450_v60 = vmul.f32 %v4318_v38, %v5468_v61  ;;  %v4124_v61 = vld [vmem:[%s5876_s6 + $0x1e0] ss:$8 sps:$4 sm:$0xff]  }
 0xacc   : > { %v2415_v0 = vpop.xlane.xlu0 %2414  ;;  %v2413_v18 = vpop.xlane.xlu1 %2412  ;;  %v4136_v38 = vld [vmem:[%s5876_s6 + $0x1a0] ss:$8 sps:$4 sm:$0xff]  }
 0xacd   : > { %4325 = vrcp.f32 %v2415_v0 }
 0xace   : > { %v4320_v3 = vpop.eup %4319  ;;  %4327 = vrcp.f32 %v2413_v18 }
 0xacf   : > { %v2451_v48 = vmul.f32 %v4320_v3, %v5472_v14  ;;  %v4129_v14 = vld [vmem:[%s5876_s6 + $0x1d4] ss:$8 sps:$4 sm:$0xff]  }
 0xad0   : > { %v2417_v1 = vpop.xlane.xlu1 %2416 }
 0xad1   : > { %v2465_v57 = vpack.c.bf16 %v2451_v48, %v2450_v60  ;;  %4329 = vrcp.f32 %v2417_v1 }
 0xad2   : > { %v4322_v52 = vpop.eup %4321 }
 0xad3   : > { %3905 = vmatmul.mubr.bf16.vlgmr.msra.gmra.mxu0 %v2465_v57  ;;  %v2452_v7 = vmul.f32 %v4322_v52, %v5476_v10 }
 0xad4   : > { %v2419_v41 = vpop.xlane.xlu0 %2418  ;;  %2691 = vmatpush1.bf16.msra.mxu0 %v4121_v34 }
 0xad5   : > { %4331 = vrcp.f32 %v2419_v41  ;;  %2692 = vmatprep.subr.bf16.mxu0 %v4126_v33 }
 0xad6   : > { %v4324_v58 = vpop.eup %4323 }
 0xad7   : > { %v2453_v49 = vmul.f32 %v4324_v58, %v5480_v27 }
 0xad8   : > { %v2421_v24 = vpop.xlane.xlu1 %2420  ;;  %2693 = vmatpush1.bf16.msra.mxu0 %v4124_v61 }
 0xad9   : > { %v2466_v25 = vpack.c.bf16 %v2453_v49, %v2452_v7  ;;  %2694 = vmatprep.subr.bf16.mxu0 %v4129_v14  ;;  %4333 = vrcp.f32 %v2421_v24  ;;  %v3655_v24 = vld [vmem:[%s5877_s7 + $0x2] ss:$0 sm:$0xff] }
 0xada   : > { %v4326_v26 = vpop.eup %4325 }
 0xadb   : > { %v4328_v53 = vpop.eup %4327  ;;  %3908 = vmatprep.mubr.bf16.mxu0 %v2466_v25  ;;  %v2455_v10 = vmul.f32 %v4326_v26, %v5483_v20  ;;  %v4133_v20 = vld [vmem:[%s5876_s6 + $0x1b0] ss:$8 sps:$4 sm:$0xff]  }
 0xadc   : > { %v2423_v36 = vpop.xlane.xlu0 %2422  ;;  %v2454_v27 = vmul.f32 %v4328_v53, %v5486_v40  ;;  %2695 = vmatpush1.bf16.msra.mxu0 %v4127_v56 }
 0xadd   : > { %4335 = vrcp.f32 %v2423_v36  ;;  %2696 = vmatprep.subr.bf16.mxu0 %v4132_v22 }
 0xade   : > { %v2467_v39 = vpack.c.bf16 %v2455_v10, %v2454_v27  ;;  %v4330_v15 = vpop.eup %4329 }
 0xadf   : > { %v2456_v54 = vmul.f32 %v4330_v15, %v5491_v55 }
 0xae0   : > { %3909 = vmatmul.mubr.bf16.gmra.mxu0 %v2467_v39  ;;  %v2425_v6 = vpop.xlane.xlu1 %2424 }
 0xae1   : > { %2697 = vmatpush1.bf16.msra.mxu0 %v4130_v16  ;;  %4337 = vrcp.f32 %v2425_v6 }
 0xae2   : > { %v4332_v40 = vpop.eup %4331  ;;  %2698 = vmatprep.subr.bf16.mxu0 %v4135_v9 }
 0xae3   : > { %v2457_v45 = vmul.f32 %v4332_v40, %v5495_v13 }
 0xae4   : > { %v2427_v21 = vpop.xlane.xlu0 %2426 }
 0xae5   : > { %4339 = vrcp.f32 %v2427_v21  ;;  %v2468_v28 = vpack.c.bf16 %v2457_v45, %v2456_v54  ;;  %2699 = vmatpush1.bf16.msra.mxu0 %v4133_v20 }
 0xae6   : > { %2700 = vmatprep.subr.bf16.mxu0 %v4138_v47  ;;  %v4334_v0 = vpop.eup %4333 }
 0xae7   : > { %3912 = vmatprep.mubr.bf16.mxu0 %v2468_v28  ;;  %v2458_v60 = vmul.f32 %v4334_v0, %v5499_v30 }
 0xae8   : > { %v2429_v18 = vpop.xlane.xlu1 %2428 }
 0xae9   : > { %2701 = vmatpush1.bf16.msra.mxu0 %v4136_v38  ;;  %4341 = vrcp.f32 %v2429_v18 }
 0xaea   : > { %v4336_v3 = vpop.eup %4335 }
 0xaeb   : > { %v2459_v55 = vmul.f32 %v4336_v3, %v5503_v8  ;;  %v4139_v8 = vld [vmem:[%s5876_s6 + $0x190] ss:$8 sps:$4 sm:$0xff]  }
 0xaec   : > { %v2431_v13 = vpop.xlane.xlu0 %2430 }
 0xaed   : > { %4343 = vrcp.f32 %v2431_v13  ;;  %v2469_v48 = vpack.c.bf16 %v2459_v55, %v2458_v60 }
 0xaee   : > { %v4338_v1 = vpop.eup %4337 }
 0xaef   : > { %3913 = vmatmul.mubr.bf16.gmra.mxu0 %v2469_v48  ;;  %v2460_v57 = vmul.f32 %v4338_v1, %v5506_v59  ;;  %v4141_v59 = vld [vmem:[%s5876_s6 + $0x194] ss:$8 sps:$4 sm:$0xff]  }
 0xaf0   : > { %2702 = vmatprep.subr.bf16.mxu0 %v4141_v59 }
 0xaf1   : > { %2703 = vmatpush1.bf16.msra.mxu0 %v4139_v8 }
 0xaf2   : > { %v4340_v34 = vpop.eup %4339 }
 0xaf3   : > { %v2461_v33 = vmul.f32 %v4340_v34, %v5509_v2  ;;  %v4142_v2 = vld [vmem:[%s5876_s6 + $0x180] ss:$8 sps:$4 sm:$0xff]  }
 0xaf5   : > { %v2470_v52 = vpack.c.bf16 %v2461_v33, %v2460_v57 }
 0xaf6   : > { %v4342_v41 = vpop.eup %4341 }
 0xaf7   : > { %3916 = vmatprep.mubr.bf16.mxu0 %v2470_v52  ;;  %v2462_v14 = vmul.f32 %v4342_v41, %v5512_v42  ;;  %v4144_v42 = vld [vmem:[%s5876_s6 + $0x184] ss:$8 sps:$4 sm:$0xff]  }
 0xaf8   : > { %2704 = vmatprep.subr.bf16.mxu0 %v4144_v42 }
 0xaf9   : > { %2705 = vmatpush1.bf16.msra.mxu0 %v4142_v2 }
 0xafa   : > { %v4344_v61 = vpop.eup %4343 }
 0xafb   : > { %v2463_v30 = vmul.f32 %v4344_v61, %v5515_v37 }
 0xafd   : > { %v2471_v58 = vpack.c.bf16 %v2463_v30, %v2462_v14 }
 0xaff   : > { %3917 = vmatmul.mubr.bf16.gmra.mxu0 %v2471_v58 }
 0xb00   : > { %2722 = vmatprep.mubr.bf16.mxu0 %v4487_v44 }
 0xb93   : > { %v3906_v37 = vpop.f32.mrf.mxu0 }
 0xb94   : > { %v2531_v36 = vadd.f32 %v3906_v37, %v3655_v24 }
 0xb95   : > { %v2522_v7 = vpop.f32.mrf.mxu0 }
 0xb96   : > { %v2523_v25 = vadd.f32 %v3655_v24, %v2522_v7 }
 0xb97   : > { %v3907_v49 = vpop.f32.mrf.mxu0 }
 0xb98   : > { %v2534_v53 = vadd.f32 %v3907_v49, %v3655_v24 }
 0xb99   : > { %v2525_v56 = vpop.f32.mrf.mxu0 }
 0xb9a   : > { %v2526_v22 = vadd.f32 %v3655_v24, %v2525_v56  ;;  %v2586_v16 = vpack.c.bf16 %v2534_v53, %v2531_v36 }
 0xb9c   : > { %v2585_v26 = vpack.c.bf16 %v2526_v22, %v2523_v25 }
 0xb9e   : > { %2723 = vmatmul.mubr.bf16.vlgmr.msra.gmra.mxu0 %v2585_v26 }
 0xb9f   : > { %2732 = vmatprep.mubr.bf16.mxu0 %v4487_v44 }
 0xba0   : > { %v3910_v10 = vpop.f32.mrf.mxu0 }
 0xba1   : > { %v2547_v45 = vadd.f32 %v3910_v10, %v3655_v24 }
 0xba2   : > { %v2538_v27 = vpop.f32.mrf.mxu0 }
 0xba3   : > { %v2539_v6 = vadd.f32 %v3655_v24, %v2538_v27 }
 0xba4   : > { %v3911_v39 = vpop.f32.mrf.mxu0 }
 0xba5   : > { %v2550_v47 = vadd.f32 %v3911_v39, %v3655_v24 }
 0xba6   : > { %v2541_v9 = vpop.f32.mrf.mxu0  ;;  %2733 = vmatmul.mubr.bf16.gmra.mxu0 %v2586_v16 }
 0xba7   : > { %2742 = vmatprep.mubr.bf16.mxu0 %v4487_v44  ;;  %v2542_v15 = vadd.f32 %v3655_v24, %v2541_v9  ;;  %v2588_v28 = vpack.c.bf16 %v2550_v47, %v2547_v45 }
 0xba9   : > { %v2587_v20 = vpack.c.bf16 %v2542_v15, %v2539_v6 }
 0xbae   : > { %2743 = vmatmul.mubr.bf16.gmra.mxu0 %v2587_v20 }
 0xbaf   : > { %v3914_v40 = vpop.f32.mrf.mxu0  ;;  %2752 = vmatprep.mubr.bf16.mxu0 %v4487_v44 }
 0xbb0   : > { %v2563_v48 = vadd.f32 %v3914_v40, %v3655_v24 }
 0xbb1   : > { %v2554_v54 = vpop.f32.mrf.mxu0 }
 0xbb2   : > { %v2555_v18 = vadd.f32 %v3655_v24, %v2554_v54 }
 0xbb3   : > { %v3915_v21 = vpop.f32.mrf.mxu0 }
 0xbb4   : > { %v2566_v55 = vadd.f32 %v3915_v21, %v3655_v24 }
 0xbb5   : > { %v2557_v38 = vpop.f32.mrf.mxu0 }
 0xbb6   : > { %2753 = vmatmul.mubr.bf16.gmra.mxu0 %v2588_v28  ;;  %v2558_v0 = vadd.f32 %v3655_v24, %v2557_v38  ;;  %v2590_v34 = vpack.c.bf16 %v2566_v55, %v2563_v48 }
 0xbb7   : > { %2762 = vmatprep.mubr.bf16.mxu0 %v4487_v44 }
 0xbb8   : > { %v2589_v3 = vpack.c.bf16 %v2558_v0, %v2555_v18 }
 0xbbe   : > { %2763 = vmatmul.mubr.bf16.gmra.mxu0 %v2589_v3 }
 0xbbf   : > { %v3918_v60 = vpop.f32.mrf.mxu0  ;;  %2772 = vmatprep.mubr.bf16.mxu0 %v4487_v44 }
 0xbc0   : > { %v2579_v14 = vadd.f32 %v3918_v60, %v3655_v24 }
 0xbc1   : > { %v2570_v13 = vpop.f32.mrf.mxu0 }
 0xbc2   : > { %v2571_v52 = vadd.f32 %v3655_v24, %v2570_v13 }
 0xbc3   : > { %v3919_v1 = vpop.f32.mrf.mxu0 }
 0xbc4   : > { %v2582_v61 = vadd.f32 %v3919_v1, %v3655_v24 }
 0xbc5   : > { %v2573_v57 = vpop.f32.mrf.mxu0 }
 0xbc6   : > { %2773 = vmatmul.mubr.bf16.gmra.mxu0 %v2590_v34  ;;  %v2574_v33 = vadd.f32 %v3655_v24, %v2573_v57  ;;  %v2592_v30 = vpack.c.bf16 %v2582_v61, %v2579_v14 }
 0xbc7   : > { %2782 = vmatprep.mubr.bf16.mxu0 %v4487_v44 }
 0xbc8   : > { %v2591_v41 = vpack.c.bf16 %v2574_v33, %v2571_v52 }
 0xbce   : > { %2783 = vmatmul.mubr.bf16.gmra.mxu0 %v2591_v41 }
 0xbcf   : > { %2792 = vmatprep.mubr.bf16.mxu0 %v4487_v44 }
 0xbd6   : > { %2793 = vmatmul.mubr.bf16.gmra.mxu0 %v2592_v30 }
 0xc5e   : > { %v2724_v58 = vpop.f32.mrf.mxu0 }
 0xc60   : > { %v5593_v8 = vpop.f32.mrf.mxu0 }
 0xc61   : > { %2837 = vperm.xlu1 %4044, %v5593_v8  }
 0xc62   : > { %v2728_v59 = vpop.f32.mrf.mxu0 }
 0xc63   : > { %v5596_v2 = vpack.c.bf16 %v2728_v59, %v2724_v58 }
 0xc64   : > { %v5598_v42 = vpop.f32.mrf.mxu0 }
 0xc65   : > { %2842 = vperm.xlu0 %4043, %v5598_v42  }
 0xc66   : > { %v2734_v37 = vpop.f32.mrf.mxu0 }
 0xc68   : > { %v5601_v7 = vpop.f32.mrf.mxu0 }
 0xc69   : > { %2847 = vperm.xlu1 %4044, %v5601_v7  }
 0xc6a   : > { %v2738_v44 = vpop.f32.mrf.mxu0 }
 0xc6b   : > { %v3136_v49 = vpack.c.bf16 %v2738_v44, %v2734_v37 }
 0xc6c   : > { %v2740_v24 = vpop.f32.mrf.mxu0 }
 0xc6d   : > { %2852 = vperm.xlu1 %4044, %v2740_v24  }
 0xc6e   : > { %v2744_v56 = vpop.f32.mrf.mxu0 }
 0xc70   : > { %v2746_v25 = vpop.f32.mrf.mxu0 }
 0xc71   : > { %2857 = vperm.xlu0 %4043, %v2746_v25  }
 0xc72   : > { %v2748_v22 = vpop.f32.mrf.mxu0 }
 0xc73   : > { %v3137_v34 = vpack.c.bf16 %v2748_v22, %v2744_v56 }
 0xc74   : > { %v2750_v26 = vpop.f32.mrf.mxu0 }
 0xc75   : > { %2862 = vperm.xlu1 %4044, %v2750_v26  }
 0xc76   : > { %v2754_v53 = vpop.f32.mrf.mxu0 }
 0xc78   : > { %v2756_v10 = vpop.f32.mrf.mxu0 }
 0xc79   : > { %2867 = vperm.xlu0 %4043, %v2756_v10  }
 0xc7a   : > { %v2758_v36 = vpop.f32.mrf.mxu0 }
 0xc7b   : > { %v3138_v1 = vpack.c.bf16 %v2758_v36, %v2754_v53 }
 0xc7c   : > { %v2760_v27 = vpop.f32.mrf.mxu0 }
 0xc7d   : > { %2872 = vperm.xlu1 %4044, %v2760_v27  }
 0xc7e   : > { %v2764_v16 = vpop.f32.mrf.mxu0 }
 0xc80   : > { %v2766_v39 = vpop.f32.mrf.mxu0 }
 0xc81   : > { %2877 = vperm.xlu0 %4043, %v2766_v39  }
 0xc82   : > { %v2768_v9 = vpop.f32.mrf.mxu0 }
 0xc83   : > { %v3139_v48 = vpack.c.bf16 %v2768_v9, %v2764_v16 }
 0xc84   : > { %v2770_v15 = vpop.f32.mrf.mxu0 }
 0xc85   : > { %2882 = vperm.xlu1 %4044, %v2770_v15  }
 0xc86   : > { %v2774_v6 = vpop.f32.mrf.mxu0 }
 0xc88   : > { %v2776_v20 = vpop.f32.mrf.mxu0 }
 0xc89   : > { %2887 = vperm.xlu0 %4043, %v2776_v20  }
 0xc8a   : > { %v2778_v40 = vpop.f32.mrf.mxu0 }
 0xc8b   : > { %v3140_v13 = vpack.c.bf16 %v2778_v40, %v2774_v6 }
 0xc8c   : > { %v2780_v47 = vpop.f32.mrf.mxu0 }
 0xc8d   : > { %2892 = vperm.xlu1 %4044, %v2780_v47  }
 0xc8e   : > { %v2784_v54 = vpop.f32.mrf.mxu0 }
 0xc90   : > { %v2786_v45 = vpop.f32.mrf.mxu0 }
 0xc91   : > { %2897 = vperm.xlu0 %4043, %v2786_v45  }
 0xc92   : > { %v2788_v21 = vpop.f32.mrf.mxu0 }
 0xc93   : > { %v3141_v55 = vpack.c.bf16 %v2788_v21, %v2784_v54 }
 0xc94   : > { %v2790_v28 = vpop.f32.mrf.mxu0 }
 0xc95   : > { %2902 = vperm.xlu1 %4044, %v2790_v28  }
 0xc96   : > { %v2794_v38 = vpop.f32.mrf.mxu0 }
 0xc98   : > { %v2796_v0 = vpop.f32.mrf.mxu0 }
 0xc99   : > { %2907 = vperm.xlu0 %4043, %v2796_v0  }
 0xc9a   : > { %v2798_v18 = vpop.f32.mrf.mxu0 }
 0xc9b   : > { %v3142_v3 = vpack.c.bf16 %v2798_v18, %v2794_v38 }
 0xc9c   : > { %v2800_v60 = vpop.f32.mrf.mxu0 }
 0xc9d   : > { %3920 = vmatprep.subr.bf16.mxu1 %v3142_v3  ;;  %2912 = vperm.xlu1 %4044, %v2800_v60  }
 0xc9e   : > { %3921 = vmatpush3.bf16.msra.mxu1 %v3142_v3 }
 0xc9f   : > { %3922 = vmatprep.subr.bf16.mxu1 %v3141_v55 }
 0xca2   : > { %3923 = vmatpush3.bf16.msra.mxu1 %v3141_v55 }
 0xca3   : > { %3924 = vmatprep.subr.bf16.mxu1 %v3140_v13 }
 0xca6   : > { %3925 = vmatpush3.bf16.msra.mxu1 %v3140_v13 }
 0xca7   : > { %3926 = vmatprep.subr.bf16.mxu1 %v3139_v48 }
 0xcaa   : > { %3927 = vmatpush3.bf16.msra.mxu1 %v3139_v48 }
 0xcab   : > { %3928 = vmatprep.subr.bf16.mxu1 %v3138_v1 }
 0xcae   : > { %3929 = vmatpush3.bf16.msra.mxu1 %v3138_v1 }
 0xcaf   : > { %3930 = vmatprep.subr.bf16.mxu1 %v3137_v34 }
 0xcb2   : > { %3931 = vmatpush3.bf16.msra.mxu1 %v3137_v34 }
 0xcb3   : > { %3932 = vmatprep.subr.bf16.mxu1 %v3136_v49 }
 0xcb6   : > { %3933 = vmatpush3.bf16.msra.mxu1 %v3136_v49 }
 0xcb7   : > { %2803 = vxpose.xlu0.b32.start [1/16] (narrow) %v5593_v8, 8  ;;  %3934 = vmatprep.subr.bf16.mxu1 %v5596_v2 }
 0xcba   : > { %3935 = vmatpush3.bf16.msra.mxu1 %v5596_v2 }
 0xcbb   : > { %2804 = vxpose.xlu0.b32.cont [2/16] (narrow) %v5598_v42, 8 }
 0xcbf   : > { %2805 = vxpose.xlu0.b32.cont [3/16] (narrow) %v5601_v7, 8 }
 0xcc3   : > { %2806 = vxpose.xlu0.b32.cont [4/16] (narrow) %v2740_v24, 8 }
 0xcc7   : > { %2807 = vxpose.xlu0.b32.cont [5/16] (narrow) %v2746_v25, 8 }
 0xccb   : > { %2808 = vxpose.xlu0.b32.cont [6/16] (narrow) %v2750_v26, 8 }
 0xccf   : > { %2809 = vxpose.xlu0.b32.cont [7/16] (narrow) %v2756_v10, 8 }
 0xcd3   : > { %2810 = vxpose.xlu0.b32.cont [8/16] (narrow) %v2760_v27, 8 }
 0xcd7   : > { %2811 = vxpose.xlu0.b32.cont [9/16] (narrow) %v2766_v39, 8 }
 0xcdb   : > { %2812 = vxpose.xlu0.b32.cont [10/16] (narrow) %v2770_v15, 8 }
 0xcdc   : > { %v2838_v57 = vpop.permute.xlu1 %2837 }
 0xcdf   : > { %2813 = vxpose.xlu0.b32.cont [11/16] (narrow) %v2776_v20, 8 }
 0xce0   : > { %v2843_v33 = vpop.permute.xlu0 %2842 }
 0xce3   : > { %2814 = vxpose.xlu0.b32.cont [12/16] (narrow) %v2780_v47, 8 }
 0xce4   : > { %v2848_v52 = vpop.permute.xlu1 %2847 }
 0xce7   : > { %2815 = vxpose.xlu0.b32.cont [13/16] (narrow) %v2786_v45, 8 }
 0xce8   : > { %v2853_v61 = vpop.permute.xlu1 %2852 }
 0xceb   : > { %2816 = vxpose.xlu0.b32.cont [14/16] (narrow) %v2790_v28, 8 }
 0xcec   : > { %v2858_v41 = vpop.permute.xlu0 %2857 }
 0xcef   : > { %2817 = vxpose.xlu0.b32.cont [15/16] (narrow) %v2796_v0, 8 }
 0xcf0   : > { %v2863_v30 = vpop.permute.xlu1 %2862 }
 0xcf3   : > { %2818 = vxpose.xlu0.b32.end [16/16] (narrow) %v2800_v60, 8 }
 0xcf4   : > { %v2868_v14 = vpop.permute.xlu0 %2867 }
 0xcf8   : > { %v2873_v8 = vpop.permute.xlu1 %2872 }
 0xcfc   : > { %v2878_v58 = vpop.permute.xlu0 %2877 }
 0xd00   : > { %v2883_v2 = vpop.permute.xlu1 %2882 }
 0xd04   : > { %v2888_v59 = vpop.permute.xlu0 %2887 }
 0xd08   : > { %v2893_v37 = vpop.permute.xlu1 %2892 }
 0xd0c   : > { %v5609_v42 = vpop.permute.xlu0 %2897 }
 0xd10   : > { %v5613_v44 = vpop.permute.xlu1 %2902 }
 0xd14   : > { %v5611_v7 = vpop.permute.xlu0 %2907 }
 0xd18   : > { %v2913_v56 = vpop.permute.xlu1 %2912 }
 0xd33   : > { %v2819_v49 = vpop.trf.xlu0 }
 0xd34   : > { %v5616_v24 = vrot.slane %v2819_v49, %v4806_v62 }
 0xd36   : > { %v2919_v25 = vadd.f32 %v5616_v24, %v2838_v57  ;;  %v2934_v22 = vadd.f32 %v5616_v24, %v2913_v56  ;;  %v2920_v26 = vadd.f32 %v5616_v24, %v2843_v33  ;;  %v2921_v27 = vadd.f32 %v5616_v24, %v2848_v52 }
 0xd37   : > { %v2922_v9 = vadd.f32 %v5616_v24, %v2853_v61  ;;  %v2923_v45 = vadd.f32 %v5616_v24, %v2858_v41  ;;  %v2924_v28 = vadd.f32 %v5616_v24, %v2863_v30  ;;  %v2925_v18 = vadd.f32 %v5616_v24, %v2868_v14 }
 0xd38   : > { %v2935_v53 = vmul.f32 0.2, %v2919_v25  ;;  %v2950_v10 = vmul.f32 0.2, %v2934_v22  ;;  %v2936_v36 = vmul.f32 0.2, %v2920_v26  ;;  %v2926_v55 = vadd.f32 %v5616_v24, %v2873_v8 }
 0xd39   : > { %v2937_v20 = vmul.f32 0.2, %v2921_v27  ;;  %v2938_v54 = vmul.f32 0.2, %v2922_v9  ;;  %v2939_v21 = vmul.f32 0.2, %v2923_v45  ;;  %v2927_v1 = vadd.f32 %v5616_v24, %v2878_v58 }
 0xd3a   : > { %v2951_v16 = vmax.f32 %v2919_v25, %v2935_v53  ;;  %v2966_v39 = vmax.f32 %v2934_v22, %v2950_v10  ;;  %v2952_v6 = vmax.f32 %v2920_v26, %v2936_v36  ;;  %v2940_v0 = vmul.f32 0.2, %v2924_v28 }
 0xd3b   : > { %v2953_v47 = vmax.f32 %v2921_v27, %v2937_v20  ;;  %v2941_v60 = vmul.f32 0.2, %v2925_v18  ;;  %v2942_v48 = vmul.f32 0.2, %v2926_v55  ;;  %v2943_v57 = vmul.f32 0.2, %v2927_v1 }
 0xd3c   : > { %v5624_v15 = vadd.f32 %v5338_v19, %v2951_v16  ;;  %v5627_v62 = vadd.f32 %v5448_v63, %v2966_v39  ;;  %v5632_v40 = vadd.f32 %v5346_v5, %v2952_v6  ;;  %v2954_v63 = vmax.f32 %v2922_v9, %v2938_v54 }
 0xd3d   : > { %v5637_v19 = vadd.f32 %v5354_v31, %v2953_v47  ;;  %v2955_v5 = vmax.f32 %v2923_v45, %v2939_v21  ;;  %v2956_v31 = vmax.f32 %v2924_v28, %v2940_v0  ;;  %v2928_v33 = vadd.f32 %v5616_v24, %v2883_v2 }
 0xd3e   : > { %2983 = vmax.xlane.f32.xlu1 %v5624_v15  ;;  %3013 = vmax.xlane.f32.xlu0 %v5627_v62  ;;  %v5642_v38 = vadd.f32 %v5362_v23, %v2954_v63  ;;  %v2957_v23 = vmax.f32 %v2925_v18, %v2941_v60  ;;  %v2929_v61 = vadd.f32 %v5616_v24, %v2888_v59 }
 0xd3f   : > { %v5647_v3 = vadd.f32 %v5370_v46, %v2955_v5  ;;  %v5652_v13 = vadd.f32 %v5378_v32, %v2956_v31  ;;  %v2958_v46 = vmax.f32 %v2926_v55, %v2942_v48  ;;  %v2959_v32 = vmax.f32 %v2927_v1, %v2943_v57 }
 0xd40   : > { %v5657_v34 = vadd.f32 %v5386_v11, %v2957_v23  ;;  %v2944_v41 = vmul.f32 0.2, %v2928_v33  ;;  %v2945_v30 = vmul.f32 0.2, %v2929_v61  ;;  %v2930_v58 = vadd.f32 %v5616_v24, %v2893_v37 }
 0xd41   : > { %v5662_v52 = vadd.f32 %v5332_v51, %v2958_v46  ;;  %v5667_v14 = vadd.f32 %v5394_v17, %v2959_v32  ;;  %v2931_v49 = vadd.f32 %v5616_v24, %v5609_v42  ;;  %v2932_v37 = vadd.f32 %v5616_v24, %v5613_v44 }
 0xd42   : > { %2985 = vmax.xlane.f32.xlu1 %v5632_v40  ;;  %v2960_v11 = vmax.f32 %v2928_v33, %v2944_v41  ;;  %v2961_v51 = vmax.f32 %v2929_v61, %v2945_v30  ;;  %v2946_v2 = vmul.f32 0.2, %v2930_v58  ;;  %v2933_v42 = vadd.f32 %v5616_v24, %v5611_v7 }
 0xd43   : > { %v2947_v56 = vmul.f32 0.2, %v2931_v49  ;;  %v2948_v22 = vmul.f32 0.2, %v2932_v37 }
 0xd44   : > { %v5672_v8 = vadd.f32 %v5402_v12, %v2960_v11  ;;  %v5678_v59 = vadd.f32 %v5410_v50, %v2961_v51  ;;  %v2962_v17 = vmax.f32 %v2930_v58, %v2946_v2  ;;  %v2949_v53 = vmul.f32 0.2, %v2933_v42 }
 0xd45   : > { %v2963_v25 = vmax.f32 %v2931_v49, %v2947_v56  ;;  %v2964_v26 = vmax.f32 %v2932_v37, %v2948_v22 }
 0xd46   : > { %2987 = vmax.xlane.f32.xlu1 %v5637_v19  ;;  %v5684_v12 = vadd.f32 %v5419_v29, %v2962_v17  ;;  %v2965_v10 = vmax.f32 %v2933_v42, %v2949_v53 }
 0xd47   : > { %v5690_v50 = vadd.f32 %v5427_v35, %v2963_v25  ;;  %v5694_v44 = vadd.f32 %v5434_v43, %v2964_v26 }
 0xd48   : > { %v5698_v29 = vadd.f32 %v5441_v4, %v2965_v10 }
 0xd4a   : > { %2989 = vmax.xlane.f32.xlu1 %v5642_v38 }
 0xd4e   : > { %2991 = vmax.xlane.f32.xlu1 %v5647_v3 }
 0xd52   : > { %2993 = vmax.xlane.f32.xlu1 %v5652_v13 }
 0xd56   : > { %2995 = vmax.xlane.f32.xlu1 %v5657_v34 }
 0xd5a   : > { %2997 = vmax.xlane.f32.xlu1 %v5662_v52 }
 0xd5e   : > { %2999 = vmax.xlane.f32.xlu1 %v5667_v14 }
 0xd62   : > { %3001 = vmax.xlane.f32.xlu1 %v5672_v8 }
 0xd66   : > { %3003 = vmax.xlane.f32.xlu1 %v5678_v59 }
 0xd6a   : > { %3005 = vmax.xlane.f32.xlu1 %v5684_v12 }
 0xd6e   : > { %3007 = vmax.xlane.f32.xlu1 %v5690_v50 }
 0xd72   : > { %3009 = vmax.xlane.f32.xlu1 %v5694_v44 }
 0xd76   : > { %3011 = vmax.xlane.f32.xlu1 %v5698_v29 }
 0xdc7   : > { %v2984_v7 = vpop.xlane.xlu1 %2983 }
 0xdc8   : > { %v3015_v24 = vsub.f32 %v5624_v15, %v2984_v7 }
 0xdca   : > { %v3031_v35 = vmul.f32 1.442695, %v3015_v24 }
 0xdcb   : > { %v2986_v36 = vpop.xlane.xlu1 %2985 }
 0xdcc   : > { %v3016_v27 = vsub.f32 %v5632_v40, %v2986_v36  ;;  %4345 = vpow2.f32 %v3031_v35 }
 0xdce   : > { %v3033_v16 = vmul.f32 1.442695, %v3016_v27 }
 0xdcf   : > { %v2988_v39 = vpop.xlane.xlu1 %2987 }
 0xdd0   : > { %4347 = vpow2.f32 %v3033_v16  ;;  %v3017_v43 = vsub.f32 %v5637_v19, %v2988_v39 }
 0xdd2   : > { %v3035_v9 = vmul.f32 1.442695, %v3017_v43 }
 0xdd3   : > { %v2990_v6 = vpop.xlane.xlu1 %2989 }
 0xdd4   : > { %4349 = vpow2.f32 %v3035_v9  ;;  %v3018_v4 = vsub.f32 %v5642_v38, %v2990_v6 }
 0xdd6   : > { %v3037_v20 = vmul.f32 1.442695, %v3018_v4 }
 0xdd7   : > { %v2992_v47 = vpop.xlane.xlu1 %2991 }
 0xdd8   : > { %4351 = vpow2.f32 %v3037_v20  ;;  %v3019_v15 = vsub.f32 %v5647_v3, %v2992_v47 }
 0xdd9   : > { %v5706_v54 = vpop.eup %4345 }
 0xdda   : > { %v3039_v45 = vmul.f32 1.442695, %v3019_v15  ;;  %3063 = vadd.xlane.f32.xlu1 %v5706_v54 }
 0xddb   : > { %v2994_v40 = vpop.xlane.xlu1 %2993 }
 0xddc   : > { %4353 = vpow2.f32 %v3039_v45  ;;  %v3020_v63 = vsub.f32 %v5652_v13, %v2994_v40 }
 0xddd   : > { %v5710_v19 = vpop.eup %4347 }
 0xdde   : > { %v3041_v21 = vmul.f32 1.442695, %v3020_v63  ;;  %3065 = vadd.xlane.f32.xlu1 %v5710_v19 }
 0xddf   : > { %v2996_v28 = vpop.xlane.xlu1 %2995 }
 0xde0   : > { %4355 = vpow2.f32 %v3041_v21  ;;  %v3021_v38 = vsub.f32 %v5657_v34, %v2996_v28 }
 0xde1   : > { %v5714_v5 = vpop.eup %4349 }
 0xde2   : > { %v3043_v0 = vmul.f32 1.442695, %v3021_v38  ;;  %3067 = vadd.xlane.f32.xlu1 %v5714_v5 }
 0xde3   : > { %v2998_v18 = vpop.xlane.xlu1 %2997 }
 0xde4   : > { %4357 = vpow2.f32 %v3043_v0  ;;  %v3022_v3 = vsub.f32 %v5662_v52, %v2998_v18 }
 0xde5   : > { %v5718_v31 = vpop.eup %4351 }
 0xde6   : > { %v3045_v60 = vmul.f32 1.442695, %v3022_v3  ;;  %3069 = vadd.xlane.f32.xlu1 %v5718_v31 }
 0xde7   : > { %v3000_v55 = vpop.xlane.xlu1 %2999 }
 0xde8   : > { %4359 = vpow2.f32 %v3045_v60  ;;  %v3023_v13 = vsub.f32 %v5667_v14, %v3000_v55 }
 0xde9   : > { %v5722_v23 = vpop.eup %4353 }
 0xdea   : > { %v3047_v48 = vmul.f32 1.442695, %v3023_v13  ;;  %3071 = vadd.xlane.f32.xlu1 %v5722_v23 }
 0xdeb   : > { %v3002_v1 = vpop.xlane.xlu1 %3001 }
 0xdec   : > { %4361 = vpow2.f32 %v3047_v48  ;;  %v3024_v34 = vsub.f32 %v5672_v8, %v3002_v1  ;;  %v3014_v8 = vpop.xlane.xlu0 %3013 }
 0xded   : > { %v5726_v46 = vpop.eup %4355 }
 0xdee   : > { %v3049_v57 = vmul.f32 1.442695, %v3024_v34  ;;  %3073 = vadd.xlane.f32.xlu1 %v5726_v46 }
 0xdef   : > { %v3004_v33 = vpop.xlane.xlu1 %3003 }
 0xdf0   : > { %4363 = vpow2.f32 %v3049_v57  ;;  %v3025_v52 = vsub.f32 %v5678_v59, %v3004_v33  ;;  %v3030_v59 = vsub.f32 %v5627_v62, %v3014_v8 }
 0xdf1   : > { %v5730_v32 = vpop.eup %4357 }
 0xdf2   : > { %v3051_v41 = vmul.f32 1.442695, %v3025_v52  ;;  %3075 = vadd.xlane.f32.xlu1 %v5730_v32  ;;  %v3061_v25 = vmul.f32 1.442695, %v3030_v59 }
 0xdf3   : > { %v3006_v61 = vpop.xlane.xlu1 %3005 }
 0xdf4   : > { %4365 = vpow2.f32 %v3051_v41  ;;  %v3026_v14 = vsub.f32 %v5684_v12, %v3006_v61 }
 0xdf5   : > { %v5734_v11 = vpop.eup %4359 }
 0xdf6   : > { %v3053_v30 = vmul.f32 1.442695, %v3026_v14  ;;  %3077 = vadd.xlane.f32.xlu1 %v5734_v11 }
 0xdf7   : > { %v3008_v58 = vpop.xlane.xlu1 %3007 }
 0xdf8   : > { %4367 = vpow2.f32 %v3053_v30  ;;  %v3027_v51 = vsub.f32 %v5690_v50, %v3008_v58 }
 0xdf9   : > { %v5738_v2 = vpop.eup %4361 }
 0xdfa   : > { %v3055_v49 = vmul.f32 1.442695, %v3027_v51  ;;  %3079 = vadd.xlane.f32.xlu1 %v5738_v2 }
 0xdfb   : > { %v3010_v17 = vpop.xlane.xlu1 %3009 }
 0xdfc   : > { %4369 = vpow2.f32 %v3055_v49  ;;  %v3028_v56 = vsub.f32 %v5694_v44, %v3010_v17 }
 0xdfd   : > { %v5743_v37 = vpop.eup %4363 }
 0xdfe   : > { %v3057_v12 = vmul.f32 1.442695, %v3028_v56  ;;  %3081 = vadd.xlane.f32.xlu1 %v5743_v37 }
 0xdff   : > { %v3012_v22 = vpop.xlane.xlu1 %3011 }
 0xe00   : > { %4371 = vpow2.f32 %v3057_v12  ;;  %v3029_v42 = vsub.f32 %v5698_v29, %v3012_v22 }
 0xe01   : > { %v5747_v50 = vpop.eup %4365  ;;  %4373 = vpow2.f32 %v3061_v25 }
 0xe02   : > { %v3059_v26 = vmul.f32 1.442695, %v3029_v42  ;;  %3083 = vadd.xlane.f32.xlu1 %v5747_v50  ;;  %v4145_v42 = vld [vmem:[%s5785_s17 + $0x10] sm:$0xff]  }
 0xe04   : > { %4375 = vpow2.f32 %v3059_v26 }
 0xe05   : > { %v5750_v62 = vpop.eup %4367 }
 0xe06   : > { %3085 = vadd.xlane.f32.xlu0 %v5750_v62 }
 0xe09   : > { %v5753_v53 = vpop.eup %4369 }
 0xe0a   : > { %3087 = vadd.xlane.f32.xlu1 %v5753_v53 }
 0xe0d   : > { %v5756_v44 = vpop.eup %4371 }
 0xe0e   : > { %3089 = vadd.xlane.f32.xlu0 %v5756_v44  ;;  %v5759_v10 = vpop.eup %4373 }
 0xe11   : > { %v5761_v29 = vpop.eup %4375 }
 0xe12   : > { %3093 = vadd.xlane.f32.xlu0 %v5759_v10  ;;  %3091 = vadd.xlane.f32.xlu1 %v5761_v29 }
 0xe63   : > { %v3064_v7 = vpop.xlane.xlu1 %3063 }
 0xe64   : > { %4377 = vrcp.f32 %v3064_v7 }
 0xe67   : > { %v3066_v24 = vpop.xlane.xlu1 %3065 }
 0xe68   : > { %4379 = vrcp.f32 %v3066_v24 }
 0xe6b   : > { %v3068_v35 = vpop.xlane.xlu1 %3067 }
 0xe6c   : > { %4381 = vrcp.f32 %v3068_v35 }
 0xe6f   : > { %v3070_v36 = vpop.xlane.xlu1 %3069 }
 0xe70   : > { %4383 = vrcp.f32 %v3070_v36 }
 0xe71   : > { %v4378_v27 = vpop.eup %4377 }
 0xe72   : > { %v3111_v43 = vmul.f32 %v4378_v27, %v5706_v54 }
 0xe73   : > { %v3072_v16 = vpop.xlane.xlu1 %3071 }
 0xe74   : > { %4385 = vrcp.f32 %v3072_v16 }
 0xe75   : > { %v4380_v39 = vpop.eup %4379 }
 0xe76   : > { %v3112_v9 = vmul.f32 %v4380_v39, %v5710_v19 }
 0xe77   : > { %v3074_v6 = vpop.xlane.xlu1 %3073 }
 0xe78   : > { %4387 = vrcp.f32 %v3074_v6  ;;  %v3127_v4 = vpack.c.bf16 %v3112_v9, %v3111_v43  ;;  %v3689_v9 = vld [vmem:[%s5877_s7 + $0x3] ss:$0 sm:$0xff] }
 0xe79   : > { %v4382_v20 = vpop.eup %4381 }
 0xe7a   : > { %3936 = vmatprep.mubr.bf16.mxu1 %v3127_v4  ;;  %v3113_v45 = vmul.f32 %v4382_v20, %v5714_v5 }
 0xe7b   : > { %v3076_v47 = vpop.xlane.xlu1 %3075 }
 0xe7c   : > { %4389 = vrcp.f32 %v3076_v47 }
 0xe7d   : > { %v4384_v15 = vpop.eup %4383 }
 0xe7e   : > { %v3114_v40 = vmul.f32 %v4384_v15, %v5718_v31 }
 0xe7f   : > { %v3078_v63 = vpop.xlane.xlu1 %3077 }
 0xe80   : > { %4391 = vrcp.f32 %v3078_v63  ;;  %v3128_v21 = vpack.c.bf16 %v3114_v40, %v3113_v45 }
 0xe81   : > { %v4386_v28 = vpop.eup %4385 }
 0xe82   : > { %3937 = vmatmul.mubr.bf16.vlgmr.msra.gmra.mxu1 %v3128_v21  ;;  %v3115_v19 = vmul.f32 %v4386_v28, %v5722_v23 }
 0xe83   : > { %v3080_v54 = vpop.xlane.xlu1 %3079 }
 0xe84   : > { %4393 = vrcp.f32 %v3080_v54 }
 0xe85   : > { %v4388_v38 = vpop.eup %4387 }
 0xe86   : > { %v3116_v0 = vmul.f32 %v4388_v38, %v5726_v46 }
 0xe87   : > { %v3082_v18 = vpop.xlane.xlu1 %3081 }
 0xe88   : > { %4395 = vrcp.f32 %v3082_v18  ;;  %v3129_v3 = vpack.c.bf16 %v3116_v0, %v3115_v19 }
 0xe89   : > { %v4390_v60 = vpop.eup %4389 }
 0xe8a   : > { %3940 = vmatprep.mubr.bf16.mxu1 %v3129_v3  ;;  %v3117_v13 = vmul.f32 %v4390_v60, %v5730_v32 }
 0xe8b   : > { %v3084_v5 = vpop.xlane.xlu1 %3083 }
 0xe8c   : > { %4397 = vrcp.f32 %v3084_v5 }
 0xe8d   : > { %v4392_v55 = vpop.eup %4391 }
 0xe8e   : > { %v3118_v48 = vmul.f32 %v4392_v55, %v5734_v11 }
 0xe8f   : > { %v3086_v31 = vpop.xlane.xlu0 %3085 }
 0xe90   : > { %4399 = vrcp.f32 %v3086_v31  ;;  %v3130_v1 = vpack.c.bf16 %v3118_v48, %v3117_v13 }
 0xe91   : > { %v4394_v23 = vpop.eup %4393 }
 0xe92   : > { %3941 = vmatmul.mubr.bf16.gmra.mxu1 %v3130_v1  ;;  %v3119_v33 = vmul.f32 %v4394_v23, %v5738_v2 }
 0xe93   : > { %v3088_v34 = vpop.xlane.xlu1 %3087 }
 0xe94   : > { %4401 = vrcp.f32 %v3088_v34 }
 0xe95   : > { %v4396_v57 = vpop.eup %4395 }
 0xe96   : > { %v3120_v52 = vmul.f32 %v4396_v57, %v5743_v37 }
 0xe97   : > { %v3090_v46 = vpop.xlane.xlu0 %3089 }
 0xe98   : > { %4403 = vrcp.f32 %v3090_v46  ;;  %v3131_v41 = vpack.c.bf16 %v3120_v52, %v3119_v33  ;;  %v4146_v46 = vld [vmem:[%s5785_s17 + $0x18] sm:$0xff]   ;;  %v4151_v33 = vld [vmem:[%s5785_s17 + $0x8] sm:$0xff]   ;;  %v4147_v52 = vld [vmem:[%s5785_s17 + $0x20] sm:$0xff]  }
 0xe99   : > { %v4398_v61 = vpop.eup %4397 }
 0xe9a   : > { %3944 = vmatprep.mubr.bf16.mxu1 %v3131_v41  ;;  %v3121_v30 = vmul.f32 %v4398_v61, %v5747_v50  ;;  %v4149_v50 = vld [vmem:[%s5785_s17] sm:$0xff]   ;;  %v4148_v41 = vld [vmem:[%s5785_s17 + $0x28] sm:$0xff]   ;;  %v4150_v61 = vld [vmem:[%s5785_s17 + $0x30] sm:$0xff]  }
 0xe9b   : > { %v3094_v14 = vpop.xlane.xlu0 %3093  ;;  %v3092_v32 = vpop.xlane.xlu1 %3091  ;;  %3968 = vmatprep.mubr.bf16.mxu0 %v4149_v50 }
 0xe9c   : > { %4405 = vrcp.f32 %v3094_v14  ;;  %v4152_v14 = vld [vmem:[%s5785_s17 + $0x38] sm:$0xff]   ;;  %s4429_s17 = sshll.u32 %s4489_s13, 4  ;;  %s4430_s17 = int_to_ptr.vmem [resolvable:$false] %s4429_s17 }
 0xe9d   : > { %v4400_v11 = vpop.eup %4399  ;;  %4407 = vrcp.f32 %v3092_v32  ;;  %s4431_s21 = scalar_lea.vmem %s4430_s17, 4096  ;;  %p4432_p0 = scmp.lt.s32.totalorder %s5824_s25, %s4430_s17 }
 0xe9e   : > { %v3122_v58 = vmul.f32 %v4400_v11, %v5750_v62  ;;  %p4433_p1 = scmp.lt.s32.totalorder %s4431_s21, %s4425_s9 }
 0xea0   : > { %v3132_v8 = vpack.c.bf16 %v3122_v58, %v3121_v30  ;;  %p4434_p2 = por %p4433_p1, %p4432_p0 }
 0xea1   : > { %v4402_v51 = vpop.eup %4401 }
 0xea2   : > { %3945 = vmatmul.mubr.bf16.gmra.mxu1 %v3132_v8  ;;  %v3123_v49 = vmul.f32 %v4402_v51, %v5753_v53  ;;  %p4435_p3 = pnand %p4434_p2, %p4428_p13 }
 0xea5   : > { %v4404_v2 = vpop.eup %4403 }
 0xea6   : > { %v3124_v59 = vmul.f32 %v4404_v2, %v5756_v44 }
 0xea8   : > { %v3133_v17 = vpack.c.bf16 %v3124_v59, %v3123_v49 }
 0xea9   : > { %v4406_v56 = vpop.eup %4405 }
 0xeaa   : > { %v4408_v37 = vpop.eup %4407  ;;  %3948 = vmatprep.mubr.bf16.mxu1 %v3133_v17  ;;  %v3126_v12 = vmul.f32 %v4406_v56, %v5759_v10 }
 0xeab   : > { %v3125_v25 = vmul.f32 %v4408_v37, %v5761_v29 }
 0xead   : > { %v3134_v22 = vpack.c.bf16 %v3126_v12, %v3125_v25 }
 0xeaf   : > { %3949 = vmatmul.mubr.bf16.gmra.mxu1 %v3134_v22 }
 0xeb0   : > { %3972 = vmatprep.mubr.bf16.mxu1 %v4145_v42 }
 0xf42   : > { %v3938_v26 = vpop.f32.mrf.mxu1 }
 0xf43   : > { %v3194_v48 = vadd.f32 %v3938_v26, %v3689_v9 }
 0xf44   : > { %v3185_v62 = vpop.f32.mrf.mxu1 }
 0xf45   : > { %v3186_v23 = vadd.f32 %v3689_v9, %v3185_v62 }
 0xf46   : > { %v3939_v53 = vpop.f32.mrf.mxu1 }
 0xf47   : > { %v3197_v31 = vadd.f32 %v3939_v53, %v3689_v9 }
 0xf48   : > { %v3188_v44 = vpop.f32.mrf.mxu1 }
 0xf49   : > { %v3249_v1 = vpack.c.bf16 %v3197_v31, %v3194_v48  ;;  %v3189_v34 = vadd.f32 %v3689_v9, %v3188_v44 }
 0xf4b   : > { %v3248_v57 = vpack.c.bf16 %v3189_v34, %v3186_v23 }
 0xf52   : > { %v3942_v10 = vpop.f32.mrf.mxu1 }
 0xf53   : > { %v3210_v3 = vadd.f32 %v3942_v10, %v3689_v9 }
 0xf54   : > { %v3201_v29 = vpop.f32.mrf.mxu1 }
 0xf55   : > { %v3202_v55 = vadd.f32 %v3689_v9, %v3201_v29 }
 0xf56   : > { %v3943_v7 = vpop.f32.mrf.mxu1 }
 0xf57   : > { %v3213_v0 = vadd.f32 %v3943_v7, %v3689_v9 }
 0xf58   : > { %v3204_v24 = vpop.f32.mrf.mxu1 }
 0xf59   : > { %v3251_v60 = vpack.c.bf16 %v3213_v0, %v3210_v3  ;;  %v3205_v5 = vadd.f32 %v3689_v9, %v3204_v24 }
 0xf5b   : > { %v3250_v13 = vpack.c.bf16 %v3205_v5, %v3202_v55 }
 0xf62   : > { %v3946_v35 = vpop.f32.mrf.mxu1 }
 0xf63   : > { %v3226_v28 = vadd.f32 %v3946_v35, %v3689_v9 }
 0xf64   : > { %v3217_v36 = vpop.f32.mrf.mxu1 }
 0xf65   : > { %v3218_v19 = vadd.f32 %v3689_v9, %v3217_v36 }
 0xf66   : > { %v3947_v27 = vpop.f32.mrf.mxu1 }
 0xf67   : > { %v3229_v63 = vadd.f32 %v3947_v27, %v3689_v9 }
 0xf68   : > { %v3220_v16 = vpop.f32.mrf.mxu1 }
 0xf69   : > { %v3253_v54 = vpack.c.bf16 %v3229_v63, %v3226_v28  ;;  %v3221_v38 = vadd.f32 %v3689_v9, %v3220_v16 }
 0xf6b   : > { %v3252_v18 = vpack.c.bf16 %v3221_v38, %v3218_v19 }
 0xf6f   : > { %v3950_v39 = vpop.f32.mrf.mxu1 }
 0xf70   : > { %v3242_v4 = vadd.f32 %v3950_v39, %v3689_v9 }
 0xf71   : > { %v3233_v43 = vpop.f32.mrf.mxu1 }
 0xf72   : > { %v3234_v15 = vadd.f32 %v3689_v9, %v3233_v43 }
 0xf73   : > { %v3951_v6 = vpop.f32.mrf.mxu1 }
 0xf74   : > { %v3245_v20 = vadd.f32 %v3951_v6, %v3689_v9 }
 0xf75   : > { %v3236_v47 = vpop.f32.mrf.mxu1 }
 0xf76   : > { %v3255_v45 = vpack.c.bf16 %v3245_v20, %v3242_v4  ;;  %v3237_v40 = vadd.f32 %v3689_v9, %v3236_v47 }
 0xf78   : > { %v3254_v21 = vpack.c.bf16 %v3237_v40, %v3234_v15  ;;  %3952 = vmatprep.subr.bf16.mxu0 %v3255_v45  ;;  %3984 = vmatprep.subr.bf16.mxu1 %v3255_v45 }
 0xf79   : > { %3953 = vmatpush3.bf16.msra.mxu0 %v3255_v45  ;;  %3992 = vmatpush3.bf16.msra.mxu1 %v3255_v45 }
 0xf7a   : > { %3954 = vmatprep.subr.bf16.mxu0 %v3254_v21  ;;  %3985 = vmatprep.subr.bf16.mxu1 %v3254_v21 }
 0xf7d   : > { %3955 = vmatpush3.bf16.msra.mxu0 %v3254_v21  ;;  %3993 = vmatpush3.bf16.msra.mxu1 %v3254_v21 }
 0xf7e   : > { %3956 = vmatprep.subr.bf16.mxu0 %v3253_v54  ;;  %3986 = vmatprep.subr.bf16.mxu1 %v3253_v54 }
 0xf81   : > { %3957 = vmatpush3.bf16.msra.mxu0 %v3253_v54  ;;  %3994 = vmatpush3.bf16.msra.mxu1 %v3253_v54 }
 0xf82   : > { %3958 = vmatprep.subr.bf16.mxu0 %v3252_v18  ;;  %3987 = vmatprep.subr.bf16.mxu1 %v3252_v18 }
 0xf85   : > { %3959 = vmatpush3.bf16.msra.mxu0 %v3252_v18  ;;  %3995 = vmatpush3.bf16.msra.mxu1 %v3252_v18 }
 0xf86   : > { %3960 = vmatprep.subr.bf16.mxu0 %v3251_v60  ;;  %3988 = vmatprep.subr.bf16.mxu1 %v3251_v60 }
 0xf89   : > { %3961 = vmatpush3.bf16.msra.mxu0 %v3251_v60  ;;  %3996 = vmatpush3.bf16.msra.mxu1 %v3251_v60 }
 0xf8a   : > { %3962 = vmatprep.subr.bf16.mxu0 %v3250_v13  ;;  %3989 = vmatprep.subr.bf16.mxu1 %v3250_v13 }
 0xf8d   : > { %3963 = vmatpush3.bf16.msra.mxu0 %v3250_v13  ;;  %3997 = vmatpush3.bf16.msra.mxu1 %v3250_v13 }
 0xf8e   : > { %3964 = vmatprep.subr.bf16.mxu0 %v3249_v1  ;;  %3990 = vmatprep.subr.bf16.mxu1 %v3249_v1 }
 0xf91   : > { %3965 = vmatpush3.bf16.msra.mxu0 %v3249_v1  ;;  %3998 = vmatpush3.bf16.msra.mxu1 %v3249_v1 }
 0xf92   : > { %3966 = vmatprep.subr.bf16.mxu0 %v3248_v57  ;;  %3991 = vmatprep.subr.bf16.mxu1 %v3248_v57 }
 0xf95   : > { %3967 = vmatpush3.bf16.msra.mxu0 %v3248_v57  ;;  %3999 = vmatpush3.bf16.msra.mxu1 %v3248_v57 }
 0xf98   : > { %3973 = vmatmul.mubr.bf16.vlgmr.msra.gmra.mxu1 %v4146_v46  ;;  %3969 = vmatmul.mubr.bf16.vlgmr.msra.gmra.mxu0 %v4151_v33 }
 0xf99   : > { %3976 = vmatprep.mubr.bf16.mxu1 %v4147_v52 }
 0xfa0   : > { %3977 = vmatmul.mubr.bf16.gmra.mxu1 %v4148_v41 }
 0xfa1   : > { %3980 = vmatprep.mubr.bf16.mxu1 %v4150_v61 }
 0xfa8   : > { %3981 = vmatmul.mubr.bf16.gmra.mxu1 %v4152_v14 }
0x1058   : > { %v3974_v32 = vpop.f32.mrf.mxu1  ;;  %v3970_v11 = vpop.f32.mrf.mxu0 }
0x1059   : > { %3423 = vst [vmem:[%s5801_s22 + $0x30] sm:$0xff] %v3974_v32  ;;  %3419 = vst [vmem:[%s5801_s22 + $0x10] sm:$0xff] %v3970_v11 }
0x105a   : > { %v3370_v30 = vpop.f32.mrf.mxu1  ;;  %v3354_v58 = vpop.f32.mrf.mxu0 }
0x105b   : > { %3421 = vst [vmem:[%s5801_s22 + $0x20] sm:$0xff] %v3370_v30  ;;  %3417 = vst [vmem:[%s5801_s22] sm:$0xff] %v3354_v58 }
0x105c   : > { %v3975_v8 = vpop.f32.mrf.mxu1  ;;  %v3971_v51 = vpop.f32.mrf.mxu0 }
0x105d   : > { %3424 = vst [vmem:[%s5801_s22 + $0x38] sm:$0xff] %v3975_v8  ;;  %3420 = vst [vmem:[%s5801_s22 + $0x18] sm:$0xff] %v3971_v51 }
0x105e   : > { %v3373_v2 = vpop.f32.mrf.mxu1  ;;  %v3357_v49 = vpop.f32.mrf.mxu0 }
0x105f   : > { %3422 = vst [vmem:[%s5801_s22 + $0x28] sm:$0xff] %v3373_v2  ;;  %3418 = vst [vmem:[%s5801_s22 + $0x8] sm:$0xff] %v3357_v49 }
0x1060   : > { %v3978_v59 = vpop.f32.mrf.mxu1 }
0x1061   : > { %3427 = vst [vmem:[%s5801_s22 + $0x50] sm:$0xff] %v3978_v59 }
0x1062   : > { %v3386_v17 = vpop.f32.mrf.mxu1 }
0x1063   : > { %3425 = vst [vmem:[%s5801_s22 + $0x40] sm:$0xff] %v3386_v17 }
0x1064   : > { %v3979_v56 = vpop.f32.mrf.mxu1 }
0x1065   : > { %3428 = vst [vmem:[%s5801_s22 + $0x58] sm:$0xff] %v3979_v56 }
0x1066   : > { %v3389_v37 = vpop.f32.mrf.mxu1 }
0x1067   : > { %3426 = vst [vmem:[%s5801_s22 + $0x48] sm:$0xff] %v3389_v37 }
0x1068   : > { %v3982_v12 = vpop.f32.mrf.mxu1 }
0x1069   : > { %3431 = vst [vmem:[%s5801_s22 + $0x70] sm:$0xff] %v3982_v12 }
0x106a   : > { %v3402_v25 = vpop.f32.mrf.mxu1 }
0x106b   : > { %3429 = vst [vmem:[%s5801_s22 + $0x60] sm:$0xff] %v3402_v25 }
0x106c   : > { %v3983_v22 = vpop.f32.mrf.mxu1 }
0x106d   : > { %3432 = vst [vmem:[%s5801_s22 + $0x78] sm:$0xff] %v3983_v22 }
0x106e   : > { %v3405_v42 = vpop.f32.mrf.mxu1 }
0x106f   : > { %3430 = vst [vmem:[%s5801_s22 + $0x68] sm:$0xff] %v3405_v42 }
0x1070   : > { %4438 = shalt.err (!%p4435_p3)
}
0x1071   : > { %s4439_s18 = scalar_lea.hbm %s5822_s24, 2048  ;;  %s4443_s22 = scalar_lea.hbm %s5878_s8, 4096 }
0x1072   : > { %p4440_p4 = scmp.ne.s32.totalorder %s5822_s24, %s4439_s18  ;;  %p4444_p9 = scmp.lt.s32.totalorder %s5822_s24, %s5878_s8 }
0x1073   : > { %p4445_p10 = scmp.lt.s32.totalorder %s4443_s22, %s4439_s18 }
0x1074   : > { %p4441_p7 = pnand %p4440_p4, %p4575_p5 }
0x1075   : > { %p4446_p11 = por %p4445_p10, %p4444_p9 }
0x1076   : > { %p4442_p8 = pneg %p4441_p7 }
0x1078   : > { %p4447_p12 = pnand %p4446_p11, %p4442_p8 }
0x107a   : > { %4450 = shalt.err (!%p4447_p12)
}
0x107b   : > { %s4490_s10 = smov 128   ;;  %s4491_s9 = smov 8  }
0x107c   : > { %4000 = dma.vmem_to_hbm [thread:$0]  (%p4575_p5), %s5824_s25, 2048, %s5822_s24, %s5830_s12, %s4490_s10, %s4490_s10, %s4491_s9  }
0x107d PF: > { %p4006_p13 = scmp.ge.s32.totalorder %s4485_s30, 2  ;;  %s3462_s13 = sand.u32 1, %s4473_s27  }
0x107e   : > { %s3463_s17 = scalar_lea.sflag [#allocation3], %s3462_s13 }
0x107f   : > { %p4003_p0 = pnand %p4006_p13, %p4579_p6 }
0x1081   : > { %p4004_p1 = pneg %p4003_p0 }
0x1083   : > { %4468 = dma.done.wait (%p4004_p1), %s3463_s17, 2048  }
0x1084   : > { %4470 = vsyncadd (%p4004_p1), %s3463_s17, 4294965248  ;;  %p18_p2 = scmp.ge.s32.totalorder %s4562_s11, 4   ;;  %s5881_s27 = smov %s4477_s28 }
0x1085   : > { %s5882_s28 = smov %s4481_s29  ;;  %s5883_s29 = smov %s4573_s14 }
0x1086   : > { %s5884_s30 = smov %s4562_s11  ;;  %20 = sbr.rel (!%p18_p2) target bundleno = 3 (0x3), region = 102 }
0x108b   :  { %3468 = vsyncpa [#allocation3], 1 }
0x108c   :  { %3470 = vsyncpa [#allocation3 + $0x1], 1 }

</bundles_post_ra>
